<compile_context>
chip_gen: v5e
topology: v5e:2x2
jax: 0.10.0
libtpu: 0.0.40
codegen_flags: <defaults>
</compile_context>

<pallas_src>
import math

import jax
import jax.numpy as jnp
from jax.experimental import pallas as pl
from jax.experimental.pallas import tpu as pltpu

LANE = 128   # lane width (batch axis tiling unit)
SUB = 8      # sublane alignment for slab row offsets


# ----------------------------------------------------------------------------- helpers
def _round_up(n, m):
    return ((n + m - 1) // m) * m


def _silu(x):
    return x * jax.nn.sigmoid(x)


def _marginal_prob_std(t, sigma):
    # TODO(synk): marginal_prob_std is not defined in the provided module; this is the
    # standard VE-SDE form sqrt((sigma^(2t) - 1) / (2 ln sigma)) from score-SDE code.
    log_sigma = math.log(sigma)
    return jnp.sqrt((jnp.exp(2.0 * t * log_sigma) - 1.0) / (2.0 * log_sigma))


def _layernorm_cols(x, gamma, beta, eps):
    """LayerNorm over the feature (sublane) axis. x: (F, TB); gamma/beta: (F, 1)."""
    mu = jnp.mean(x, axis=0, keepdims=True)
    xc = x - mu
    var = jnp.mean(xc * xc, axis=0, keepdims=True)
    return xc * jax.lax.rsqrt(var + eps) * gamma + beta


# ----------------------------------------------------------------------------- weight slabs
class _SlabBuilder:
    """Packs the many tiny parameters into two resident slabs.

    Matrices (cols > 1) are row-packed at 8-aligned offsets into a (Rm, 128) slab.
    Column vectors (biases / norm params, cols == 1) each occupy one lane column
    of a shared (Rv, 128) slab.  Handles are static and resolved in the kernel.
    """

    def __init__(self):
        self.mats = []
        self.vecs = []
        self.mat_off = 0

    def add(self, p):
        p = jnp.asarray(p, jnp.float32)
        if p.ndim == 1:
            p = p.reshape(-1, 1)
        r, c = p.shape
        if c == 1:
            j = len(self.vecs)
            self.vecs.append(p)
            return ("v", j, r)
        h = ("m", self.mat_off, r, c)
        self.mats.append((self.mat_off, p))
        self.mat_off += _round_up(r, SUB)
        return h

    def finish(self):
        rm = _round_up(max(self.mat_off, SUB), SUB)
        cm = _round_up(max(p.shape[1] for _, p in self.mats), LANE)
        mat = jnp.zeros((rm, cm), jnp.float32)
        for off, p in self.mats:
            mat = mat.at[off:off + p.shape[0], 0:p.shape[1]].set(p)

        rv = _round_up(max(p.shape[0] for p in self.vecs), SUB)
        cv = _round_up(len(self.vecs), LANE)
        vec = jnp.zeros((rv, cv), jnp.float32)
        for j, p in enumerate(self.vecs):
            vec = vec.at[0:p.shape[0], j:j + 1].set(p)
        return mat, vec


def _build_plan(gfp_w, flat, block_dims, ndim, ted):
    """Build the (mat_slab, vec_slab, handle_plan) for the kernel."""
    half = ted // 2
    # GFP without an in-kernel concat: cat([sin p, cos p]) == sin(cat([p, p]) + [0, pi/2])
    w_col = jnp.concatenate([gfp_w, gfp_w]).reshape(ted, 1).astype(jnp.float32)
    ph_col = jnp.concatenate(
        [jnp.zeros((half,), jnp.float32),
         jnp.full((half,), 0.5 * math.pi, jnp.float32)]).reshape(ted, 1)

    sb = _SlabBuilder()
    plan = [sb.add(w_col), sb.add(ph_col)]
    it = iter(flat)
    for fin, fout in block_dims:
        n0g, n0b, fc0w, fc0b, afw, afb, n1g, n1b, fc1w, fc1b = [next(it) for _ in range(10)]
        plan += [sb.add(n0g), sb.add(n0b),
                 sb.add(fc0w), sb.add(fc0b),
                 # torch chunk(2, dim=1): scale = first fout output rows, shift = second.
                 sb.add(afw[:fout, :]), sb.add(afb[:fout]),
                 sb.add(afw[fout:, :]), sb.add(afb[fout:]),
                 sb.add(n1g), sb.add(n1b),
                 sb.add(fc1w), sb.add(fc1b)]
        if fin != fout:
            skw, skb = next(it), next(it)
            plan += [sb.add(skw), sb.add(skb)]
    finw, finb = next(it), next(it)
    plan += [sb.add(finw), sb.add(finb)]
    mat, vec = sb.finish()
    return mat, vec, tuple(plan)


# ----------------------------------------------------------------------------- kernel
def _make_kernel(block_dims, plan, sigma, eps, ndim):
    two_pi = 2.0 * math.pi

    def kernel(xt_ref, mat_ref, vec_ref, out_ref):
        def rd(h):
            if h[0] == "m":
                _, off, r, c = h
                return mat_ref[off:off + r, 0:c]
            _, j, r = h
            return vec_ref[0:r, j:j + 1]

        x = xt_ref[0:ndim, :]                       # (ndim, TB) batch on lanes
        t = xt_ref[ndim:ndim + 1, :]                # (1, TB)
        std = _marginal_prob_std(t, sigma)          # (1, TB)
        ln_std = jnp.log(std) * 0.25

        w_col, ph_col = rd(plan[0]), rd(plan[1])    # (ted, 1) each
        emb = jnp.sin(ln_std * w_col * two_pi + ph_col)      # (ted, TB)

        orig = x
        one_plus_var = 1.0 + std * std
        r_ = jax.lax.rsqrt(one_plus_var)            # (1, TB)
        h = x * r_

        idx = 2
        for fin, fout in block_dims:
            n0g, n0b = rd(plan[idx]), rd(plan[idx + 1])
            fc0w, fc0b = rd(plan[idx + 2]), rd(plan[idx + 3])
            asw, asb = rd(plan[idx + 4]), rd(plan[idx + 5])
            ahw, ahb = rd(plan[idx + 6]), rd(plan[idx + 7])
            n1g, n1b = rd(plan[idx + 8]), rd(plan[idx + 9])
            fc1w, fc1b = rd(plan[idx + 10]), rd(plan[idx + 11])
            idx += 12
            if fin != fout:
                skw, skb = rd(plan[idx]), rd(plan[idx + 1])
                idx += 2
            else:
                skw = skb = None

            h_in = h
            a = _silu(_layernorm_cols(h, n0g, n0b, eps))
            h = jnp.dot(fc0w, a, preferred_element_type=jnp.float32) + fc0b
            scale = jnp.dot(asw, emb, preferred_element_type=jnp.float32) + asb
            shift = jnp.dot(ahw, emb, preferred_element_type=jnp.float32) + ahb
            h = _silu(shift + _layernorm_cols(h, n1g, n1b, eps) * (scale + 1.0))
            h = jnp.dot(fc1w, h, preferred_element_type=jnp.float32) + fc1b
            if skw is not None:
                h = h + (jnp.dot(skw, h_in, preferred_element_type=jnp.float32) + skb)
            else:
                h = h + h_in
            # dropout(p=0, eval) and skip_scale == 1 are identities.

        finw, finb = rd(plan[idx]), rd(plan[idx + 1])
        assert idx + 2 == len(plan)
        pred = jnp.dot(finw, h, preferred_element_type=jnp.float32) + finb

        inv_std = pl.reciprocal(std, approx=True)   # EUP reciprocal on the narrow vector
        out_ref[...] = pred * inv_std - orig * (r_ * r_)   # single lane-dense store

    return kernel


# ----------------------------------------------------------------------------- wrapper
def score_model_forward(x, t, gfp_w, flat, block_dims, *, sigma, time_embed_dim,
                        eps=1e-5, tb=1024):
    """x: [B, ndim] f32, t: [B] f32, gfp_w: [time_embed_dim//2] f32 (torch-layout params)."""
    x = x.astype(jnp.float32)
    t = t.astype(jnp.float32)
    B, ndim = x.shape

    # Batch (lane) tiling: TB multiple of 128; keep >= 2 grid steps for large B so
    # both v7x TensorCores get work under dimension_semantics=("parallel",).
    bp_min = _round_up(B, LANE)
    if bp_min > LANE:
        TB = min(_round_up(tb, LANE), _round_up(max(bp_min // 2, LANE), LANE))
    else:
        TB = LANE
    Bp = _round_up(B, TB)
    grid = (Bp // TB,)

    # Pack x and t into one lane-dense streaming input (batch on lanes).
    xt = jnp.zeros((ndim + 1, Bp), jnp.float32)
    xt = xt.at[ndim, :].set(0.5)                   # benign t pad for log/std
    xt = xt.at[0:ndim, 0:B].set(x.T)
    xt = xt.at[ndim, 0:B].set(t)

    mat, vec, plan = _build_plan(gfp_w, flat, block_dims, ndim, time_embed_dim)

    out_t = pl.pallas_call(
        _make_kernel(tuple(block_dims), plan, float(sigma), float(eps), ndim),
        out_shape=jax.ShapeDtypeStruct((ndim, Bp), jnp.float32),
        grid=grid,
        in_specs=[
            pl.BlockSpec((ndim + 1, TB), lambda i: (0, i)),   # streamed x/t tile
            pl.BlockSpec(mat.shape, lambda i: (0, 0)),        # resident matrix slab
            pl.BlockSpec(vec.shape, lambda i: (0, 0)),        # resident vector slab
        ],
        out_specs=pl.BlockSpec((ndim, TB), lambda i: (0, i)),
        compiler_params=pltpu.CompilerParams(
            dimension_semantics=("parallel",),                # v7x: shard batch over 2 TCs
            vmem_limit_bytes=64 * 1024 * 1024,                # actual use is only a few MB
        ),
    )(xt, mat, vec)
    return out_t[:, :B].T


# ----------------------------------------------------------------------------- params
def init_params(key, ndim, nlayers, nhidden, time_embed_dim):
    """Deterministic demo parameters in torch layout: weights (out, in), biases (out,)."""
    block_dims = [(ndim, nhidden)] + [(nhidden, nhidden)] * (nlayers - 2)
    half = time_embed_dim // 2

    def dense(k, fin, fout):
        k1, k2 = jax.random.split(k)
        lim = 1.0 / math.sqrt(fin)
        w = jax.random.uniform(k1, (fout, fin), jnp.float32, minval=-lim, maxval=lim)
        b = jax.random.uniform(k2, (fout,), jnp.float32, minval=-lim, maxval=lim)
        return w, b

    keys = iter(jax.random.split(key, 256))
    gfp_w = jax.random.normal(next(keys), (half,), jnp.float32) * 1.0    # scale = 1

    flat = []
    for fin, fout in block_dims:
        flat.append(1.0 + 0.1 * jax.random.normal(next(keys), (fin,), jnp.float32))   # norm0 g
        flat.append(0.1 * jax.random.normal(next(keys), (fin,), jnp.float32))         # norm0 b
        flat.extend(dense(next(keys), fin, fout))                                     # fc0
        flat.extend(dense(next(keys), time_embed_dim, 2 * fout))                      # affine
        flat.append(1.0 + 0.1 * jax.random.normal(next(keys), (fout,), jnp.float32))  # norm1 g
        flat.append(0.1 * jax.random.normal(next(keys), (fout,), jnp.float32))        # norm1 b
        flat.extend(dense(next(keys), fout, fout))                                    # fc1
        if fin != fout:
            flat.extend(dense(next(keys), fin, fout))                                 # skip
    flat.extend(dense(next(keys), nhidden, ndim))                                     # final
    return block_dims, gfp_w, flat


# ----------------------------------------------------------------------------- reference
def _layernorm_rows(x, g, b, eps):
    mu = jnp.mean(x, axis=-1, keepdims=True)
    xc = x - mu
    var = jnp.mean(xc * xc, axis=-1, keepdims=True)
    return xc * jax.lax.rsqrt(var + eps) * g + b


def reference_forward(x, t, gfp_w, flat, block_dims, sigma, eps=1e-5):
    """Pure-JAX reference mirroring the torch forward (standard (B, feat) layout)."""
    x = x.astype(jnp.float32)
    std = _marginal_prob_std(t.reshape(-1, 1).astype(jnp.float32), sigma)
    ln = jnp.log(std) * 0.25
    tp = ln * gfp_w[None, :] * (2.0 * math.pi)
    emb = jnp.concatenate([jnp.sin(tp), jnp.cos(tp)], axis=-1)

    orig = x
    h = x / jnp.sqrt(1.0 + std * std)
    it = iter(flat)
    for fin, fout in block_dims:
        n0g, n0b, fc0w, fc0b, afw, afb, n1g, n1b, fc1w, fc1b = [next(it) for _ in range(10)]
        skw = skb = None
        if fin != fout:
            skw, skb = next(it), next(it)
        h_in = h
        a = _silu(_layernorm_rows(h, n0g, n0b, eps))
        h = a @ fc0w.T + fc0b
        p = emb @ afw.T + afb
        scale, shift = p[:, :fout], p[:, fout:]
        h = _silu(shift + _layernorm_rows(h, n1g, n1b, eps) * (scale + 1.0))
        h = h @ fc1w.T + fc1b
        h = h + ((h_in @ skw.T + skb) if skw is not None else h_in)
    finw, finb = next(it), next(it)
    pred = h @ finw.T + finb
    return pred / std - orig / (1.0 + std * std)


# ----------------------------------------------------------------------------- demo
if __name__ == "__main__":
    ndim, nlayers, nhidden, time_embed_dim = 2, 5, 50, 10
    sigma = 25.0
    batch = 8

    key = jax.random.PRNGKey(0)
    kp, kx, kt = jax.random.split(key, 3)
    block_dims, gfp_w, flat = init_params(kp, ndim, nlayers, nhidden, time_embed_dim)

    x = jax.random.normal(kx, (batch, ndim), dtype=jnp.float32)
    t = jax.random.uniform(kt, (batch,), dtype=jnp.float32, minval=0.2, maxval=1.0)

    out = score_model_forward(x, t, gfp_w, flat, block_dims,
                              sigma=sigma, time_embed_dim=time_embed_dim)
    out = jax.block_until_ready(out)

    ref = reference_forward(x, t, gfp_w, flat, block_dims, sigma)
    assert out.shape == (batch, ndim)
    assert jnp.allclose(out, ref, rtol=1e-2, atol=1e-2), float(jnp.max(jnp.abs(out - ref)))
    print("KERNEL_OK")
</pallas_src>

<mosaic_0001>
module attributes {stable_mosaic.version = 11 : i64} {
  func.func @kernel(%arg0: i32, %arg1: memref<3x128xf32, #tpu.memory_space<vmem>>, %arg2: memref<960x128xf32, #tpu.memory_space<vmem>>, %arg3: memref<56x128xf32, #tpu.memory_space<vmem>>, %arg4: memref<2x128xf32, #tpu.memory_space<vmem>>) attributes {dimension_semantics = [#tpu.dimension_semantics<parallel>], iteration_bounds = array<i64: 1>, scalar_prefetch = 0 : i64, scratch_operands = 0 : i64, tpu.core_type = #tpu.core_type<tc>, window_params = [{transform_indices = @transform_0, window_bounds = array<i64: 3, 128>}, {pipeline_mode = #tpu.pipeline_mode<synchronous>, transform_indices = @transform_1, window_bounds = array<i64: 960, 128>}, {pipeline_mode = #tpu.pipeline_mode<synchronous>, transform_indices = @transform_2, window_bounds = array<i64: 56, 128>}, {transform_indices = @transform_3, window_bounds = array<i64: 2, 128>}]} {
    %c0 = arith.constant 0 : index
    %c0_0 = arith.constant 0 : index
    %0 = vector.load %arg1[%c0, %c0_0] : memref<3x128xf32, #tpu.memory_space<vmem>>, vector<2x128xf32>
    %c2 = arith.constant 2 : index
    %c0_1 = arith.constant 0 : index
    %1 = vector.load %arg1[%c2, %c0_1] : memref<3x128xf32, #tpu.memory_space<vmem>>, vector<1x128xf32>
    %cst = arith.constant 2.000000e+00 : f32
    %2 = vector.broadcast %cst : f32 to vector<1x128xf32>
    %3 = arith.mulf %2, %1 : vector<1x128xf32>
    %cst_2 = arith.constant 3.21887589 : f32
    %4 = vector.broadcast %cst_2 : f32 to vector<1x128xf32>
    %5 = arith.mulf %3, %4 : vector<1x128xf32>
    %6 = math.exp %5 : vector<1x128xf32>
    %cst_3 = arith.constant 1.000000e+00 : f32
    %7 = vector.broadcast %cst_3 : f32 to vector<1x128xf32>
    %8 = arith.subf %6, %7 : vector<1x128xf32>
    %cst_4 = arith.constant 6.43775177 : f32
    %9 = vector.broadcast %cst_4 : f32 to vector<1x128xf32>
    %10 = arith.divf %8, %9 : vector<1x128xf32>
    %11 = math.sqrt %10 : vector<1x128xf32>
    %12 = math.log %11 : vector<1x128xf32>
    %cst_5 = arith.constant 2.500000e-01 : f32
    %13 = vector.broadcast %cst_5 : f32 to vector<1x128xf32>
    %14 = arith.mulf %12, %13 : vector<1x128xf32>
    %c0_6 = arith.constant 0 : index
    %c0_7 = arith.constant 0 : index
    %15 = vector.load %arg3[%c0_6, %c0_7] : memref<56x128xf32, #tpu.memory_space<vmem>>, vector<10x1xf32>
    %c0_8 = arith.constant 0 : index
    %c1 = arith.constant 1 : index
    %16 = vector.load %arg3[%c0_8, %c1] : memref<56x128xf32, #tpu.memory_space<vmem>>, vector<10x1xf32>
    %17 = vector.broadcast %14 : vector<1x128xf32> to vector<10x128xf32>
    %18 = vector.broadcast %15 : vector<10x1xf32> to vector<10x128xf32>
    %19 = arith.mulf %17, %18 : vector<10x128xf32>
    %cst_9 = arith.constant 6.28318548 : f32
    %20 = vector.broadcast %cst_9 : f32 to vector<10x128xf32>
    %21 = arith.mulf %19, %20 : vector<10x128xf32>
    %22 = vector.broadcast %16 : vector<10x1xf32> to vector<10x128xf32>
    %23 = arith.addf %21, %22 : vector<10x128xf32>
    %24 = math.sin %23 : vector<10x128xf32>
    %25 = arith.mulf %11, %11 : vector<1x128xf32>
    %cst_10 = arith.constant 1.000000e+00 : f32
    %26 = vector.broadcast %cst_10 : f32 to vector<1x128xf32>
    %27 = arith.addf %26, %25 : vector<1x128xf32>
    %28 = math.rsqrt %27 : vector<1x128xf32>
    %29 = vector.broadcast %28 : vector<1x128xf32> to vector<2x128xf32>
    %30 = arith.mulf %0, %29 : vector<2x128xf32>
    %c0_11 = arith.constant 0 : index
    %c2_12 = arith.constant 2 : index
    %31 = vector.load %arg3[%c0_11, %c2_12] : memref<56x128xf32, #tpu.memory_space<vmem>>, vector<2x1xf32>
    %c0_13 = arith.constant 0 : index
    %c3 = arith.constant 3 : index
    %32 = vector.load %arg3[%c0_13, %c3] : memref<56x128xf32, #tpu.memory_space<vmem>>, vector<2x1xf32>
    %c0_14 = arith.constant 0 : index
    %c0_15 = arith.constant 0 : index
    %33 = vector.load %arg2[%c0_14, %c0_15] : memref<960x128xf32, #tpu.memory_space<vmem>>, vector<50x2xf32>
    %c0_16 = arith.constant 0 : index
    %c4 = arith.constant 4 : index
    %34 = vector.load %arg3[%c0_16, %c4] : memref<56x128xf32, #tpu.memory_space<vmem>>, vector<50x1xf32>
    %c56 = arith.constant 56 : index
    %c0_17 = arith.constant 0 : index
    %35 = vector.load %arg2[%c56, %c0_17] : memref<960x128xf32, #tpu.memory_space<vmem>>, vector<50x10xf32>
    %c0_18 = arith.constant 0 : index
    %c5 = arith.constant 5 : index
    %36 = vector.load %arg3[%c0_18, %c5] : memref<56x128xf32, #tpu.memory_space<vmem>>, vector<50x1xf32>
    %c112 = arith.constant 112 : index
    %c0_19 = arith.constant 0 : index
    %37 = vector.load %arg2[%c112, %c0_19] : memref<960x128xf32, #tpu.memory_space<vmem>>, vector<50x10xf32>
    %c0_20 = arith.constant 0 : index
    %c6 = arith.constant 6 : index
    %38 = vector.load %arg3[%c0_20, %c6] : memref<56x128xf32, #tpu.memory_space<vmem>>, vector<50x1xf32>
    %c0_21 = arith.constant 0 : index
    %c7 = arith.constant 7 : index
    %39 = vector.load %arg3[%c0_21, %c7] : memref<56x128xf32, #tpu.memory_space<vmem>>, vector<50x1xf32>
    %c0_22 = arith.constant 0 : index
    %c8 = arith.constant 8 : index
    %40 = vector.load %arg3[%c0_22, %c8] : memref<56x128xf32, #tpu.memory_space<vmem>>, vector<50x1xf32>
    %c168 = arith.constant 168 : index
    %c0_23 = arith.constant 0 : index
    %41 = vector.load %arg2[%c168, %c0_23] : memref<960x128xf32, #tpu.memory_space<vmem>>, vector<50x50xf32>
    %c0_24 = arith.constant 0 : index
    %c9 = arith.constant 9 : index
    %42 = vector.load %arg3[%c0_24, %c9] : memref<56x128xf32, #tpu.memory_space<vmem>>, vector<50x1xf32>
    %c224 = arith.constant 224 : index
    %c0_25 = arith.constant 0 : index
    %43 = vector.load %arg2[%c224, %c0_25] : memref<960x128xf32, #tpu.memory_space<vmem>>, vector<50x2xf32>
    %c0_26 = arith.constant 0 : index
    %c10 = arith.constant 10 : index
    %44 = vector.load %arg3[%c0_26, %c10] : memref<56x128xf32, #tpu.memory_space<vmem>>, vector<50x1xf32>
    %cst_27 = arith.constant dense<0.000000e+00> : vector<128xf32>
    %45 = vector.multi_reduction <add>, %30, %cst_27 [0] : vector<2x128xf32> to vector<128xf32>
    %46 = vector.shape_cast %45 : vector<128xf32> to vector<1x128xf32>
    %cst_28 = arith.constant 2.000000e+00 : f32
    %47 = vector.broadcast %cst_28 : f32 to vector<1x128xf32>
    %48 = arith.divf %46, %47 : vector<1x128xf32>
    %49 = vector.broadcast %48 : vector<1x128xf32> to vector<2x128xf32>
    %50 = arith.subf %30, %49 : vector<2x128xf32>
    %51 = arith.mulf %50, %50 : vector<2x128xf32>
    %cst_29 = arith.constant dense<0.000000e+00> : vector<128xf32>
    %52 = vector.multi_reduction <add>, %51, %cst_29 [0] : vector<2x128xf32> to vector<128xf32>
    %53 = vector.shape_cast %52 : vector<128xf32> to vector<1x128xf32>
    %cst_30 = arith.constant 2.000000e+00 : f32
    %54 = vector.broadcast %cst_30 : f32 to vector<1x128xf32>
    %55 = arith.divf %53, %54 : vector<1x128xf32>
    %cst_31 = arith.constant 9.99999974E-6 : f32
    %56 = vector.broadcast %cst_31 : f32 to vector<1x128xf32>
    %57 = arith.addf %55, %56 : vector<1x128xf32>
    %58 = math.rsqrt %57 : vector<1x128xf32>
    %59 = vector.broadcast %58 : vector<1x128xf32> to vector<2x128xf32>
    %60 = arith.mulf %50, %59 : vector<2x128xf32>
    %61 = vector.broadcast %31 : vector<2x1xf32> to vector<2x128xf32>
    %62 = arith.mulf %60, %61 : vector<2x128xf32>
    %63 = vector.broadcast %32 : vector<2x1xf32> to vector<2x128xf32>
    %64 = arith.addf %62, %63 : vector<2x128xf32>
    %65 = arith.negf %64 : vector<2x128xf32>
    %66 = math.exp %65 : vector<2x128xf32>
    %cst_32 = arith.constant 1.000000e+00 : f32
    %67 = vector.broadcast %cst_32 : f32 to vector<2x128xf32>
    %68 = arith.addf %67, %66 : vector<2x128xf32>
    %69 = arith.divf %67, %68 : vector<2x128xf32>
    %70 = arith.mulf %64, %69 : vector<2x128xf32>
    %cst_33 = arith.constant dense<0.000000e+00> : vector<50x128xf32>
    %71 = tpu.matmul %33, %70, %cst_33 {dimension_numbers = #tpu.dot_dimension_numbers<[1], [0], [0], [1], [0, 0, 1, 1], [], []>} : vector<50x2xf32>, vector<2x128xf32>, vector<50x128xf32> -> vector<50x128xf32>
    %72 = vector.broadcast %34 : vector<50x1xf32> to vector<50x128xf32>
    %73 = arith.addf %71, %72 : vector<50x128xf32>
    %cst_34 = arith.constant dense<0.000000e+00> : vector<50x128xf32>
    %74 = tpu.matmul %35, %24, %cst_34 {dimension_numbers = #tpu.dot_dimension_numbers<[1], [0], [0], [1], [0, 0, 1, 1], [], []>} : vector<50x10xf32>, vector<10x128xf32>, vector<50x128xf32> -> vector<50x128xf32>
    %75 = vector.broadcast %36 : vector<50x1xf32> to vector<50x128xf32>
    %76 = arith.addf %74, %75 : vector<50x128xf32>
    %cst_35 = arith.constant dense<0.000000e+00> : vector<50x128xf32>
    %77 = tpu.matmul %37, %24, %cst_35 {dimension_numbers = #tpu.dot_dimension_numbers<[1], [0], [0], [1], [0, 0, 1, 1], [], []>} : vector<50x10xf32>, vector<10x128xf32>, vector<50x128xf32> -> vector<50x128xf32>
    %78 = vector.broadcast %38 : vector<50x1xf32> to vector<50x128xf32>
    %79 = arith.addf %77, %78 : vector<50x128xf32>
    %cst_36 = arith.constant dense<0.000000e+00> : vector<128xf32>
    %80 = vector.multi_reduction <add>, %73, %cst_36 [0] : vector<50x128xf32> to vector<128xf32>
    %81 = vector.shape_cast %80 : vector<128xf32> to vector<1x128xf32>
    %cst_37 = arith.constant 5.000000e+01 : f32
    %82 = vector.broadcast %cst_37 : f32 to vector<1x128xf32>
    %83 = arith.divf %81, %82 : vector<1x128xf32>
    %84 = vector.broadcast %83 : vector<1x128xf32> to vector<50x128xf32>
    %85 = arith.subf %73, %84 : vector<50x128xf32>
    %86 = arith.mulf %85, %85 : vector<50x128xf32>
    %cst_38 = arith.constant dense<0.000000e+00> : vector<128xf32>
    %87 = vector.multi_reduction <add>, %86, %cst_38 [0] : vector<50x128xf32> to vector<128xf32>
    %88 = vector.shape_cast %87 : vector<128xf32> to vector<1x128xf32>
    %cst_39 = arith.constant 5.000000e+01 : f32
    %89 = vector.broadcast %cst_39 : f32 to vector<1x128xf32>
    %90 = arith.divf %88, %89 : vector<1x128xf32>
    %cst_40 = arith.constant 9.99999974E-6 : f32
    %91 = vector.broadcast %cst_40 : f32 to vector<1x128xf32>
    %92 = arith.addf %90, %91 : vector<1x128xf32>
    %93 = math.rsqrt %92 : vector<1x128xf32>
    %94 = vector.broadcast %93 : vector<1x128xf32> to vector<50x128xf32>
    %95 = arith.mulf %85, %94 : vector<50x128xf32>
    %96 = vector.broadcast %39 : vector<50x1xf32> to vector<50x128xf32>
    %97 = arith.mulf %95, %96 : vector<50x128xf32>
    %98 = vector.broadcast %40 : vector<50x1xf32> to vector<50x128xf32>
    %99 = arith.addf %97, %98 : vector<50x128xf32>
    %cst_41 = arith.constant 1.000000e+00 : f32
    %100 = vector.broadcast %cst_41 : f32 to vector<50x128xf32>
    %101 = arith.addf %76, %100 : vector<50x128xf32>
    %102 = arith.mulf %99, %101 : vector<50x128xf32>
    %103 = arith.addf %79, %102 : vector<50x128xf32>
    %104 = arith.negf %103 : vector<50x128xf32>
    %105 = math.exp %104 : vector<50x128xf32>
    %cst_42 = arith.constant 1.000000e+00 : f32
    %106 = vector.broadcast %cst_42 : f32 to vector<50x128xf32>
    %107 = arith.addf %106, %105 : vector<50x128xf32>
    %108 = arith.divf %106, %107 : vector<50x128xf32>
    %109 = arith.mulf %103, %108 : vector<50x128xf32>
    %cst_43 = arith.constant dense<0.000000e+00> : vector<50x128xf32>
    %110 = tpu.matmul %41, %109, %cst_43 {dimension_numbers = #tpu.dot_dimension_numbers<[1], [0], [0], [1], [0, 0, 1, 1], [], []>} : vector<50x50xf32>, vector<50x128xf32>, vector<50x128xf32> -> vector<50x128xf32>
    %111 = vector.broadcast %42 : vector<50x1xf32> to vector<50x128xf32>
    %112 = arith.addf %110, %111 : vector<50x128xf32>
    %cst_44 = arith.constant dense<0.000000e+00> : vector<50x128xf32>
    %113 = tpu.matmul %43, %30, %cst_44 {dimension_numbers = #tpu.dot_dimension_numbers<[1], [0], [0], [1], [0, 0, 1, 1], [], []>} : vector<50x2xf32>, vector<2x128xf32>, vector<50x128xf32> -> vector<50x128xf32>
    %114 = vector.broadcast %44 : vector<50x1xf32> to vector<50x128xf32>
    %115 = arith.addf %113, %114 : vector<50x128xf32>
    %116 = arith.addf %112, %115 : vector<50x128xf32>
    %c0_45 = arith.constant 0 : index
    %c11 = arith.constant 11 : index
    %117 = vector.load %arg3[%c0_45, %c11] : memref<56x128xf32, #tpu.memory_space<vmem>>, vector<50x1xf32>
    %c0_46 = arith.constant 0 : index
    %c12 = arith.constant 12 : index
    %118 = vector.load %arg3[%c0_46, %c12] : memref<56x128xf32, #tpu.memory_space<vmem>>, vector<50x1xf32>
    %c280 = arith.constant 280 : index
    %c0_47 = arith.constant 0 : index
    %119 = vector.load %arg2[%c280, %c0_47] : memref<960x128xf32, #tpu.memory_space<vmem>>, vector<50x50xf32>
    %c0_48 = arith.constant 0 : index
    %c13 = arith.constant 13 : index
    %120 = vector.load %arg3[%c0_48, %c13] : memref<56x128xf32, #tpu.memory_space<vmem>>, vector<50x1xf32>
    %c336 = arith.constant 336 : index
    %c0_49 = arith.constant 0 : index
    %121 = vector.load %arg2[%c336, %c0_49] : memref<960x128xf32, #tpu.memory_space<vmem>>, vector<50x10xf32>
    %c0_50 = arith.constant 0 : index
    %c14 = arith.constant 14 : index
    %122 = vector.load %arg3[%c0_50, %c14] : memref<56x128xf32, #tpu.memory_space<vmem>>, vector<50x1xf32>
    %c392 = arith.constant 392 : index
    %c0_51 = arith.constant 0 : index
    %123 = vector.load %arg2[%c392, %c0_51] : memref<960x128xf32, #tpu.memory_space<vmem>>, vector<50x10xf32>
    %c0_52 = arith.constant 0 : index
    %c15 = arith.constant 15 : index
    %124 = vector.load %arg3[%c0_52, %c15] : memref<56x128xf32, #tpu.memory_space<vmem>>, vector<50x1xf32>
    %c0_53 = arith.constant 0 : index
    %c16 = arith.constant 16 : index
    %125 = vector.load %arg3[%c0_53, %c16] : memref<56x128xf32, #tpu.memory_space<vmem>>, vector<50x1xf32>
    %c0_54 = arith.constant 0 : index
    %c17 = arith.constant 17 : index
    %126 = vector.load %arg3[%c0_54, %c17] : memref<56x128xf32, #tpu.memory_space<vmem>>, vector<50x1xf32>
    %c448 = arith.constant 448 : index
    %c0_55 = arith.constant 0 : index
    %127 = vector.load %arg2[%c448, %c0_55] : memref<960x128xf32, #tpu.memory_space<vmem>>, vector<50x50xf32>
    %c0_56 = arith.constant 0 : index
    %c18 = arith.constant 18 : index
    %128 = vector.load %arg3[%c0_56, %c18] : memref<56x128xf32, #tpu.memory_space<vmem>>, vector<50x1xf32>
    %cst_57 = arith.constant dense<0.000000e+00> : vector<128xf32>
    %129 = vector.multi_reduction <add>, %116, %cst_57 [0] : vector<50x128xf32> to vector<128xf32>
    %130 = vector.shape_cast %129 : vector<128xf32> to vector<1x128xf32>
    %cst_58 = arith.constant 5.000000e+01 : f32
    %131 = vector.broadcast %cst_58 : f32 to vector<1x128xf32>
    %132 = arith.divf %130, %131 : vector<1x128xf32>
    %133 = vector.broadcast %132 : vector<1x128xf32> to vector<50x128xf32>
    %134 = arith.subf %116, %133 : vector<50x128xf32>
    %135 = arith.mulf %134, %134 : vector<50x128xf32>
    %cst_59 = arith.constant dense<0.000000e+00> : vector<128xf32>
    %136 = vector.multi_reduction <add>, %135, %cst_59 [0] : vector<50x128xf32> to vector<128xf32>
    %137 = vector.shape_cast %136 : vector<128xf32> to vector<1x128xf32>
    %cst_60 = arith.constant 5.000000e+01 : f32
    %138 = vector.broadcast %cst_60 : f32 to vector<1x128xf32>
    %139 = arith.divf %137, %138 : vector<1x128xf32>
    %cst_61 = arith.constant 9.99999974E-6 : f32
    %140 = vector.broadcast %cst_61 : f32 to vector<1x128xf32>
    %141 = arith.addf %139, %140 : vector<1x128xf32>
    %142 = math.rsqrt %141 : vector<1x128xf32>
    %143 = vector.broadcast %142 : vector<1x128xf32> to vector<50x128xf32>
    %144 = arith.mulf %134, %143 : vector<50x128xf32>
    %145 = vector.broadcast %117 : vector<50x1xf32> to vector<50x128xf32>
    %146 = arith.mulf %144, %145 : vector<50x128xf32>
    %147 = vector.broadcast %118 : vector<50x1xf32> to vector<50x128xf32>
    %148 = arith.addf %146, %147 : vector<50x128xf32>
    %149 = arith.negf %148 : vector<50x128xf32>
    %150 = math.exp %149 : vector<50x128xf32>
    %cst_62 = arith.constant 1.000000e+00 : f32
    %151 = vector.broadcast %cst_62 : f32 to vector<50x128xf32>
    %152 = arith.addf %151, %150 : vector<50x128xf32>
    %153 = arith.divf %151, %152 : vector<50x128xf32>
    %154 = arith.mulf %148, %153 : vector<50x128xf32>
    %cst_63 = arith.constant dense<0.000000e+00> : vector<50x128xf32>
    %155 = tpu.matmul %119, %154, %cst_63 {dimension_numbers = #tpu.dot_dimension_numbers<[1], [0], [0], [1], [0, 0, 1, 1], [], []>} : vector<50x50xf32>, vector<50x128xf32>, vector<50x128xf32> -> vector<50x128xf32>
    %156 = vector.broadcast %120 : vector<50x1xf32> to vector<50x128xf32>
    %157 = arith.addf %155, %156 : vector<50x128xf32>
    %cst_64 = arith.constant dense<0.000000e+00> : vector<50x128xf32>
    %158 = tpu.matmul %121, %24, %cst_64 {dimension_numbers = #tpu.dot_dimension_numbers<[1], [0], [0], [1], [0, 0, 1, 1], [], []>} : vector<50x10xf32>, vector<10x128xf32>, vector<50x128xf32> -> vector<50x128xf32>
    %159 = vector.broadcast %122 : vector<50x1xf32> to vector<50x128xf32>
    %160 = arith.addf %158, %159 : vector<50x128xf32>
    %cst_65 = arith.constant dense<0.000000e+00> : vector<50x128xf32>
    %161 = tpu.matmul %123, %24, %cst_65 {dimension_numbers = #tpu.dot_dimension_numbers<[1], [0], [0], [1], [0, 0, 1, 1], [], []>} : vector<50x10xf32>, vector<10x128xf32>, vector<50x128xf32> -> vector<50x128xf32>
    %162 = vector.broadcast %124 : vector<50x1xf32> to vector<50x128xf32>
    %163 = arith.addf %161, %162 : vector<50x128xf32>
    %cst_66 = arith.constant dense<0.000000e+00> : vector<128xf32>
    %164 = vector.multi_reduction <add>, %157, %cst_66 [0] : vector<50x128xf32> to vector<128xf32>
    %165 = vector.shape_cast %164 : vector<128xf32> to vector<1x128xf32>
    %cst_67 = arith.constant 5.000000e+01 : f32
    %166 = vector.broadcast %cst_67 : f32 to vector<1x128xf32>
    %167 = arith.divf %165, %166 : vector<1x128xf32>
    %168 = vector.broadcast %167 : vector<1x128xf32> to vector<50x128xf32>
    %169 = arith.subf %157, %168 : vector<50x128xf32>
    %170 = arith.mulf %169, %169 : vector<50x128xf32>
    %cst_68 = arith.constant dense<0.000000e+00> : vector<128xf32>
    %171 = vector.multi_reduction <add>, %170, %cst_68 [0] : vector<50x128xf32> to vector<128xf32>
    %172 = vector.shape_cast %171 : vector<128xf32> to vector<1x128xf32>
    %cst_69 = arith.constant 5.000000e+01 : f32
    %173 = vector.broadcast %cst_69 : f32 to vector<1x128xf32>
    %174 = arith.divf %172, %173 : vector<1x128xf32>
    %cst_70 = arith.constant 9.99999974E-6 : f32
    %175 = vector.broadcast %cst_70 : f32 to vector<1x128xf32>
    %176 = arith.addf %174, %175 : vector<1x128xf32>
    %177 = math.rsqrt %176 : vector<1x128xf32>
    %178 = vector.broadcast %177 : vector<1x128xf32> to vector<50x128xf32>
    %179 = arith.mulf %169, %178 : vector<50x128xf32>
    %180 = vector.broadcast %125 : vector<50x1xf32> to vector<50x128xf32>
    %181 = arith.mulf %179, %180 : vector<50x128xf32>
    %182 = vector.broadcast %126 : vector<50x1xf32> to vector<50x128xf32>
    %183 = arith.addf %181, %182 : vector<50x128xf32>
    %cst_71 = arith.constant 1.000000e+00 : f32
    %184 = vector.broadcast %cst_71 : f32 to vector<50x128xf32>
    %185 = arith.addf %160, %184 : vector<50x128xf32>
    %186 = arith.mulf %183, %185 : vector<50x128xf32>
    %187 = arith.addf %163, %186 : vector<50x128xf32>
    %188 = arith.negf %187 : vector<50x128xf32>
    %189 = math.exp %188 : vector<50x128xf32>
    %cst_72 = arith.constant 1.000000e+00 : f32
    %190 = vector.broadcast %cst_72 : f32 to vector<50x128xf32>
    %191 = arith.addf %190, %189 : vector<50x128xf32>
    %192 = arith.divf %190, %191 : vector<50x128xf32>
    %193 = arith.mulf %187, %192 : vector<50x128xf32>
    %cst_73 = arith.constant dense<0.000000e+00> : vector<50x128xf32>
    %194 = tpu.matmul %127, %193, %cst_73 {dimension_numbers = #tpu.dot_dimension_numbers<[1], [0], [0], [1], [0, 0, 1, 1], [], []>} : vector<50x50xf32>, vector<50x128xf32>, vector<50x128xf32> -> vector<50x128xf32>
    %195 = vector.broadcast %128 : vector<50x1xf32> to vector<50x128xf32>
    %196 = arith.addf %194, %195 : vector<50x128xf32>
    %197 = arith.addf %196, %116 : vector<50x128xf32>
    %c0_74 = arith.constant 0 : index
    %c19 = arith.constant 19 : index
    %198 = vector.load %arg3[%c0_74, %c19] : memref<56x128xf32, #tpu.memory_space<vmem>>, vector<50x1xf32>
    %c0_75 = arith.constant 0 : index
    %c20 = arith.constant 20 : index
    %199 = vector.load %arg3[%c0_75, %c20] : memref<56x128xf32, #tpu.memory_space<vmem>>, vector<50x1xf32>
    %c504 = arith.constant 504 : index
    %c0_76 = arith.constant 0 : index
    %200 = vector.load %arg2[%c504, %c0_76] : memref<960x128xf32, #tpu.memory_space<vmem>>, vector<50x50xf32>
    %c0_77 = arith.constant 0 : index
    %c21 = arith.constant 21 : index
    %201 = vector.load %arg3[%c0_77, %c21] : memref<56x128xf32, #tpu.memory_space<vmem>>, vector<50x1xf32>
    %c560 = arith.constant 560 : index
    %c0_78 = arith.constant 0 : index
    %202 = vector.load %arg2[%c560, %c0_78] : memref<960x128xf32, #tpu.memory_space<vmem>>, vector<50x10xf32>
    %c0_79 = arith.constant 0 : index
    %c22 = arith.constant 22 : index
    %203 = vector.load %arg3[%c0_79, %c22] : memref<56x128xf32, #tpu.memory_space<vmem>>, vector<50x1xf32>
    %c616 = arith.constant 616 : index
    %c0_80 = arith.constant 0 : index
    %204 = vector.load %arg2[%c616, %c0_80] : memref<960x128xf32, #tpu.memory_space<vmem>>, vector<50x10xf32>
    %c0_81 = arith.constant 0 : index
    %c23 = arith.constant 23 : index
    %205 = vector.load %arg3[%c0_81, %c23] : memref<56x128xf32, #tpu.memory_space<vmem>>, vector<50x1xf32>
    %c0_82 = arith.constant 0 : index
    %c24 = arith.constant 24 : index
    %206 = vector.load %arg3[%c0_82, %c24] : memref<56x128xf32, #tpu.memory_space<vmem>>, vector<50x1xf32>
    %c0_83 = arith.constant 0 : index
    %c25 = arith.constant 25 : index
    %207 = vector.load %arg3[%c0_83, %c25] : memref<56x128xf32, #tpu.memory_space<vmem>>, vector<50x1xf32>
    %c672 = arith.constant 672 : index
    %c0_84 = arith.constant 0 : index
    %208 = vector.load %arg2[%c672, %c0_84] : memref<960x128xf32, #tpu.memory_space<vmem>>, vector<50x50xf32>
    %c0_85 = arith.constant 0 : index
    %c26 = arith.constant 26 : index
    %209 = vector.load %arg3[%c0_85, %c26] : memref<56x128xf32, #tpu.memory_space<vmem>>, vector<50x1xf32>
    %cst_86 = arith.constant dense<0.000000e+00> : vector<128xf32>
    %210 = vector.multi_reduction <add>, %197, %cst_86 [0] : vector<50x128xf32> to vector<128xf32>
    %211 = vector.shape_cast %210 : vector<128xf32> to vector<1x128xf32>
    %cst_87 = arith.constant 5.000000e+01 : f32
    %212 = vector.broadcast %cst_87 : f32 to vector<1x128xf32>
    %213 = arith.divf %211, %212 : vector<1x128xf32>
    %214 = vector.broadcast %213 : vector<1x128xf32> to vector<50x128xf32>
    %215 = arith.subf %197, %214 : vector<50x128xf32>
    %216 = arith.mulf %215, %215 : vector<50x128xf32>
    %cst_88 = arith.constant dense<0.000000e+00> : vector<128xf32>
    %217 = vector.multi_reduction <add>, %216, %cst_88 [0] : vector<50x128xf32> to vector<128xf32>
    %218 = vector.shape_cast %217 : vector<128xf32> to vector<1x128xf32>
    %cst_89 = arith.constant 5.000000e+01 : f32
    %219 = vector.broadcast %cst_89 : f32 to vector<1x128xf32>
    %220 = arith.divf %218, %219 : vector<1x128xf32>
    %cst_90 = arith.constant 9.99999974E-6 : f32
    %221 = vector.broadcast %cst_90 : f32 to vector<1x128xf32>
    %222 = arith.addf %220, %221 : vector<1x128xf32>
    %223 = math.rsqrt %222 : vector<1x128xf32>
    %224 = vector.broadcast %223 : vector<1x128xf32> to vector<50x128xf32>
    %225 = arith.mulf %215, %224 : vector<50x128xf32>
    %226 = vector.broadcast %198 : vector<50x1xf32> to vector<50x128xf32>
    %227 = arith.mulf %225, %226 : vector<50x128xf32>
    %228 = vector.broadcast %199 : vector<50x1xf32> to vector<50x128xf32>
    %229 = arith.addf %227, %228 : vector<50x128xf32>
    %230 = arith.negf %229 : vector<50x128xf32>
    %231 = math.exp %230 : vector<50x128xf32>
    %cst_91 = arith.constant 1.000000e+00 : f32
    %232 = vector.broadcast %cst_91 : f32 to vector<50x128xf32>
    %233 = arith.addf %232, %231 : vector<50x128xf32>
    %234 = arith.divf %232, %233 : vector<50x128xf32>
    %235 = arith.mulf %229, %234 : vector<50x128xf32>
    %cst_92 = arith.constant dense<0.000000e+00> : vector<50x128xf32>
    %236 = tpu.matmul %200, %235, %cst_92 {dimension_numbers = #tpu.dot_dimension_numbers<[1], [0], [0], [1], [0, 0, 1, 1], [], []>} : vector<50x50xf32>, vector<50x128xf32>, vector<50x128xf32> -> vector<50x128xf32>
    %237 = vector.broadcast %201 : vector<50x1xf32> to vector<50x128xf32>
    %238 = arith.addf %236, %237 : vector<50x128xf32>
    %cst_93 = arith.constant dense<0.000000e+00> : vector<50x128xf32>
    %239 = tpu.matmul %202, %24, %cst_93 {dimension_numbers = #tpu.dot_dimension_numbers<[1], [0], [0], [1], [0, 0, 1, 1], [], []>} : vector<50x10xf32>, vector<10x128xf32>, vector<50x128xf32> -> vector<50x128xf32>
    %240 = vector.broadcast %203 : vector<50x1xf32> to vector<50x128xf32>
    %241 = arith.addf %239, %240 : vector<50x128xf32>
    %cst_94 = arith.constant dense<0.000000e+00> : vector<50x128xf32>
    %242 = tpu.matmul %204, %24, %cst_94 {dimension_numbers = #tpu.dot_dimension_numbers<[1], [0], [0], [1], [0, 0, 1, 1], [], []>} : vector<50x10xf32>, vector<10x128xf32>, vector<50x128xf32> -> vector<50x128xf32>
    %243 = vector.broadcast %205 : vector<50x1xf32> to vector<50x128xf32>
    %244 = arith.addf %242, %243 : vector<50x128xf32>
    %cst_95 = arith.constant dense<0.000000e+00> : vector<128xf32>
    %245 = vector.multi_reduction <add>, %238, %cst_95 [0] : vector<50x128xf32> to vector<128xf32>
    %246 = vector.shape_cast %245 : vector<128xf32> to vector<1x128xf32>
    %cst_96 = arith.constant 5.000000e+01 : f32
    %247 = vector.broadcast %cst_96 : f32 to vector<1x128xf32>
    %248 = arith.divf %246, %247 : vector<1x128xf32>
    %249 = vector.broadcast %248 : vector<1x128xf32> to vector<50x128xf32>
    %250 = arith.subf %238, %249 : vector<50x128xf32>
    %251 = arith.mulf %250, %250 : vector<50x128xf32>
    %cst_97 = arith.constant dense<0.000000e+00> : vector<128xf32>
    %252 = vector.multi_reduction <add>, %251, %cst_97 [0] : vector<50x128xf32> to vector<128xf32>
    %253 = vector.shape_cast %252 : vector<128xf32> to vector<1x128xf32>
    %cst_98 = arith.constant 5.000000e+01 : f32
    %254 = vector.broadcast %cst_98 : f32 to vector<1x128xf32>
    %255 = arith.divf %253, %254 : vector<1x128xf32>
    %cst_99 = arith.constant 9.99999974E-6 : f32
    %256 = vector.broadcast %cst_99 : f32 to vector<1x128xf32>
    %257 = arith.addf %255, %256 : vector<1x128xf32>
    %258 = math.rsqrt %257 : vector<1x128xf32>
    %259 = vector.broadcast %258 : vector<1x128xf32> to vector<50x128xf32>
    %260 = arith.mulf %250, %259 : vector<50x128xf32>
    %261 = vector.broadcast %206 : vector<50x1xf32> to vector<50x128xf32>
    %262 = arith.mulf %260, %261 : vector<50x128xf32>
    %263 = vector.broadcast %207 : vector<50x1xf32> to vector<50x128xf32>
    %264 = arith.addf %262, %263 : vector<50x128xf32>
    %cst_100 = arith.constant 1.000000e+00 : f32
    %265 = vector.broadcast %cst_100 : f32 to vector<50x128xf32>
    %266 = arith.addf %241, %265 : vector<50x128xf32>
    %267 = arith.mulf %264, %266 : vector<50x128xf32>
    %268 = arith.addf %244, %267 : vector<50x128xf32>
    %269 = arith.negf %268 : vector<50x128xf32>
    %270 = math.exp %269 : vector<50x128xf32>
    %cst_101 = arith.constant 1.000000e+00 : f32
    %271 = vector.broadcast %cst_101 : f32 to vector<50x128xf32>
    %272 = arith.addf %271, %270 : vector<50x128xf32>
    %273 = arith.divf %271, %272 : vector<50x128xf32>
    %274 = arith.mulf %268, %273 : vector<50x128xf32>
    %cst_102 = arith.constant dense<0.000000e+00> : vector<50x128xf32>
    %275 = tpu.matmul %208, %274, %cst_102 {dimension_numbers = #tpu.dot_dimension_numbers<[1], [0], [0], [1], [0, 0, 1, 1], [], []>} : vector<50x50xf32>, vector<50x128xf32>, vector<50x128xf32> -> vector<50x128xf32>
    %276 = vector.broadcast %209 : vector<50x1xf32> to vector<50x128xf32>
    %277 = arith.addf %275, %276 : vector<50x128xf32>
    %278 = arith.addf %277, %197 : vector<50x128xf32>
    %c0_103 = arith.constant 0 : index
    %c27 = arith.constant 27 : index
    %279 = vector.load %arg3[%c0_103, %c27] : memref<56x128xf32, #tpu.memory_space<vmem>>, vector<50x1xf32>
    %c0_104 = arith.constant 0 : index
    %c28 = arith.constant 28 : index
    %280 = vector.load %arg3[%c0_104, %c28] : memref<56x128xf32, #tpu.memory_space<vmem>>, vector<50x1xf32>
    %c728 = arith.constant 728 : index
    %c0_105 = arith.constant 0 : index
    %281 = vector.load %arg2[%c728, %c0_105] : memref<960x128xf32, #tpu.memory_space<vmem>>, vector<50x50xf32>
    %c0_106 = arith.constant 0 : index
    %c29 = arith.constant 29 : index
    %282 = vector.load %arg3[%c0_106, %c29] : memref<56x128xf32, #tpu.memory_space<vmem>>, vector<50x1xf32>
    %c784 = arith.constant 784 : index
    %c0_107 = arith.constant 0 : index
    %283 = vector.load %arg2[%c784, %c0_107] : memref<960x128xf32, #tpu.memory_space<vmem>>, vector<50x10xf32>
    %c0_108 = arith.constant 0 : index
    %c30 = arith.constant 30 : index
    %284 = vector.load %arg3[%c0_108, %c30] : memref<56x128xf32, #tpu.memory_space<vmem>>, vector<50x1xf32>
    %c840 = arith.constant 840 : index
    %c0_109 = arith.constant 0 : index
    %285 = vector.load %arg2[%c840, %c0_109] : memref<960x128xf32, #tpu.memory_space<vmem>>, vector<50x10xf32>
    %c0_110 = arith.constant 0 : index
    %c31 = arith.constant 31 : index
    %286 = vector.load %arg3[%c0_110, %c31] : memref<56x128xf32, #tpu.memory_space<vmem>>, vector<50x1xf32>
    %c0_111 = arith.constant 0 : index
    %c32 = arith.constant 32 : index
    %287 = vector.load %arg3[%c0_111, %c32] : memref<56x128xf32, #tpu.memory_space<vmem>>, vector<50x1xf32>
    %c0_112 = arith.constant 0 : index
    %c33 = arith.constant 33 : index
    %288 = vector.load %arg3[%c0_112, %c33] : memref<56x128xf32, #tpu.memory_space<vmem>>, vector<50x1xf32>
    %c896 = arith.constant 896 : index
    %c0_113 = arith.constant 0 : index
    %289 = vector.load %arg2[%c896, %c0_113] : memref<960x128xf32, #tpu.memory_space<vmem>>, vector<50x50xf32>
    %c0_114 = arith.constant 0 : index
    %c34 = arith.constant 34 : index
    %290 = vector.load %arg3[%c0_114, %c34] : memref<56x128xf32, #tpu.memory_space<vmem>>, vector<50x1xf32>
    %cst_115 = arith.constant dense<0.000000e+00> : vector<128xf32>
    %291 = vector.multi_reduction <add>, %278, %cst_115 [0] : vector<50x128xf32> to vector<128xf32>
    %292 = vector.shape_cast %291 : vector<128xf32> to vector<1x128xf32>
    %cst_116 = arith.constant 5.000000e+01 : f32
    %293 = vector.broadcast %cst_116 : f32 to vector<1x128xf32>
    %294 = arith.divf %292, %293 : vector<1x128xf32>
    %295 = vector.broadcast %294 : vector<1x128xf32> to vector<50x128xf32>
    %296 = arith.subf %278, %295 : vector<50x128xf32>
    %297 = arith.mulf %296, %296 : vector<50x128xf32>
    %cst_117 = arith.constant dense<0.000000e+00> : vector<128xf32>
    %298 = vector.multi_reduction <add>, %297, %cst_117 [0] : vector<50x128xf32> to vector<128xf32>
    %299 = vector.shape_cast %298 : vector<128xf32> to vector<1x128xf32>
    %cst_118 = arith.constant 5.000000e+01 : f32
    %300 = vector.broadcast %cst_118 : f32 to vector<1x128xf32>
    %301 = arith.divf %299, %300 : vector<1x128xf32>
    %cst_119 = arith.constant 9.99999974E-6 : f32
    %302 = vector.broadcast %cst_119 : f32 to vector<1x128xf32>
    %303 = arith.addf %301, %302 : vector<1x128xf32>
    %304 = math.rsqrt %303 : vector<1x128xf32>
    %305 = vector.broadcast %304 : vector<1x128xf32> to vector<50x128xf32>
    %306 = arith.mulf %296, %305 : vector<50x128xf32>
    %307 = vector.broadcast %279 : vector<50x1xf32> to vector<50x128xf32>
    %308 = arith.mulf %306, %307 : vector<50x128xf32>
    %309 = vector.broadcast %280 : vector<50x1xf32> to vector<50x128xf32>
    %310 = arith.addf %308, %309 : vector<50x128xf32>
    %311 = arith.negf %310 : vector<50x128xf32>
    %312 = math.exp %311 : vector<50x128xf32>
    %cst_120 = arith.constant 1.000000e+00 : f32
    %313 = vector.broadcast %cst_120 : f32 to vector<50x128xf32>
    %314 = arith.addf %313, %312 : vector<50x128xf32>
    %315 = arith.divf %313, %314 : vector<50x128xf32>
    %316 = arith.mulf %310, %315 : vector<50x128xf32>
    %cst_121 = arith.constant dense<0.000000e+00> : vector<50x128xf32>
    %317 = tpu.matmul %281, %316, %cst_121 {dimension_numbers = #tpu.dot_dimension_numbers<[1], [0], [0], [1], [0, 0, 1, 1], [], []>} : vector<50x50xf32>, vector<50x128xf32>, vector<50x128xf32> -> vector<50x128xf32>
    %318 = vector.broadcast %282 : vector<50x1xf32> to vector<50x128xf32>
    %319 = arith.addf %317, %318 : vector<50x128xf32>
    %cst_122 = arith.constant dense<0.000000e+00> : vector<50x128xf32>
    %320 = tpu.matmul %283, %24, %cst_122 {dimension_numbers = #tpu.dot_dimension_numbers<[1], [0], [0], [1], [0, 0, 1, 1], [], []>} : vector<50x10xf32>, vector<10x128xf32>, vector<50x128xf32> -> vector<50x128xf32>
    %321 = vector.broadcast %284 : vector<50x1xf32> to vector<50x128xf32>
    %322 = arith.addf %320, %321 : vector<50x128xf32>
    %cst_123 = arith.constant dense<0.000000e+00> : vector<50x128xf32>
    %323 = tpu.matmul %285, %24, %cst_123 {dimension_numbers = #tpu.dot_dimension_numbers<[1], [0], [0], [1], [0, 0, 1, 1], [], []>} : vector<50x10xf32>, vector<10x128xf32>, vector<50x128xf32> -> vector<50x128xf32>
    %324 = vector.broadcast %286 : vector<50x1xf32> to vector<50x128xf32>
    %325 = arith.addf %323, %324 : vector<50x128xf32>
    %cst_124 = arith.constant dense<0.000000e+00> : vector<128xf32>
    %326 = vector.multi_reduction <add>, %319, %cst_124 [0] : vector<50x128xf32> to vector<128xf32>
    %327 = vector.shape_cast %326 : vector<128xf32> to vector<1x128xf32>
    %cst_125 = arith.constant 5.000000e+01 : f32
    %328 = vector.broadcast %cst_125 : f32 to vector<1x128xf32>
    %329 = arith.divf %327, %328 : vector<1x128xf32>
    %330 = vector.broadcast %329 : vector<1x128xf32> to vector<50x128xf32>
    %331 = arith.subf %319, %330 : vector<50x128xf32>
    %332 = arith.mulf %331, %331 : vector<50x128xf32>
    %cst_126 = arith.constant dense<0.000000e+00> : vector<128xf32>
    %333 = vector.multi_reduction <add>, %332, %cst_126 [0] : vector<50x128xf32> to vector<128xf32>
    %334 = vector.shape_cast %333 : vector<128xf32> to vector<1x128xf32>
    %cst_127 = arith.constant 5.000000e+01 : f32
    %335 = vector.broadcast %cst_127 : f32 to vector<1x128xf32>
    %336 = arith.divf %334, %335 : vector<1x128xf32>
    %cst_128 = arith.constant 9.99999974E-6 : f32
    %337 = vector.broadcast %cst_128 : f32 to vector<1x128xf32>
    %338 = arith.addf %336, %337 : vector<1x128xf32>
    %339 = math.rsqrt %338 : vector<1x128xf32>
    %340 = vector.broadcast %339 : vector<1x128xf32> to vector<50x128xf32>
    %341 = arith.mulf %331, %340 : vector<50x128xf32>
    %342 = vector.broadcast %287 : vector<50x1xf32> to vector<50x128xf32>
    %343 = arith.mulf %341, %342 : vector<50x128xf32>
    %344 = vector.broadcast %288 : vector<50x1xf32> to vector<50x128xf32>
    %345 = arith.addf %343, %344 : vector<50x128xf32>
    %cst_129 = arith.constant 1.000000e+00 : f32
    %346 = vector.broadcast %cst_129 : f32 to vector<50x128xf32>
    %347 = arith.addf %322, %346 : vector<50x128xf32>
    %348 = arith.mulf %345, %347 : vector<50x128xf32>
    %349 = arith.addf %325, %348 : vector<50x128xf32>
    %350 = arith.negf %349 : vector<50x128xf32>
    %351 = math.exp %350 : vector<50x128xf32>
    %cst_130 = arith.constant 1.000000e+00 : f32
    %352 = vector.broadcast %cst_130 : f32 to vector<50x128xf32>
    %353 = arith.addf %352, %351 : vector<50x128xf32>
    %354 = arith.divf %352, %353 : vector<50x128xf32>
    %355 = arith.mulf %349, %354 : vector<50x128xf32>
    %cst_131 = arith.constant dense<0.000000e+00> : vector<50x128xf32>
    %356 = tpu.matmul %289, %355, %cst_131 {dimension_numbers = #tpu.dot_dimension_numbers<[1], [0], [0], [1], [0, 0, 1, 1], [], []>} : vector<50x50xf32>, vector<50x128xf32>, vector<50x128xf32> -> vector<50x128xf32>
    %357 = vector.broadcast %290 : vector<50x1xf32> to vector<50x128xf32>
    %358 = arith.addf %356, %357 : vector<50x128xf32>
    %359 = arith.addf %358, %278 : vector<50x128xf32>
    %c952 = arith.constant 952 : index
    %c0_132 = arith.constant 0 : index
    %360 = vector.load %arg2[%c952, %c0_132] : memref<960x128xf32, #tpu.memory_space<vmem>>, vector<2x50xf32>
    %c0_133 = arith.constant 0 : index
    %c35 = arith.constant 35 : index
    %361 = vector.load %arg3[%c0_133, %c35] : memref<56x128xf32, #tpu.memory_space<vmem>>, vector<2x1xf32>
    %cst_134 = arith.constant dense<0.000000e+00> : vector<2x128xf32>
    %362 = tpu.matmul %360, %359, %cst_134 {dimension_numbers = #tpu.dot_dimension_numbers<[1], [0], [0], [1], [0, 0, 1, 1], [], []>} : vector<2x50xf32>, vector<50x128xf32>, vector<2x128xf32> -> vector<2x128xf32>
    %363 = vector.broadcast %361 : vector<2x1xf32> to vector<2x128xf32>
    %364 = arith.addf %362, %363 : vector<2x128xf32>
    %365 = tpu.reciprocal %11 {approx = true} : vector<1x128xf32> -> vector<1x128xf32>
    %366 = vector.broadcast %365 : vector<1x128xf32> to vector<2x128xf32>
    %367 = arith.mulf %364, %366 : vector<2x128xf32>
    %368 = arith.mulf %28, %28 : vector<1x128xf32>
    %369 = vector.broadcast %368 : vector<1x128xf32> to vector<2x128xf32>
    %370 = arith.mulf %0, %369 : vector<2x128xf32>
    %371 = arith.subf %367, %370 : vector<2x128xf32>
    %c0_135 = arith.constant 0 : index
    %c0_136 = arith.constant 0 : index
    %372 = vector.load %arg4[%c0_135, %c0_136] : memref<2x128xf32, #tpu.memory_space<vmem>>, vector<2x128xf32>
    tpu.vector_store %arg4[%c0_135, %c0_136], %371 {strides = array<i32>} : memref<2x128xf32, #tpu.memory_space<vmem>>, vector<2x128xf32>,
    return
  }
  func.func @transform_0(%arg0: i32) -> (i32, i32) {
    %c0_i32 = arith.constant 0 : i32
    %c0_i32_0 = arith.constant 0 : i32
    return %c0_i32, %arg0 : i32, i32
  }
  func.func @transform_1(%arg0: i32) -> (i32, i32) {
    %c0_i32 = arith.constant 0 : i32
    %c0_i32_0 = arith.constant 0 : i32
    %c0_i32_1 = arith.constant 0 : i32
    return %c0_i32, %c0_i32_0 : i32, i32
  }
  func.func @transform_2(%arg0: i32) -> (i32, i32) {
    %c0_i32 = arith.constant 0 : i32
    %c0_i32_0 = arith.constant 0 : i32
    %c0_i32_1 = arith.constant 0 : i32
    return %c0_i32, %c0_i32_0 : i32, i32
  }
  func.func @transform_3(%arg0: i32) -> (i32, i32) {
    %c0_i32 = arith.constant 0 : i32
    %c0_i32_0 = arith.constant 0 : i32
    return %c0_i32, %arg0 : i32, i32
  }
}

</mosaic_0001>

<bundles_post_ra>
// kernel: tpu_custom_call.1
= control target key start
LH: loop header
LB: loop body
LE: loop exit
PB: predicated region body
PF: predicated region fallthrough
CT: control target
= control target key end

     0   :  { %8 = vsyncpa [#allocation3], 0  ;;  %s7573_s0 = inlined_call_operand.hbm [shape: f32[3,128], index: 0, kind: input, shape index: {}]   ;;  %s7574_s1 = inlined_call_operand.hbm [shape: f32[960,128], index: 1, kind: input, shape index: {}]   ;;  %s7575_s2 = inlined_call_operand.hbm [shape: f32[56,128], index: 2, kind: input, shape index: {}]   ;;  %s7576_s3 = inlined_call_operand.hbm [shape: f32[2,128], index: 3, kind: output, shape index: {}]  }
   0x1   :  { %9 = vsyncpa [#allocation6], 0  ;;  %s26_s14 = sshll.u32 %s7574_s1, 4  ;;  %s27_s14 = int_to_ptr.hbm [resolvable:$true] %s26_s14 }
   0x2   :  { %10 = vsyncpa [#allocation4], 0  ;;  %s4994_s15 = smov [#allocation5]   ;;  %s16_s19 = sshll.u32 %s7573_s0, 4  ;;  %s17_s19 = int_to_ptr.hbm [resolvable:$true] %s16_s19 }
   0x3   :  { %s28_s16 = sshll.u32 %s4994_s15, 4  ;;  %s4995_s20 = smov 128   ;;  %s29_s16 = int_to_ptr.vmem [resolvable:$true] %s28_s16 }
   0x4   :  { %s4996_s21 = smov 8   ;;  %s4997_s22 = smov [#allocation2]  }
   0x5   :  { %34 = dma.hbm_to_vmem [thread:$0]  %s27_s14, 15360, %s29_s16, [#allocation6], %s4995_s20, %s4995_s20, %s4996_s21  }
   0x6   :  { %s18_s23 = sshll.u32 %s4997_s22, 4  ;;  %s39_s26 = sshll.u32 %s7575_s2, 4  ;;  %s19_s23 = int_to_ptr.vmem [resolvable:$true] %s18_s23  ;;  %s40_s26 = int_to_ptr.hbm [resolvable:$true] %s39_s26 }
   0x7   :  { %21 = dma.hbm_to_vmem [thread:$0]  %s17_s19, 64, %s19_s23, [#allocation3]  }
   0x8   :  { %s4998_s1 = smov [#allocation7]  }
   0x9   :  { %s41_s27 = sshll.u32 %s4998_s1, 4  ;;  %s42_s27 = int_to_ptr.vmem [resolvable:$true] %s41_s27 }
   0xa   :  { %47 = dma.hbm_to_vmem [thread:$0]  %s40_s26, 896, %s42_s27, [#allocation6], %s4995_s20, %s4995_s20, %s4996_s21  }
   0xb   :  { %4988 = dma.done.wait [#allocation3], 64  }
   0xc   :  { %4989 = vsyncadd [#allocation3], 4294967232 }
   0xd   :  { %4990 = dma.done.wait [#allocation6], 16256  }
   0xe   :  { %4991 = vsyncadd [#allocation6], 4294951040  ;;  %v4999_v0 = vmov 1   ;;  %v5000_v1 = vmov 0   ;;  %v5001_v2 = vmov 2   ;;  %v5075_v12 = vld [vmem:[#allocation7] sm:$0xff] }
   0xf   :  { %4472 = vset.pattern.permute.xlu1 %v4999_v0  ;;  %4471 = vset.pattern.permute.xlu0 %v5000_v1  ;;  %v5002_v3 = vmov 6.437752   ;;  %v91_v4 = vld [vmem:[#allocation7 + $0x8] sm:$0x3]  ;;  %v441_v5 = vld [vmem:[#allocation7] sm:$0x3] }
  0x10   :  { %4473 = vset.pattern.permute.xlu2 %v5001_v2  ;;  %4628 = vrcp.f32 %v5002_v3  ;;  %112 = vperm.xlu1 %4472, %v91_v4   ;;  %v61_v7 = vld [vmem:[#allocation2 + $0x2] sm:$0x1]  ;;  %v5003_v15 = vmov 3   ;;  %v5004_v34 = vmov 2.0   ;;  %v60_v42 = vld [vmem:[#allocation2] sm:$0x3] }
  0x11   :  { %100 = vperm.xlu0 %4471, %v91_v4   ;;  %524 = vperm.xlu2 %4473, %v441_v5   ;;  %v62_v9 = vmul.f32 2.0, %v61_v7  ;;  %vm7586_vm6 = vcmask 1041408   ;;  %s5044_s0 = smov [#allocation8]   ;;  %s4211_s30 = sshll.u32 %s7576_s3, 4  ;;  %s4212_s30 = int_to_ptr.hbm [resolvable:$true] %s4211_s30 }
  0x12   :  { %s4209_s2 = sshll.u32 %s5044_s0, 4  ;;  %s4210_s2 = int_to_ptr.vmem [resolvable:$true] %s4209_s2 }
  0x13   :  { %v63_v11 = vmul.f32 3.218876, %v62_v9 }
  0x15   :  { %v64_v14 = vmul.f32 1.442695, %v63_v11 }
  0x16   :  { %v4629_v6 = vpop.eup %4628 }
  0x17   :  { %v68_v8 = vmul.f32 6.437752, %v4629_v6  ;;  %4630 = vpow2.f32 %v64_v14  ;;  %vm72_vm0 = vweird.f32 %v4629_v6 }
  0x18   :  { %108 = vperm.xlu1 %4472, %v5075_v12  }
  0x19   :  { %v69_v10 = vsub.f32 1.0, %v68_v8  ;;  %95 = vperm.xlu0 %4471, %v5075_v12   ;;  %4474 = vset.pattern.permute.xlu2 %v5003_v15 }
  0x1a   :  { %529 = vperm.xlu2 %4474, %v441_v5  }
  0x1b   :  { %v70_v13 = vmul.f32 %v4629_v6, %v69_v10 }
  0x1d   :  { %v71_v16 = vadd.f32 %v4629_v6, %v70_v13  ;;  %v4631_v17 = vpop.eup %4630 }
  0x1e   :  { %v4222_v19 = vadd.f32 -1.0, %v4631_v17 }
  0x1f   :  { %v73_v18 = vsel %vm72_vm0, %v4629_v6, %v71_v16 }
  0x20   :  { %v74_v20 = vmul.f32 %v4222_v19, %v73_v18 }
  0x22   :  { %4632 = vrsqrt.f32 %v74_v20  ;;  %vm82_vm1 = vcmp.eq.f32.partialorder %v74_v20, inf  ;;  %v85_v27 = vand.u32 2147483648, %v74_v20  ;;  %vm84_vm2 = vcmp.eq.f32.partialorder %v74_v20, 0.0 }
  0x28   :  { %v4633_v21 = vpop.eup %4632 }
  0x29   :  { %v76_v22 = vmul.f32 %v4633_v21, %v74_v20 }
  0x2b   :  { %v77_v23 = vmul.f32 %v4633_v21, %v76_v22 }
  0x2d   :  { %v78_v24 = vmul.f32 0.5, %v77_v23  ;;  %v5005_v23 = vmov 4  }
  0x2e   :  { %4476 = vset.pattern.permute.xlu1 %v5005_v23  ;;  %4477 = vset.pattern.permute.xlu2 %v5005_v23 }
  0x2f   :  { %v79_v25 = vsub.f32 1.5, %v78_v24  ;;  %v5093_v24 = vld [vmem:[#allocation7 + $0x8] sm:$0xff]  ;;  %4475 = vset.pattern.permute.xlu0 %v5005_v23 }
  0x30   :  { %560 = vperm.xlu1 %4476, %v5093_v24   ;;  %555 = vperm.xlu0 %4475, %v5075_v12  }
  0x31   :  { %v80_v26 = vmul.f32 %v4633_v21, %v79_v25 }
  0x33   :  { %v81_v28 = vmul.f32 %v80_v26, %v74_v20 }
  0x35   :  { %v83_v29 = vsel %vm82_vm1, %v74_v20, %v81_v28 }
  0x36   :  { %v5079_v30 = vsel %vm84_vm2, %v85_v27, %v83_v29 }
  0x37   :  { %7594 = vst [vmem:[#allocation12_spill] sm:$0xff] %v5079_v30  ;;  %v427_v31 = vmul.f32 %v5079_v30, %v5079_v30 }
  0x39   :  { %v428_v32 = vadd.f32 1.0, %v427_v31 }
  0x3b   :  { %4634 = vrsqrt.f32 %v428_v32  ;;  %vm435_vm3 = vweird.f32 %v428_v32 }
  0x3c   :  { %4636 = vrcp.f32 %v5004_v34 }
  0x3d   :  { %4638 = vlog2.f32 %v5079_v30 }
  0x41   :  { %v4635_v33 = vpop.eup %4634 }
  0x42   :  { %v430_v35 = vmul.f32 %v4635_v33, %v428_v32  ;;  %vm436_vm4 = vweird.f32 %v4635_v33  ;;  %v4637_v38 = vpop.eup %4636 }
  0x43   :  { %vm437_vm5 = vmor %vm435_vm3, %vm436_vm4  ;;  %v493_v41 = vmul.f32 2.0, %v4637_v38  ;;  %vm497_vm7 = vweird.f32 %v4637_v38  ;;  %v4639_v6 = vpop.eup %4638 }
  0x44   :  { %v431_v36 = vmul.f32 %v4635_v33, %v430_v35  ;;  %v88_v7 = vmul.f32 0.6931472, %v4639_v6 }
  0x45   :  { %v494_v45 = vsub.f32 1.0, %v493_v41  ;;  %v5106_v41 = vld [vmem:[#allocation7 + $0x18] sm:$0xff] }
  0x46   :  { %v432_v37 = vmul.f32 0.5, %v431_v36  ;;  %v89_v9 = vmul.f32 0.25, %v88_v7  ;;  %570 = vperm.xlu1 %4476, %v5106_v41  }
  0x47   :  { %v495_v49 = vmul.f32 %v4637_v38, %v494_v45 }
  0x48   :  { %v433_v39 = vsub.f32 1.5, %v432_v37  ;;  %v92_v14 = vperm.slane %v89_v9, 0 }
  0x49   :  { %v496_v52 = vadd.f32 %v4637_v38, %v495_v49 }
  0x4a   :  { %v434_v40 = vmul.f32 %v4635_v33, %v433_v39 }
  0x4b   :  { %v498_v55 = vsel %vm497_vm7, %v4637_v38, %v496_v52 }
  0x4c   :  { %v5083_v43 = vsel %vm437_vm5, %v4635_v33, %v434_v40 }
  0x4d   :  { %7595 = vst [vmem:[#allocation13_spill] sm:$0xff] %v5083_v43  ;;  %v439_v44 = vperm.slane %v5083_v43, 0 }
  0x4f   :  { %v5086_v46 = vmul.f32 %v439_v44, %v60_v42 }
  0x51   :  { %v485_v47 = vsel %vm7586_vm6, %v5086_v46, 0.0 }
  0x52   :  { %v486_v48 = vrot.slane %v485_v47, 4 }
  0x54   :  { %v487_v50 = vadd.f32 %v486_v48, %v485_v47 }
  0x56   :  { %v488_v51 = vrot.slane %v487_v50, 2 }
  0x58   :  { %v489_v53 = vadd.f32 %v488_v51, %v487_v50 }
  0x5a   :  { %v490_v54 = vrot.slane %v489_v53, 1 }
  0x5c   :  { %v491_v56 = vadd.f32 %v490_v54, %v489_v53 }
  0x5e   :  { %v499_v57 = vmul.f32 %v498_v55, %v491_v56 }
  0x60   :  { %v500_v58 = vsub.f32 %v5086_v46, %v499_v57 }
  0x62   :  { %v501_v59 = vmul.f32 %v500_v58, %v500_v58 }
  0x64   :  { %v502_v60 = vsel %vm7586_vm6, %v501_v59, 0.0  ;;  %v5006_v59 = vmov 683565275  }
  0x65   :  { %v503_v61 = vrot.slane %v502_v60, 4 }
  0x67   :  { %v504_v62 = vadd.f32 %v503_v61, %v502_v60  ;;  %v5007_v61 = vmov 2475754826  }
  0x69   :  { %v505_v63 = vrot.slane %v504_v62, 2 }
  0x6b   :  { %v506_v0 = vadd.f32 %v505_v63, %v504_v62  ;;  %v525_v11 = vpop.permute.xlu2 %524  ;;  %v5008_v63 = vmov 2131351028  }
  0x6d   :  { %v507_v2 = vrot.slane %v506_v0, 1 }
  0x6f   :  { %v508_v3 = vadd.f32 %v507_v2, %v506_v0  ;;  %v5009_v2 = vmov 2102212464  }
  0x71   :  { %v509_v4 = vmul.f32 %v508_v3, %v498_v55 }
  0x73   :  { %v510_v5 = vadd.f32 1e-05, %v509_v4  ;;  %v5129_v4 = vld [vmem:[#allocation7 + $0x30] sm:$0x3] }
  0x74   :  { %v530_v27 = vpop.permute.xlu2 %529  ;;  %585 = vperm.xlu1 %4476, %v5129_v4  }
  0x75   :  { %4640 = vrsqrt.f32 %v510_v5  ;;  %vm517_vm8 = vweird.f32 %v510_v5 }
  0x7b   :  { %v4641_v8 = vpop.eup %4640 }
  0x7c   :  { %v512_v10 = vmul.f32 %v4641_v8, %v510_v5  ;;  %vm518_vm9 = vweird.f32 %v4641_v8 }
  0x7d   :  { %vm519_vm10 = vmor %vm517_vm8, %vm518_vm9 }
  0x7e   :  { %v513_v13 = vmul.f32 %v4641_v8, %v512_v10 }
  0x80   :  { %v514_v15 = vmul.f32 0.5, %v513_v13  ;;  %v5011_v13 = vmov 1326507024  }
  0x82   :  { %v515_v16 = vsub.f32 1.5, %v514_v15  ;;  %v113_v20 = vpop.permute.xlu1 %112 }
  0x83   :  { %v101_v17 = vpop.permute.xlu0 %100 }
  0x84   :  { %v104_v18 = vmul.f32 %v101_v17, %v92_v14  ;;  %v516_v19 = vmul.f32 %v4641_v8, %v515_v16 }
  0x86   :  { %v106_v21 = vmul.f32 6.2831855, %v104_v18  ;;  %v520_v22 = vsel %vm519_vm10, %v4641_v8, %v516_v19  ;;  %v5010_v8 = vmov 920167782   ;;  %vm588_vm10 = vcmask 15360  }
  0x87   :  { %v521_v25 = vmul.f32 %v520_v22, %v500_v58 }
  0x88   :  { %v5095_v26 = vadd.f32 %v113_v20, %v106_v21 }
  0x89   :  { %v527_v28 = vmul.f32 %v525_v11, %v521_v25 }
  0x8a   :  { %v272_v29 = vand.u32 2147483647, %v5095_v26  ;;  %v275_v31 = vand.u32 2139095040, %v5095_v26  ;;  %v109_v44 = vpop.permute.xlu1 %108 }
  0x8b   :  { %v96_v32 = vpop.permute.xlu0 %95  ;;  %v5103_v35 = vadd.f32 %v530_v27, %v527_v28 }
  0x8c   :  { %v276_v33 = vshrl.u32 %v275_v31, 23  ;;  %v279_v34 = vand.u32 8388607, %v272_v29  ;;  %v103_v36 = vmul.f32 %v96_v32, %v92_v14 }
  0x8d   :  { %v4229_v39 = vmul.f32 -1.442695, %v5103_v35 }
  0x8e   :  { %v4226_v37 = vadd.s32 4294967169, %v276_v33  ;;  %v280_v38 = vor.u32 8388608, %v279_v34  ;;  %v105_v40 = vmul.f32 6.2831855, %v103_v36 }
  0x8f   :  { %4642 = vpow2.f32 %v4229_v39 }
  0x90   :  { %v282_v42 = vadd.s32 1, %v4226_v37  ;;  %v5109_v45 = vshll.u32 %v280_v38, 8  ;;  %v5111_v47 = vadd.f32 %v109_v44, %v105_v40 }
  0x92   :  { %vm283_vm11 = vcmp.gt.s32.totalorder %v282_v42, 0  ;;  %v117_v49 = vand.u32 2147483647, %v5111_v47  ;;  %v120_v50 = vand.u32 2139095040, %v5111_v47  ;;  %v5116_v53 = vand.u32 65535, %v5109_v45 }
  0x93   :  { %v284_v48 = vsel %vm283_vm11, %v282_v42, 0  ;;  %v5119_v55 = vshrl.u32 %v5109_v45, 16 }
  0x94   :  { %v286_v51 = vand.u32 31, %v284_v48  ;;  %v285_v52 = vshrl.u32 %v284_v48, 5  ;;  %v121_v56 = vshrl.u32 %v120_v50, 23  ;;  %v5123_v57 = vand.u32 8388607, %v117_v49  ;;  %v5145_v50 = vld [vmem:[#allocation7 + $0x28] sm:$0xff] }
  0x95   :  { %v4643_v58 = vpop.eup %4642  ;;  %580 = vperm.xlu0 %4475, %v5145_v50  }
  0x96   :  { %v287_v54 = vsub.s32 32, %v286_v51  ;;  %v289_v60 = vshll.u32 %v5006_v59, %v286_v51  ;;  %v292_v62 = vshll.u32 %v5007_v61, %v286_v51  ;;  %v295_v0 = vshll.u32 %v5008_v63, %v286_v51 }
  0x97   :  { %v298_v3 = vshll.u32 %v5009_v2, %v286_v51  ;;  %v301_v9 = vshll.u32 %v5010_v8, %v286_v51  ;;  %vm304_vm12 = vcmp.lt.s32.totalorder %v285_v52, 1  ;;  %v5139_v18 = vadd.f32 1.0, %v4643_v58 }
  0x98   :  { %v290_v5 = vshrl.u32 %v5007_v61, %v287_v54  ;;  %v293_v6 = vshrl.u32 %v5008_v63, %v287_v54  ;;  %v296_v7 = vshrl.u32 %v5009_v2, %v287_v54  ;;  %v288_v10 = vshrl.u32 %v5006_v59, %v287_v54 }
  0x99   :  { %v299_v11 = vshrl.u32 %v5010_v8, %v287_v54  ;;  %v302_v14 = vshrl.u32 %v5011_v13, %v287_v54  ;;  %vm306_vm13 = vcmp.lt.s32.totalorder %v285_v52, 3  ;;  %vm307_vm14 = vcmp.lt.s32.totalorder %v285_v52, 4 }
  0x9a   :  { %v291_v15 = vor.u32 %v290_v5, %v289_v60  ;;  %v294_v16 = vor.u32 %v293_v6, %v292_v62  ;;  %v297_v17 = vor.u32 %v296_v7, %v295_v0  ;;  %4644 = vrcp.f32 %v5139_v18 }
  0x9b   :  { %v300_v19 = vor.u32 %v299_v11, %v298_v3  ;;  %v303_v20 = vor.u32 %v302_v14, %v301_v9  ;;  %vm305_vm15 = vcmp.lt.s32.totalorder %v285_v52, 2  ;;  %v4223_v34 = vadd.s32 4294967169, %v121_v56 }
  0x9c   :  { %v308_v21 = vsel %vm304_vm12, %v288_v10, %v291_v15  ;;  %v309_v22 = vsel %vm307_vm14, %v297_v17, 2102212464  ;;  %v312_v23 = vsel %vm304_vm12, %v291_v15, %v294_v16  ;;  %v316_v25 = vsel %vm304_vm12, %v294_v16, %v297_v17 }
  0x9d   :  { %v310_v27 = vsel %vm306_vm13, %v294_v16, %v309_v22  ;;  %v313_v28 = vsel %vm307_vm14, %v300_v19, 920167782  ;;  %v317_v31 = vsel %vm307_vm14, %v303_v20, 1326507024  ;;  %v546_v39 = vand.u32 2147483647, %v5139_v18 }
  0x9e   :  { %v314_v32 = vsel %vm306_vm13, %v297_v17, %v313_v28  ;;  %v318_v33 = vsel %vm306_vm13, %v300_v19, %v317_v31  ;;  %v5142_v36 = vsel %vm305_vm15, %v308_v21, %v310_v27  ;;  %vm542_vm0 = vweird.f32 %v5139_v18 }
  0x9f   :  { %v315_v37 = vsel %vm305_vm15, %v312_v23, %v314_v32  ;;  %v319_v38 = vsel %vm305_vm15, %v316_v25, %v318_v33  ;;  %v125_v54 = vor.u32 8388608, %v5123_v57  ;;  %v365_v62 = vmul.u32 %v5109_v45, %v5142_v36 }
  0xa0   :  { %v323_v40 = vand.u32 65535, %v319_v38  ;;  %v324_v42 = vshrl.u32 %v319_v38, 16  ;;  %v345_v44 = vand.u32 65535, %v315_v37  ;;  %v346_v48 = vshrl.u32 %v315_v37, 16  ;;  %v4645_v56 = vpop.eup %4644 }
  0xa1   :  { %v548_v0 = vand.u32 2147483648, %v5139_v18  ;;  %vm5159_vm1 = vcmp.eq.f32.partialorder %v546_v39, 8.507059e+37  ;;  %v127_v9 = vadd.s32 1, %v4223_v34  ;;  %v538_v19 = vmul.f32 %v4645_v56, %v5139_v18 }
  0xa2   :  { %v326_v51 = vmul.u32 %v324_v42, %v5116_v53  ;;  %v327_v52 = vmul.u32 %v323_v40, %v5119_v55  ;;  %v348_v58 = vmul.u32 %v346_v48, %v5116_v53  ;;  %v349_v60 = vmul.u32 %v345_v44, %v5119_v55 }
  0xa3   :  { %v325_v3 = vmul.u32 %v323_v40, %v5116_v53  ;;  %v328_v5 = vmul.u32 %v324_v42, %v5119_v55  ;;  %v347_v11 = vmul.u32 %v345_v44, %v5116_v53  ;;  %v350_v14 = vmul.u32 %v346_v48, %v5119_v55 }
  0xa4   :  { %v329_v6 = vshll.u32 %v326_v51, 16  ;;  %v331_v10 = vshll.u32 %v327_v52, 16  ;;  %v351_v15 = vshll.u32 %v348_v58, 16  ;;  %v353_v17 = vshll.u32 %v349_v60, 16 }
  0xa5   :  { %vm543_vm4 = vweird.f32 %v4645_v56  ;;  %v539_v25 = vsub.f32 1.0, %v538_v19  ;;  %v330_v27 = vshrl.u32 %v326_v51, 16  ;;  %vm128_vm8 = vcmp.gt.s32.totalorder %v127_v9, 0 }
  0xa6   :  { %vm333_vm2 = vc.u32 %v325_v3, %v329_v6  ;;  %v335_v16 = vadd.s32 %v329_v6, %v325_v3  ;;  %vm355_vm3 = vc.u32 %v347_v11, %v351_v15  ;;  %v357_v21 = vadd.s32 %v351_v15, %v347_v11  ;;  %vm5173_vm9 = vmor %vm542_vm0, %vm543_vm4 }
  0xa7   :  { %v334_v20 = vsel %vm333_vm2, 1, %v5000_v1  ;;  %v356_v23 = vsel %vm355_vm3, 1, %v5000_v1  ;;  %v540_v32 = vmul.f32 %v4645_v56, %v539_v25  ;;  %v352_v33 = vshrl.u32 %v348_v58, 16 }
  0xa8   :  { %v336_v22 = vadd.s32 %v334_v20, %v328_v5  ;;  %vm337_vm5 = vc.u32 %v335_v16, %v331_v10  ;;  %v358_v55 = vadd.s32 %v356_v23, %v350_v14  ;;  %vm359_vm7 = vc.u32 %v357_v21, %v353_v17  ;;  %v442_v23 = vld [vmem:[#allocation5] sm:$0xff] }
  0xa9   :  { %v338_v53 = vsel %vm337_vm5, 1, %v5000_v1  ;;  %v360_v31 = vsel %vm359_vm7, 1, %v5000_v1  ;;  %v549_v38 = vor.u32 1.1754944e-38, %v548_v0  ;;  %v129_v39 = vsel %vm128_vm8, %v127_v9, 0  ;;  %v5192_v9 = vld [vmem:[#allocation7 + $0x10] sm:$0xff] }
  0xaa   :  { %v340_v28 = vadd.s32 %v338_v53, %v336_v22  ;;  %v362_v34 = vadd.s32 %v360_v31, %v358_v55  ;;  %v332_v40 = vshrl.u32 %v327_v52, 16  ;;  %v541_v44 = vadd.f32 %v4645_v56, %v540_v32  ;;  %565 = vperm.xlu2 %4477, %v5192_v9   ;;  %v447_v53 = vld [vmem:[#allocation5 + $0x28] sm:$0xff] }
  0xab   :  { %v131_v48 = vand.u32 31, %v129_v39  ;;  %v354_v51 = vshrl.u32 %v349_v60, 16  ;;  %v5177_v3 = vadd.s32 %v357_v21, %v353_v17  ;;  %v5183_v18 = vshrl.u32 %v129_v39, 5 }
  0xac   :  { %v341_v42 = vadd.s32 %v340_v28, %v330_v27  ;;  %v363_v5 = vadd.s32 %v362_v34, %v352_v33  ;;  %v545_v58 = vsel %vm5173_vm9, %v4645_v56, %v541_v44  ;;  %v5012_v11 = vmov 5   ;;  %v5252_v34 = vld [vmem:[#allocation7 + $0x20] sm:$0xff] }
  0xad   :  { %v5185_v10 = vsub.s32 32, %v131_v48  ;;  %4479 = vset.pattern.permute.xlu1 %v5012_v11  ;;  %v550_v0 = vsel %vm5159_vm1, %v549_v38, %v545_v58  ;;  %v134_v60 = vshll.u32 %v5006_v59, %v131_v48  ;;  %v137_v14 = vshll.u32 %v5007_v61, %v131_v48  ;;  %v443_v58 = vld [vmem:[#allocation5 + $0x8] sm:$0xff] }
  0xae   :  { %v5179_v6 = vadd.s32 %v341_v42, %v332_v40  ;;  %v364_v52 = vadd.s32 %v363_v5, %v354_v51  ;;  %672 = vperm.xlu1 %4479, %v5145_v50   ;;  %v552_v56 = vmul.f32 %v550_v0, %v5103_v35  ;;  %v140_v15 = vshll.u32 %v5008_v63, %v131_v48 }
  0xaf   :  { %v135_v16 = vshrl.u32 %v5007_v61, %v5185_v10  ;;  %v138_v17 = vshrl.u32 %v5008_v63, %v5185_v10  ;;  %v141_v19 = vshrl.u32 %v5009_v2, %v5185_v10  ;;  %v143_v20 = vshll.u32 %v5009_v2, %v131_v48  ;;  %v445_v61 = vld [vmem:[#allocation5 + $0x18] sm:$0xff] }
  0xb0   :  { %vm367_vm11 = vc.u32 %v5179_v6, %v5177_v3  ;;  %v368_v7 = vadd.s32 1, %v364_v52  ;;  %v144_v35 = vshrl.u32 %v5010_v8, %v5185_v10  ;;  %v146_v21 = vshll.u32 %v5010_v8, %v131_v48  ;;  %4230 = vmatpush.msk.msra.mxu0 %vm7586_vm6, %v552_v56  ;;  %4417 = vmatpush.msk.msra.mxu1 %vm7586_vm6, %v552_v56  ;;  %v444_v8 = vld [vmem:[#allocation5 + $0x10] sm:$0xff] }
  0xb1   :  { %v147_v22 = vshrl.u32 %v5011_v13, %v5185_v10  ;;  %v5216_v25 = vor.u32 %v135_v16, %v134_v60  ;;  %v5218_v27 = vor.u32 %v138_v17, %v137_v14  ;;  %v142_v2 = vor.u32 %v141_v19, %v140_v15  ;;  %4418 = vmatpush.msk.msra.mxu2 %vm7586_vm6, %v552_v56 }
  0xb2   :  { %v369_v63 = vsel %vm367_vm11, %v368_v7, %v364_v52  ;;  %v145_v55 = vor.u32 %v144_v35, %v143_v20  ;;  %4419 = vmatpush.msk.msra.mxu3 %vm7586_vm6, %v552_v56  ;;  %vm149_vm12 = vcmp.lt.s32.totalorder %v5183_v18, 1  ;;  %vm152_vm13 = vcmp.lt.s32.totalorder %v5183_v18, 4  ;;  %4231 = vmatmul.msk.f32.vlgmr.msra.gmra.mxu0 %vm588_vm10, %v442_v23  ;;  %v446_v52 = vld [vmem:[#allocation5 + $0x20] sm:$0xff]  ;;  %v448_v56 = vld [vmem:[#allocation5 + $0x30] sm:$0x3] }
  0xb3   :  { %v370_v13 = vadd.s32 %v369_v63, %v365_v62  ;;  %v148_v28 = vor.u32 %v147_v22, %v146_v21  ;;  %v5230_v31 = vshll.u32 %v125_v54, 8  ;;  %4234 = vmatmul.msk.f32.vlgmr.msra.gmra.mxu2 %vm588_vm10, %v445_v61  ;;  %vm151_vm14 = vcmp.lt.s32.totalorder %v5183_v18, 3  ;;  %4236 = vmatmul.msk.f32.vlgmr.msra.gmra.mxu3 %vm588_vm10, %v447_v53 }
  0xb4   :  { %v157_v36 = vsel %vm149_vm12, %v5216_v25, %v5218_v27  ;;  %v158_v62 = vsel %vm152_vm13, %v145_v55, 920167782  ;;  %4233 = vmatmul.msk.f32.vlgmr.msra.gmra.mxu1 %vm588_vm10, %v444_v8  ;;  %vm150_vm15 = vcmp.lt.s32.totalorder %v5183_v18, 2  ;;  %v161_v54 = vsel %vm149_vm12, %v5218_v27, %v142_v2  ;;  %4269 = vmatpush.msk.msrb.mxu0 %vm7586_vm6, %v5086_v46 }
  0xb5   :  { %v371_v45 = vadd.s32 536870912, %v370_v13  ;;  %v159_v57 = vsel %vm151_vm14, %v142_v2, %v158_v62  ;;  %v162_v32 = vsel %vm152_vm13, %v148_v28, 1326507024  ;;  %v5013_v33 = vmov 8   ;;  %575 = vperm.xlu2 %4477, %v5252_v34  }
  0xb6   :  { %4481 = vset.pattern.permute.xlu1 %v5013_v33  ;;  %v160_v38 = vsel %vm150_vm15, %v157_v36, %v159_v57  ;;  %v163_v39 = vsel %vm151_vm14, %v145_v55, %v162_v32  ;;  %v166_v42 = vand.u32 65535, %v5230_v31  ;;  %v167_v0 = vshrl.u32 %v5230_v31, 16 }
  0xb7   :  { %v5256_v37 = vshrl.u32 %v371_v45, 30  ;;  %956 = vperm.xlu1 %4481, %v5129_v4   ;;  %v164_v40 = vsel %vm150_vm15, %v161_v54, %v163_v39  ;;  %v190_v44 = vand.u32 65535, %v160_v38  ;;  %v191_v48 = vshrl.u32 %v160_v38, 16 }
  0xb8   :  { %v168_v51 = vand.u32 65535, %v164_v40  ;;  %v169_v5 = vshrl.u32 %v164_v40, 16  ;;  %v366_v21 = vadd.s32 %v5177_v3, %v5179_v6  ;;  %v154_v22 = vsel %vm152_vm13, %v142_v2, 2102212464 }
  0xb9   :  { %v373_v46 = vshll.u32 %v5256_v37, 30  ;;  %v193_v60 = vmul.u32 %v191_v48, %v166_v42  ;;  %v194_v17 = vmul.u32 %v190_v44, %v167_v0  ;;  %v192_v61 = vmul.u32 %v190_v44, %v166_v42 }
  0xba   :  { %v171_v15 = vmul.u32 %v169_v5, %v166_v42  ;;  %v170_v7 = vmul.u32 %v168_v51, %v166_v42  ;;  %v172_v16 = vmul.u32 %v168_v51, %v167_v0  ;;  %4232 = vmatmul.msk.f32.gmra.mxu0 %vm588_vm10, %v443_v58  ;;  %v173_v23 = vmul.u32 %v169_v5, %v167_v0 }
  0xbb   :  { %v5269_v14 = vsub.s32 %v370_v13, %v373_v46  ;;  %4235 = vmatmul.msk.f32.gmra.mxu2 %vm588_vm10, %v446_v52  ;;  %v196_v35 = vshll.u32 %v193_v60, 16  ;;  %4237 = vmatmul.msk.f32.gmra.mxu3 %vm588_vm10, %v448_v56  ;;  %v195_v28 = vmul.u32 %v191_v48, %v167_v0  ;;  %v198_v45 = vshll.u32 %v194_v17, 16 }
  0xbc   :  { %v174_v20 = vshll.u32 %v171_v15, 16  ;;  %v176_v53 = vshll.u32 %v172_v16, 16  ;;  %v175_v57 = vshrl.u32 %v171_v15, 16  ;;  %v5014_v38 = vmov 7  }
  0xbd   :  { %vm375_vm0 = vcmp.lt.s32.totalorder %v5269_v14, 0  ;;  %v376_v19 = vsub.s32 0, %v5269_v14  ;;  %4478 = vset.pattern.permute.xlu2 %v5012_v11  ;;  %vm200_vm3 = vc.u32 %v192_v61, %v196_v35  ;;  %v202_v6 = vadd.s32 %v196_v35, %v192_v61 }
  0xbe   :  { %vm178_vm1 = vc.u32 %v170_v7, %v174_v20  ;;  %v180_v8 = vadd.s32 %v174_v20, %v170_v7  ;;  %676 = vperm.xlu2 %4478, %v5129_v4   ;;  %v201_v62 = vsel %vm200_vm3, 1, %v5000_v1  ;;  %v133_v39 = vshrl.u32 %v5006_v59, %v5185_v10 }
  0xbf   :  { %v377_v63 = vsel %vm375_vm0, %v376_v19, %v5269_v14  ;;  %v179_v55 = vsel %vm178_vm1, 1, %v5000_v1  ;;  %v203_v32 = vadd.s32 %v201_v62, %v195_v28  ;;  %vm204_vm4 = vc.u32 %v202_v6, %v198_v45  ;;  %4485 = vset.pattern.permute.xlu1 %v5014_v38 }
  0xc0   :  { %v378_v13 = vclz %v377_v63  ;;  %v181_v3 = vadd.s32 %v179_v55, %v173_v23  ;;  %vm182_vm2 = vc.u32 %v180_v8, %v176_v53  ;;  %v177_v40 = vshrl.u32 %v172_v16, 16  ;;  %913 = vperm.xlu1 %4485, %v5252_v34  }
  0xc1   :  { %v183_v36 = vsel %vm182_vm2, 1, %v5000_v1  ;;  %v205_v42 = vsel %vm204_vm4, 1, %v5000_v1  ;;  %v197_v46 = vshrl.u32 %v193_v60, 16  ;;  %v153_v52 = vsel %vm149_vm12, %v133_v39, %v5216_v25 }
  0xc2   :  { %v4227_v2 = vadd.s32 4294967294, %v378_v13  ;;  %v185_v54 = vadd.s32 %v183_v36, %v181_v3  ;;  %v207_v51 = vadd.s32 %v205_v42, %v203_v32  ;;  %v155_v0 = vsel %vm151_vm14, %v5218_v27, %v154_v22 }
  0xc3   :  { %v199_v10 = vshrl.u32 %v194_v17, 16  ;;  %v206_v60 = vadd.s32 %v202_v6, %v198_v45  ;;  %v156_v16 = vsel %vm150_vm15, %v153_v52, %v155_v0  ;;  %vm274_vm8 = vcmp.lt.s32.totalorder %v5095_v26, 0 }
  0xc4   :  { %vm4228_vm5 = vcmp.lt.s32.totalorder %v4227_v2, 0  ;;  %v186_v48 = vadd.s32 %v185_v54, %v175_v57  ;;  %v208_v1 = vadd.s32 %v207_v51, %v197_v46  ;;  %v210_v35 = vmul.u32 %v5230_v31, %v156_v16 }
  0xc5   :  { %v381_v44 = vsel %vm4228_vm5, 0, %v4227_v2  ;;  %vm5317_vm9 = vcmp.le.f32.partialorder %v272_v29, 0.7853982  ;;  %v396_v55 = vsub.s32 4, %v5256_v37  ;;  %vm415_vm0 = vweird.f32 %v5095_v26 }
  0xc6   :  { %v382_v5 = vsub.s32 32, %v381_v44  ;;  %v386_v58 = vsub.s32 4294967266, %v381_v44  ;;  %v5297_v59 = vadd.s32 %v186_v48, %v177_v40  ;;  %v383_v56 = vshll.u32 %v5269_v14, %v381_v44  ;;  %4480 = vset.pattern.permute.xlu2 %v5014_v38 }
  0xc7   :  { %v209_v19 = vadd.s32 %v208_v1, %v199_v10  ;;  %917 = vperm.xlu2 %4480, %v5145_v50   ;;  %v5015_v14 = vmov 6   ;;  %v397_v29 = vsel %vm274_vm8, %v396_v55, %v5256_v37  ;;  %vm119_vm1 = vcmp.lt.s32.totalorder %v5111_v47, 0 }
  0xc8   :  { %v384_v15 = vshrl.u32 %v366_v21, %v382_v5  ;;  %v387_v7 = vadd.s32 127, %v386_v58  ;;  %vm212_vm7 = vc.u32 %v5297_v59, %v206_v60  ;;  %4487 = vset.pattern.permute.xlu1 %v5012_v11  ;;  %4483 = vset.pattern.permute.xlu0 %v5015_v14  ;;  %v399_v32 = vsel %vm5317_vm9, 0, %v397_v29 }
  0xc9   :  { %v213_v27 = vadd.s32 1, %v209_v19  ;;  %664 = vperm.xlu1 %4487, %v5106_v41   ;;  %767 = vperm.xlu0 %4483, %v5129_v4   ;;  %v416_v37 = vadd.s32 3, %v399_v32  ;;  %v211_v58 = vadd.s32 %v206_v60, %v5297_v59  ;;  %vm5357_vm2 = vcmp.le.f32.partialorder %v117_v49, 0.7853982 }
  0xca   :  { %v385_v25 = vor.u32 %v384_v15, %v383_v56  ;;  %v388_v20 = vshll.u32 %v387_v7, 23 }
  0xcb   :  { %v214_v21 = vsel %vm212_vm7, %v213_v27, %v209_v19  ;;  %v417_v56 = vand.u32 3, %v416_v37  ;;  %vm260_vm7 = vweird.f32 %v5111_v47  ;;  %v456_v37 = vld [vmem:[#allocation5 + $0x38] sm:$0xff] }
  0xcc   :  { %v389_v17 = vor.u32 4788187, %v388_v20  ;;  %v392_v22 = vcvt.s32.f32 %v385_v25  ;;  %v215_v23 = vadd.s32 %v214_v21, %v210_v35 }
  0xcd   :  { %vm419_vm13 = vcmp.eq.s32.totalorder %v417_v56, 0  ;;  %vm422_vm14 = vcmp.eq.s32.totalorder %v417_v56, 2  ;;  %vm418_vm15 = vcmp.lt.s32.totalorder %v417_v56, 2 }
  0xce   :  { %v390_v18 = vand.u32 2147483647, %v389_v17  ;;  %v216_v63 = vadd.s32 536870912, %v215_v23 }
  0xcf   :  { %4482 = vset.pattern.permute.xlu2 %v5012_v11 }
  0xd0   :  { %v393_v61 = vmul.f32 %v392_v22, %v390_v18  ;;  %v5311_v8 = vshrl.u32 %v216_v63, 30  ;;  %668 = vperm.xlu2 %4482, %v5252_v34  }
  0xd1   :  { %4489 = vset.pattern.permute.xlu1 %v5013_v33  ;;  %4484 = vset.pattern.permute.xlu0 %v5014_v38 }
  0xd2   :  { %v394_v53 = vxor.u32 2147483648, %v393_v61  ;;  %v218_v28 = vshll.u32 %v5311_v8, 30  ;;  %948 = vperm.xlu1 %4489, %v5252_v34   ;;  %921 = vperm.xlu0 %4484, %v5129_v4  }
  0xd4   :  { %v395_v13 = vsel %vm274_vm8, %v394_v53, %v393_v61  ;;  %v219_v6 = vsub.s32 %v215_v23, %v218_v28  ;;  %v241_v53 = vsub.s32 4, %v5311_v8  ;;  %vm7577_vm8 = vcmask 80896  }
  0xd5   :  { %v398_v45 = vsel %vm5317_vm9, %v5095_v26, %v395_v13 }
  0xd6   :  { %v400_v3 = vmul.f32 %v398_v45, %v398_v45  ;;  %vm220_vm11 = vcmp.lt.s32.totalorder %v219_v6, 0  ;;  %v221_v36 = vsub.s32 0, %v219_v6  ;;  %v242_v55 = vsel %vm119_vm1, %v241_v53, %v5311_v8 }
  0xd8   :  { %v408_v2 = vmul.f32 -0.00019511016, %v400_v3  ;;  %v401_v62 = vmul.f32 -0.001358992, %v400_v3  ;;  %v222_v54 = vsel %vm220_vm11, %v221_v36, %v219_v6  ;;  %4486 = vset.pattern.permute.xlu2 %v5013_v33 }
  0xd9   :  { %v223_v39 = vclz %v222_v54  ;;  %952 = vperm.xlu2 %4486, %v5145_v50  }
  0xda   :  { %v409_v57 = vadd.f32 0.008332121, %v408_v2  ;;  %v402_v40 = vadd.f32 0.041655596, %v401_v62  ;;  %4491 = vset.pattern.permute.xlu1 %v5015_v14  ;;  %909 = vperm.xlu0 %4484, %v5106_v41  }
  0xdb   :  { %v4224_v44 = vadd.s32 4294967294, %v223_v39  ;;  %759 = vperm.xlu1 %4491, %v5252_v34  }
  0xdc   :  { %v410_v42 = vmul.f32 %v409_v57, %v400_v3  ;;  %v403_v4 = vmul.f32 %v402_v40, %v400_v3 }
  0xdd   :  { %vm4225_vm12 = vcmp.lt.s32.totalorder %v4224_v44, 0 }
  0xde   :  { %v411_v48 = vadd.f32 -0.16666654, %v410_v42  ;;  %v404_v46 = vadd.f32 -0.4999988, %v403_v4  ;;  %v226_v5 = vsel %vm4225_vm12, 0, %v4224_v44 }
  0xdf   :  { %v227_v52 = vsub.s32 32, %v226_v5  ;;  %v231_v0 = vsub.s32 4294967266, %v226_v5  ;;  %v228_v15 = vshll.u32 %v219_v6, %v226_v5  ;;  %v5396_v5 = vld [vmem:[#allocation7] sm:$0xff] }
  0xe0   :  { %v412_v51 = vmul.f32 %v411_v48, %v400_v3  ;;  %v405_v10 = vmul.f32 %v404_v46, %v400_v3  ;;  %v244_v3 = vsel %vm5357_vm2, 0, %v242_v55  ;;  %v463_v46 = vld [vmem:[#allocation5 + $0x70] sm:$0xff] }
  0xe1   :  { %v229_v7 = vshrl.u32 %v211_v58, %v227_v52  ;;  %v232_v16 = vadd.s32 127, %v231_v0  ;;  %4488 = vset.pattern.permute.xlu2 %v5015_v14  ;;  %v261_v62 = vadd.s32 3, %v244_v3  ;;  %v459_v58 = vld [vmem:[#allocation5 + $0x50] sm:$0xff]  ;;  %v466_v52 = vld [vmem:[#allocation5 + $0x88] sm:$0xff]  ;;  %v561_v0 = vpop.permute.xlu1 %560 }
  0xe2   :  { %v413_v1 = vadd.f32 1.0, %v412_v51  ;;  %v406_v19 = vadd.f32 1.0, %v405_v10  ;;  %763 = vperm.xlu2 %4488, %v5145_v50   ;;  %4497 = vset.pattern.permute.xlu0 %v5012_v11  ;;  %v467_v10 = vld [vmem:[#allocation5 + $0x90] sm:$0xff] }
  0xe3   :  { %v230_v34 = vor.u32 %v229_v7, %v228_v15  ;;  %v233_v20 = vshll.u32 %v232_v16, 23  ;;  %4493 = vset.pattern.permute.xlu1 %v5012_v11  ;;  %652 = vperm.xlu0 %4497, %v5075_v12   ;;  %v262_v39 = vand.u32 3, %v261_v62  ;;  %v461_v15 = vld [vmem:[#allocation5 + $0x60] sm:$0xff]  ;;  %v468_v7 = vld [vmem:[#allocation5 + $0x98] sm:$0xff] }
  0xe4   :  { %v414_v25 = vmul.f32 %v413_v1, %v398_v45  ;;  %v423_v27 = vxor.u32 2147483648, %v406_v19  ;;  %656 = vperm.xlu1 %4493, %v5093_v24  }
  0xe5   :  { %v234_v59 = vor.u32 4788187, %v233_v20  ;;  %v237_v21 = vcvt.s32.f32 %v230_v34  ;;  %vm264_vm3 = vcmp.eq.s32.totalorder %v262_v39, 0  ;;  %vm267_vm4 = vcmp.eq.s32.totalorder %v262_v39, 2 }
  0xe6   :  { %v420_v17 = vxor.u32 2147483648, %v414_v25  ;;  %v424_v35 = vsel %vm422_vm14, %v423_v27, %v414_v25  ;;  %vm263_vm5 = vcmp.lt.s32.totalorder %v262_v39, 2  ;;  %v469_v25 = vld [vmem:[#allocation5 + $0xa0] sm:$0x3] }
  0xe7   :  { %v235_v50 = vand.u32 2147483647, %v234_v59 }
  0xe8   :  { %v421_v60 = vsel %vm419_vm13, %v406_v19, %v420_v17  ;;  %v462_v19 = vld [vmem:[#allocation5 + $0x68] sm:$0x3] }
  0xe9   :  { %v425_v18 = vsel %vm418_vm15, %v421_v60, %v424_v35  ;;  %v238_v23 = vmul.f32 %v237_v21, %v235_v50  ;;  %v571_v1 = vpop.permute.xlu1 %570  ;;  %v5016_v60 = vmov 50.0  }
  0xea   :  { %v5346_v22 = vsel %vm415_vm0, nan, %v425_v18  ;;  %4490 = vset.pattern.permute.xlu2 %v5012_v11  ;;  %4646 = vrcp.f32 %v5016_v60  ;;  %v1322_v18 = vld [vmem:[#allocation5 + $0x150] sm:$0xff] }
  0xeb   :  { %4238 = vmatpush.msk.msrb.mxu1 %vm7586_vm6, %v5346_v22  ;;  %4246 = vmatpush.msk.msrb.mxu2 %vm7586_vm6, %v5346_v22  ;;  %v239_v61 = vxor.u32 2147483648, %v238_v23 }
  0xec   :  { %660 = vperm.xlu2 %4490, %v5192_v9   ;;  %4498 = vset.pattern.permute.xlu0 %v5013_v33 }
  0xed   :  { %v240_v63 = vsel %vm119_vm1, %v239_v61, %v238_v23  ;;  %4495 = vset.pattern.permute.xlu1 %v5014_v38  ;;  %944 = vperm.xlu0 %4498, %v5106_v41  }
  0xee   :  { %v243_v11 = vsel %vm5357_vm2, %v5111_v47, %v240_v63  ;;  %901 = vperm.xlu1 %4495, %v5093_v24   ;;  %v464_v47 = vld [vmem:[#allocation5 + $0x78] sm:$0xff] }
  0xef   :  { %v245_v31 = vmul.f32 %v243_v11, %v243_v11 }
  0xf0   :  { %v4647_v63 = vpop.eup %4646 }
  0xf1   :  { %v253_v49 = vmul.f32 -0.00019511016, %v245_v31  ;;  %v246_v13 = vmul.f32 -0.001358992, %v245_v31  ;;  %v586_v16 = vpop.permute.xlu1 %585  ;;  %vm847_vm9 = vweird.f32 %v4647_v63 }
  0xf3   :  { %v254_v28 = vadd.f32 0.008332121, %v253_v49  ;;  %v247_v45 = vadd.f32 0.041655596, %v246_v13 }
  0xf4   :  { %4492 = vset.pattern.permute.xlu2 %v5014_v38 }
  0xf5   :  { %905 = vperm.xlu2 %4492, %v5192_v9   ;;  %v255_v6 = vmul.f32 %v254_v28, %v245_v31  ;;  %v248_v29 = vmul.f32 %v247_v45, %v245_v31  ;;  %932 = vperm.xlu0 %4498, %v5075_v12  }
  0xf6   :  { %4499 = vset.pattern.permute.xlu1 %v5015_v14 }
  0xf7   :  { %v256_v2 = vadd.f32 -0.16666654, %v255_v6  ;;  %v249_v36 = vadd.f32 -0.4999988, %v248_v29  ;;  %751 = vperm.xlu1 %4499, %v5192_v9   ;;  %v843_v6 = vmul.f32 50.0, %v4647_v63 }
  0xf9   :  { %v257_v8 = vmul.f32 %v256_v2, %v245_v31  ;;  %v250_v57 = vmul.f32 %v249_v36, %v245_v31  ;;  %v844_v62 = vsub.f32 1.0, %v843_v6 }
  0xfb   :  { %v258_v54 = vadd.f32 1.0, %v257_v8  ;;  %v251_v32 = vadd.f32 1.0, %v250_v57  ;;  %v845_v39 = vmul.f32 %v4647_v63, %v844_v62 }
  0xfd   :  { %4494 = vset.pattern.permute.xlu2 %v5015_v14  ;;  %v259_v40 = vmul.f32 %v258_v54, %v243_v11  ;;  %v268_v42 = vxor.u32 2147483648, %v251_v32 }
  0xfe   :  { %755 = vperm.xlu2 %4494, %v5106_v41   ;;  %v457_v41 = vld [vmem:[#allocation5 + $0x40] sm:$0xff] }
  0xff   :  { %v265_v44 = vxor.u32 2147483648, %v259_v40  ;;  %4501 = vset.pattern.permute.xlu1 %v5013_v33  ;;  %v269_v4 = vsel %vm267_vm4, %v268_v42, %v259_v40 }
 0x100   :  { %936 = vperm.xlu1 %4501, %v5093_v24  }
 0x101   :  { %v266_v12 = vsel %vm264_vm3, %v251_v32, %v265_v44  ;;  %v846_v44 = vadd.f32 %v4647_v63, %v845_v39 }
 0x102   :  { %v270_v48 = vsel %vm263_vm5, %v266_v12, %v269_v4 }
 0x103   :  { %v5382_v51 = vsel %vm260_vm7, nan, %v270_v48  ;;  %v5429_v48 = vsel %vm847_vm9, %v4647_v63, %v846_v44 }
 0x104   :  { %719 = vmatpush.msrb.mxu1 %v5382_v51  ;;  %806 = vmatpush.msrb.mxu2 %v5382_v51  ;;  %v566_v56 = vpop.permute.xlu2 %565  ;;  %7604 = vst [vmem:[#allocation14_spill] sm:$0xff] %v5429_v48 }
 0x105   :  { %4239 = vmatmul.msk.f32.vlgmr.msrb.gmra.mxu1 %vm7577_vm8, %v456_v37  ;;  %4247 = vmatmul.msk.f32.vlgmr.msrb.gmra.mxu2 %vm7577_vm8, %v463_v46 }
 0x106   :  { %4292 = vmatpush.msk.msra.mxu2 %vm7586_vm6, %v5346_v22  ;;  %4496 = vset.pattern.permute.xlu2 %v5013_v33  ;;  %v465_v33 = vld [vmem:[#allocation5 + $0x80] sm:$0xff] }
 0x107   :  { %940 = vperm.xlu2 %4496, %v5192_v9   ;;  %v458_v9 = vld [vmem:[#allocation5 + $0x48] sm:$0xff] }
 0x108   :  { %1767 = vmatpush.msra.mxu2 %v5382_v51  ;;  %4503 = vset.pattern.permute.xlu1 %v5015_v14 }
 0x109   :  { %743 = vperm.xlu1 %4503, %v5396_v5  }
 0x10a   :  { %4338 = vmatpush.msk.msrb.mxu2 %vm7586_vm6, %v5346_v22 }
 0x10c   :  { %2717 = vmatpush.msrb.mxu2 %v5382_v51 }
 0x10d   :  { %4240 = vmatmul.msk.f32.gmra.mxu1 %vm7577_vm8, %v457_v41  ;;  %4248 = vmatmul.msk.f32.gmra.mxu2 %vm7577_vm8, %v464_v47 }
 0x10f   :  { %4500 = vset.pattern.permute.xlu2 %v5014_v38  ;;  %v460_v38 = vld [vmem:[#allocation5 + $0x58] sm:$0xff]  ;;  %v576_v34 = vpop.permute.xlu2 %575 }
 0x110   :  { %897 = vperm.xlu2 %4500, %v5396_v5  }
 0x115   :  { %4241 = vmatmul.msk.f32.gmra.mxu1 %vm7577_vm8, %v458_v9  ;;  %4249 = vmatmul.msk.f32.gmra.mxu2 %vm7577_vm8, %v465_v33 }
 0x118   :  { %4502 = vset.pattern.permute.xlu2 %v5015_v14  ;;  %v556_v14 = vpop.permute.xlu0 %555  ;;  %v5419_v31 = vpop.permute.xlu2 %676 }
 0x119   :  { %747 = vperm.xlu2 %4502, %v5093_v24  }
 0x11d   :  { %4242 = vmatmul.msk.f32.gmra.mxu1 %vm7577_vm8, %v459_v58  ;;  %4250 = vmatmul.msk.f32.gmra.mxu2 %vm7577_vm8, %v466_v52 }
 0x120   :  { %v581_v26 = vpop.permute.xlu0 %580  ;;  %v5416_v53 = vpop.permute.xlu1 %672 }
 0x121   :  { %v5427_v32 = vpop.permute.xlu2 %917 }
 0x125   :  { %4243 = vmatmul.msk.f32.gmra.mxu1 %vm7577_vm8, %v460_v38  ;;  %4251 = vmatmul.msk.f32.gmra.mxu2 %vm7577_vm8, %v467_v10 }
 0x129   :  { %v5425_v57 = vpop.permute.xlu1 %956 }
 0x12a   :  { %v5433_v41 = vpop.permute.xlu2 %668 }
 0x12d   :  { %4244 = vmatmul.msk.f32.gmra.mxu1 %vm7577_vm8, %v461_v15  ;;  %4252 = vmatmul.msk.f32.gmra.mxu2 %vm7577_vm8, %v468_v7 }
 0x12f   :  { %v630_v24 = vpop.f32.mrf.mxu0 }
 0x130   :  { %v631_v17 = vadd.f32 %v630_v24, %v556_v14 }
 0x131   :  { %v636_v27 = vpop.f32.mrf.mxu1 }
 0x132   :  { %v637_v21 = vadd.f32 %v636_v27, %v566_v56  ;;  %v5431_v37 = vpop.permute.xlu1 %913 }
 0x135   :  { %4245 = vmatmul.msk.f32.gmra.mxu1 %vm7577_vm8, %v462_v19  ;;  %4253 = vmatmul.msk.f32.gmra.mxu2 %vm7577_vm8, %v469_v25  ;;  %v5452_v19 = vpop.permute.xlu2 %952 }
 0x136   :  { %v639_v20 = vpop.f32.mrf.mxu2  ;;  %v645_v59 = vpop.f32.mrf.mxu3 }
 0x137   :  { %v633_v35 = vpop.f32.mrf.mxu0  ;;  %v640_v23 = vadd.f32 %v639_v20, %v571_v1  ;;  %v646_v28 = vadd.f32 %v645_v59, %v581_v26 }
 0x138   :  { %v634_v50 = vadd.f32 %v633_v35, %v561_v0 }
 0x13a   :  { %v829_v61 = vadd.f32 %v634_v50, %v631_v17 }
 0x13b   :  { %v5446_v7 = vpop.permute.xlu1 %664  ;;  %v5465_v26 = vpop.permute.xlu0 %767 }
 0x13c   :  { %v830_v11 = vadd.f32 %v829_v61, %v637_v21 }
 0x13d   :  { %4293 = vmatmul.msk.f32.vlgmr.msra.gmra.mxu2 %vm7577_vm8, %v1322_v18  ;;  %v5463_v18 = vpop.permute.xlu2 %763 }
 0x13e   :  { %v642_v49 = vpop.f32.mrf.mxu2  ;;  %4384 = vmatpush.msk.msra.mxu2 %vm7586_vm6, %v5346_v22  ;;  %v831_v55 = vadd.f32 %v830_v11, %v640_v23  ;;  %v648_v45 = vpop.f32.mrf.mxu3 }
 0x13f   :  { %v643_v13 = vadd.f32 %v642_v49, %v576_v34  ;;  %v649_v3 = vadd.f32 %v648_v45, %v586_v16 }
 0x140   :  { %3667 = vmatpush.msra.mxu2 %v5382_v51 }
 0x141   :  { %v832_v29 = vadd.f32 %v831_v55, %v643_v13  ;;  %v834_v2 = vsel %vm7586_vm6, %v649_v3, 0.0 }
 0x143   :  { %v833_v36 = vadd.f32 %v832_v29, %v646_v28 }
 0x145   :  { %v835_v8 = vadd.f32 %v834_v2, %v833_v36 }
 0x146   :  { %v661_v55 = vpop.permute.xlu2 %660 }
 0x147   :  { %v836_v54 = vrot.slane %v835_v8, 4 }
 0x149   :  { %v837_v40 = vadd.f32 %v836_v54, %v835_v8 }
 0x14b   :  { %v838_v42 = vrot.slane %v837_v40, 2 }
 0x14d   :  { %v839_v12 = vadd.f32 %v838_v42, %v837_v40 }
 0x14f   :  { %v840_v4 = vrot.slane %v839_v12, 1  ;;  %v906_v29 = vpop.permute.xlu2 %905 }
 0x151   :  { %v841_v46 = vadd.f32 %v840_v4, %v839_v12 }
 0x153   :  { %v849_v47 = vmul.f32 %v5429_v48, %v841_v46 }
 0x155   :  { %v850_v9 = vsub.f32 %v631_v17, %v849_v47  ;;  %v851_v33 = vsub.f32 %v634_v50, %v849_v47  ;;  %v5436_v58 = vsub.f32 %v637_v21, %v849_v47  ;;  %v5438_v52 = vsub.f32 %v640_v23, %v849_v47  ;;  %v5461_v21 = vpop.permute.xlu1 %948 }
 0x156   :  { %v5440_v10 = vsub.f32 %v643_v13, %v849_v47  ;;  %v5444_v15 = vsub.f32 %v649_v3, %v849_v47  ;;  %v5448_v24 = vsub.f32 %v646_v28, %v849_v47  ;;  %v5470_v3 = vpop.permute.xlu0 %921 }
 0x157   :  { %v857_v0 = vmul.f32 %v850_v9, %v850_v9  ;;  %v858_v38 = vmul.f32 %v851_v33, %v851_v33  ;;  %v859_v1 = vmul.f32 %v5436_v58, %v5436_v58  ;;  %v860_v14 = vmul.f32 %v5438_v52, %v5438_v52 }
 0x158   :  { %v861_v25 = vmul.f32 %v5440_v10, %v5440_v10  ;;  %v863_v20 = vmul.f32 %v5444_v15, %v5444_v15  ;;  %v862_v27 = vmul.f32 %v5448_v24, %v5448_v24  ;;  %v756_v40 = vpop.permute.xlu2 %755 }
 0x159   :  { %v864_v56 = vadd.f32 %v858_v38, %v857_v0 }
 0x15a   :  { %v869_v60 = vsel %vm7586_vm6, %v863_v20, 0.0 }
 0x15b   :  { %v865_v16 = vadd.f32 %v864_v56, %v859_v1 }
 0x15d   :  { %v866_v34 = vadd.f32 %v865_v16, %v860_v14  ;;  %v5467_v13 = vpop.permute.xlu1 %759 }
 0x15e   :  { %v910_v36 = vpop.permute.xlu0 %909 }
 0x15f   :  { %v867_v17 = vadd.f32 %v866_v34, %v861_v25 }
 0x161   :  { %v868_v59 = vadd.f32 %v867_v17, %v862_v27  ;;  %v941_v0 = vpop.permute.xlu2 %940 }
 0x163   :  { %v870_v35 = vadd.f32 %v869_v60, %v868_v59 }
 0x165   :  { %v871_v50 = vrot.slane %v870_v35, 4  ;;  %v657_v6 = vpop.permute.xlu1 %656 }
 0x166   :  { %v653_v44 = vpop.permute.xlu0 %652 }
 0x167   :  { %v872_v23 = vadd.f32 %v871_v50, %v870_v35 }
 0x169   :  { %v873_v61 = vrot.slane %v872_v23, 2 }
 0x16a   :  { %v898_v17 = vpop.permute.xlu2 %897 }
 0x16b   :  { %v874_v63 = vadd.f32 %v873_v61, %v872_v23 }
 0x16d   :  { %v875_v11 = vrot.slane %v874_v63, 1  ;;  %v902_v54 = vpop.permute.xlu1 %901 }
 0x16e   :  { %v945_v1 = vpop.permute.xlu0 %944 }
 0x16f   :  { %v876_v49 = vadd.f32 %v875_v11, %v874_v63 }
 0x171   :  { %v877_v28 = vmul.f32 %v876_v49, %v5429_v48 }
 0x173   :  { %v878_v45 = vadd.f32 1e-05, %v877_v28 }
 0x175   :  { %4648 = vrsqrt.f32 %v878_v45  ;;  %v752_v47 = vpop.permute.xlu1 %751  ;;  %vm885_vm12 = vweird.f32 %v878_v45 }
 0x176   :  { %v933_v50 = vpop.permute.xlu0 %932 }
 0x17b   :  { %v4649_v2 = vpop.eup %4648 }
 0x17c   :  { %v880_v62 = vmul.f32 %v4649_v2, %v878_v45  ;;  %vm886_vm11 = vweird.f32 %v4649_v2 }
 0x17d   :  { %vm887_vm13 = vmor %vm885_vm12, %vm886_vm11  ;;  %v937_v20 = vpop.permute.xlu1 %936 }
 0x17e   :  { %v881_v8 = vmul.f32 %v4649_v2, %v880_v62 }
 0x180   :  { %v882_v42 = vmul.f32 0.5, %v881_v8 }
 0x182   :  { %v721_v39 = vpop.f32.mrf.mxu1  ;;  %v883_v4 = vsub.f32 1.5, %v882_v42 }
 0x183   :  { %v722_v63 = vadd.f32 %v721_v39, %v653_v44  ;;  %v748_v39 = vpop.permute.xlu2 %747 }
 0x184   :  { %v884_v38 = vmul.f32 %v4649_v2, %v883_v4 }
 0x185   :  { %v966_v62 = vadd.f32 1.0, %v722_v63  ;;  %v744_v42 = vpop.permute.xlu1 %743 }
 0x186   :  { %v5472_v14 = vsel %vm887_vm13, %v4649_v2, %v884_v38 }
 0x187   :  { %v889_v25 = vmul.f32 %v5472_v14, %v850_v9  ;;  %v890_v34 = vmul.f32 %v5472_v14, %v851_v33  ;;  %v891_v27 = vmul.f32 %v5472_v14, %v5436_v58  ;;  %v892_v49 = vmul.f32 %v5472_v14, %v5438_v52 }
 0x188   :  { %v808_v12 = vpop.f32.mrf.mxu2  ;;  %v893_v33 = vmul.f32 %v5472_v14, %v5440_v10 }
 0x189   :  { %v924_v60 = vmul.f32 %v898_v17, %v889_v25  ;;  %v925_v35 = vmul.f32 %v902_v54, %v890_v34  ;;  %v926_v61 = vmul.f32 %v906_v29, %v891_v27  ;;  %v927_v54 = vmul.f32 %v910_v36, %v892_v49 }
 0x18a   :  { %v724_v46 = vpop.f32.mrf.mxu1  ;;  %v928_v44 = vmul.f32 %v5431_v37, %v893_v33  ;;  %v809_v38 = vadd.f32 %v808_v12, %v744_v42  ;;  %v894_v37 = vmul.f32 %v5472_v14, %v5448_v24  ;;  %v895_v49 = vmul.f32 %v5472_v14, %v5444_v15 }
 0x18b   :  { %v725_v28 = vadd.f32 %v724_v46, %v657_v6  ;;  %v959_v9 = vadd.f32 %v933_v50, %v924_v60  ;;  %v960_v45 = vadd.f32 %v937_v20, %v925_v35  ;;  %v961_v2 = vadd.f32 %v941_v0, %v926_v61 }
 0x18c   :  { %v963_v60 = vadd.f32 %v5461_v21, %v928_v44  ;;  %v929_v50 = vmul.f32 %v5427_v32, %v894_v37 }
 0x18d   :  { %v967_v4 = vadd.f32 1.0, %v725_v28 }
 0x18f   :  { %v974_v52 = vmul.f32 %v967_v4, %v960_v45  ;;  %v930_v45 = vmul.f32 %v5470_v3, %v895_v49 }
 0x190   :  { %v811_v56 = vpop.f32.mrf.mxu2 }
 0x191   :  { %v812_v0 = vadd.f32 %v811_v56, %v748_v39  ;;  %v965_v4 = vadd.f32 %v5425_v57, %v930_v45 }
 0x192   :  { %v727_v16 = vpop.f32.mrf.mxu1 }
 0x193   :  { %v728_v11 = vadd.f32 %v727_v16, %v661_v55  ;;  %v973_v55 = vmul.f32 %v966_v62, %v959_v9  ;;  %v5487_v17 = vadd.f32 %v974_v52, %v812_v0  ;;  %v477_v0 = vld [vmem:[#allocation5 + $0xe0] sm:$0xff] }
 0x194   :  { %4270 = vmatmul.msk.f32.vlgmr.msrb.gmra.mxu0 %vm588_vm10, %v477_v0 }
 0x195   :  { %v968_v8 = vadd.f32 1.0, %v728_v11  ;;  %v5485_v36 = vadd.f32 %v973_v55, %v809_v38 }
 0x197   :  { %v975_v16 = vmul.f32 %v968_v8, %v961_v2 }
 0x198   :  { %v814_v59 = vpop.f32.mrf.mxu2 }
 0x199   :  { %v815_v10 = vadd.f32 %v814_v59, %v752_v47  ;;  %v4255_v59 = vmul.f32 -1.442695, %v5487_v17 }
 0x19a   :  { %v730_v23 = vpop.f32.mrf.mxu1 }
 0x19b   :  { %v731_v58 = vadd.f32 %v730_v23, %v5446_v7  ;;  %v962_v7 = vadd.f32 %v945_v1, %v927_v54  ;;  %v5492_v35 = vadd.f32 %v975_v16, %v815_v10 }
 0x19d   :  { %v969_v6 = vadd.f32 1.0, %v731_v58  ;;  %v4256_v21 = vmul.f32 -1.442695, %v5492_v35 }
 0x19f   :  { %v976_v27 = vmul.f32 %v969_v6, %v962_v7 }
 0x1a0   :  { %v817_v29 = vpop.f32.mrf.mxu2 }
 0x1a1   :  { %v818_v34 = vadd.f32 %v817_v29, %v756_v40  ;;  %v4254_v40 = vmul.f32 -1.442695, %v5485_v36 }
 0x1a2   :  { %v733_v46 = vpop.f32.mrf.mxu1 }
 0x1a3   :  { %v734_v25 = vadd.f32 %v733_v46, %v5433_v41  ;;  %v5494_v47 = vadd.f32 %v976_v27, %v818_v34  ;;  %4650 = vpow2.f32 %v4254_v40 }
 0x1a4   :  { %4652 = vpow2.f32 %v4255_v59 }
 0x1a5   :  { %v970_v20 = vadd.f32 1.0, %v734_v25  ;;  %v4257_v61 = vmul.f32 -1.442695, %v5494_v47  ;;  %4654 = vpow2.f32 %v4256_v21 }
 0x1a7   :  { %v977_v41 = vmul.f32 %v970_v20, %v963_v60  ;;  %4656 = vpow2.f32 %v4257_v61  ;;  %v478_v61 = vld [vmem:[#allocation5 + $0xe8] sm:$0xff] }
 0x1a8   :  { %v820_v12 = vpop.f32.mrf.mxu2  ;;  %4271 = vmatmul.msk.f32.gmra.mxu0 %vm588_vm10, %v478_v61 }
 0x1a9   :  { %v821_v1 = vadd.f32 %v820_v12, %v5467_v13  ;;  %v964_v13 = vadd.f32 %v5452_v19, %v929_v50  ;;  %v4651_v33 = vpop.eup %4650 }
 0x1aa   :  { %v736_v56 = vpop.f32.mrf.mxu1  ;;  %v4653_v62 = vpop.eup %4652  ;;  %v5515_v54 = vadd.f32 1.0, %v4651_v33 }
 0x1ab   :  { %v5500_v23 = vadd.f32 %v977_v41, %v821_v1  ;;  %v737_v24 = vadd.f32 %v736_v56, %v5416_v53  ;;  %v4655_v19 = vpop.eup %4654 }
 0x1ac   :  { %v5520_v3 = vadd.f32 1.0, %v4655_v19 }
 0x1ad   :  { %v4258_v63 = vmul.f32 -1.442695, %v5500_v23  ;;  %v971_v11 = vadd.f32 1.0, %v737_v24  ;;  %v4657_v14 = vpop.eup %4656 }
 0x1ae   :  { %v5523_v55 = vadd.f32 1.0, %v4657_v14  ;;  %v1054_v49 = vand.u32 2147483647, %v5520_v3  ;;  %vm1050_vm2 = vweird.f32 %v5520_v3 }
 0x1af   :  { %4658 = vpow2.f32 %v4258_v63  ;;  %v978_v28 = vmul.f32 %v971_v11, %v964_v13 }
 0x1b0   :  { %v823_v32 = vpop.f32.mrf.mxu2  ;;  %vm1065_vm14 = vweird.f32 %v5523_v55 }
 0x1b1   :  { %v824_v53 = vadd.f32 %v823_v32, %v5463_v18  ;;  %v5518_v18 = vadd.f32 1.0, %v4653_v62  ;;  %v1056_v32 = vand.u32 2147483648, %v5520_v3 }
 0x1b2   :  { %v739_v9 = vpop.f32.mrf.mxu1 }
 0x1b3   :  { %v5511_v58 = vadd.f32 %v978_v28, %v824_v53  ;;  %v740_v2 = vadd.f32 %v739_v9, %v5419_v31  ;;  %v1039_v11 = vand.u32 2147483647, %v5518_v18  ;;  %vm1035_vm7 = vweird.f32 %v5518_v18 }
 0x1b5   :  { %v4259_v8 = vmul.f32 -1.442695, %v5511_v58  ;;  %v972_v15 = vadd.f32 1.0, %v740_v2  ;;  %v4659_v42 = vpop.eup %4658  ;;  %v1069_v2 = vand.u32 2147483647, %v5523_v55 }
 0x1b6   :  { %v5525_v44 = vadd.f32 1.0, %v4659_v42 }
 0x1b7   :  { %4660 = vpow2.f32 %v4259_v8  ;;  %v979_v39 = vmul.f32 %v972_v15, %v965_v4  ;;  %v5017_v15 = vmov 9  }
 0x1b8   :  { %v826_v29 = vpop.f32.mrf.mxu2  ;;  %4662 = vrcp.f32 %v5515_v54  ;;  %4505 = vset.pattern.permute.xlu1 %v5017_v15  ;;  %4504 = vset.pattern.permute.xlu2 %v5017_v15  ;;  %vm1080_vm11 = vweird.f32 %v5525_v44  ;;  %v1086_v0 = vand.u32 2147483648, %v5525_v44 }
 0x1b9   :  { %v827_v31 = vadd.f32 %v826_v29, %v5465_v26  ;;  %4664 = vrcp.f32 %v5518_v18  ;;  %v5593_v29 = vld [vmem:[#allocation7 + $0x8] sm:$0xff]  ;;  %1128 = vperm.xlu2 %4504, %v5396_v5  }
 0x1ba   :  { %4666 = vrcp.f32 %v5520_v3  ;;  %1132 = vperm.xlu1 %4505, %v5593_v29  }
 0x1bb   :  { %v5528_v52 = vadd.f32 %v979_v39, %v827_v31  ;;  %4668 = vrcp.f32 %v5523_v55 }
 0x1bc   :  { %4670 = vrcp.f32 %v5525_v44 }
 0x1bd   :  { %v4661_v57 = vpop.eup %4660  ;;  %v4260_v6 = vmul.f32 -1.442695, %v5528_v52 }
 0x1be   :  { %v5535_v26 = vadd.f32 1.0, %v4661_v57  ;;  %v5537_v46 = vpop.eup %4662 }
 0x1bf   :  { %4672 = vpow2.f32 %v4260_v6  ;;  %v5540_v38 = vpop.eup %4664  ;;  %v1016_v37 = vmul.f32 %v5537_v46, %v5515_v54  ;;  %v479_v6 = vld [vmem:[#allocation5 + $0xf0] sm:$0xff] }
 0x1c0   :  { %4674 = vrcp.f32 %v5535_v26  ;;  %v5542_v16 = vpop.eup %4666  ;;  %v1031_v27 = vmul.f32 %v5540_v38, %v5518_v18  ;;  %vm1036_vm3 = vweird.f32 %v5540_v38  ;;  %vm1095_vm4 = vweird.f32 %v5535_v26  ;;  %4272 = vmatmul.msk.f32.gmra.mxu0 %vm588_vm10, %v479_v6  ;;  %v472_v6 = vld [vmem:[#allocation5 + $0xb8] sm:$0xff] }
 0x1c1   :  { %v5544_v10 = vpop.eup %4668  ;;  %v1046_v1 = vmul.f32 %v5542_v16, %v5520_v3  ;;  %v1017_v59 = vsub.f32 1.0, %v1016_v37  ;;  %vm1051_vm15 = vweird.f32 %v5542_v16  ;;  %v1099_v42 = vand.u32 2147483647, %v5535_v26 }
 0x1c2   :  { %v5546_v25 = vpop.eup %4670  ;;  %v1061_v41 = vmul.f32 %v5544_v10, %v5523_v55  ;;  %v1032_v56 = vsub.f32 1.0, %v1031_v27  ;;  %v1101_v4 = vand.u32 2147483648, %v5535_v26  ;;  %vm1066_vm12 = vweird.f32 %v5544_v10 }
 0x1c3   :  { %v1076_v12 = vmul.f32 %v5546_v25, %v5525_v44  ;;  %v1047_v21 = vsub.f32 1.0, %v1046_v1  ;;  %v5572_v53 = vmul.f32 %v5537_v46, %v1017_v59  ;;  %vm1081_vm1 = vweird.f32 %v5546_v25 }
 0x1c4   :  { %v1062_v24 = vsub.f32 1.0, %v1061_v41  ;;  %v1033_v28 = vmul.f32 %v5540_v38, %v1032_v56  ;;  %v1102_v41 = vor.u32 1.1754944e-38, %v1101_v4  ;;  %v1071_v1 = vand.u32 2147483648, %v5523_v55 }
 0x1c5   :  { %v4673_v7 = vpop.eup %4672  ;;  %v1077_v50 = vsub.f32 1.0, %v1076_v12  ;;  %v1048_v62 = vmul.f32 %v5542_v16, %v1047_v21  ;;  %vm1100_vm8 = vcmp.eq.f32.partialorder %v1099_v42, 8.507059e+37  ;;  %v1026_v55 = vand.u32 2147483648, %v5515_v54 }
 0x1c6   :  { %v5548_v34 = vpop.eup %4674  ;;  %v5550_v20 = vadd.f32 1.0, %v4673_v7  ;;  %v1063_v45 = vmul.f32 %v5544_v10, %v1062_v24  ;;  %v483_v7 = vld [vmem:[#allocation5 + $0x110] sm:$0x3] }
 0x1c7   :  { %v1091_v60 = vmul.f32 %v5548_v34, %v5535_v26  ;;  %v1078_v33 = vmul.f32 %v5546_v25, %v1077_v50  ;;  %vm1096_vm0 = vweird.f32 %v5548_v34  ;;  %v1084_v26 = vand.u32 2147483647, %v5525_v44 }
 0x1c8   :  { %4676 = vrcp.f32 %v5550_v20  ;;  %v1116_v14 = vand.u32 2147483648, %v5550_v20  ;;  %v1114_v31 = vand.u32 2147483647, %v5550_v20  ;;  %vm5602_vm9 = vmor %vm1095_vm4, %vm1096_vm0  ;;  %vm1110_vm13 = vweird.f32 %v5550_v20 }
 0x1c9   :  { %v1092_v40 = vsub.f32 1.0, %v1091_v60  ;;  %v1079_v57 = vadd.f32 %v5546_v25, %v1078_v33  ;;  %vm5616_vm0 = vmor %vm1080_vm11, %vm1081_vm1  ;;  %v1064_v12 = vadd.f32 %v5544_v10, %v1063_v45  ;;  %v1087_v50 = vor.u32 1.1754944e-38, %v1086_v0  ;;  %v476_v60 = vld [vmem:[#allocation5 + $0xd8] sm:$0x3] }
 0x1ca   :  { %v1117_v44 = vor.u32 1.1754944e-38, %v1116_v14  ;;  %vm5632_vm1 = vmor %vm1065_vm14, %vm1066_vm12  ;;  %vm1021_vm14 = vweird.f32 %v5537_v46  ;;  %v1057_v14 = vor.u32 1.1754944e-38, %v1056_v32  ;;  %vm1020_vm11 = vweird.f32 %v5515_v54 }
 0x1cb   :  { %v1093_v63 = vmul.f32 %v5548_v34, %v1092_v40  ;;  %v1068_v61 = vsel %vm5632_vm1, %v5544_v10, %v1064_v12  ;;  %v5652_v10 = vld [vmem:[#allocation7 + $0x10] sm:$0xff]  ;;  %vm1055_vm12 = vcmp.eq.f32.partialorder %v1054_v49, 8.507059e+37  ;;  %v1027_v49 = vor.u32 1.1754944e-38, %v1026_v55  ;;  %v1329_v12 = vld [vmem:[#allocation5 + $0x188] sm:$0xff] }
 0x1cc   :  { %1136 = vperm.xlu1 %4505, %v5652_v10   ;;  %v5019_v0 = vmov 11  }
 0x1cd   :  { %v1094_v8 = vadd.f32 %v5548_v34, %v1093_v63  ;;  %v5018_v63 = vmov 10  }
 0x1ce   :  { %v4677_v13 = vpop.eup %4676  ;;  %4507 = vset.pattern.permute.xlu0 %v5018_v63  ;;  %4506 = vset.pattern.permute.xlu2 %v5018_v63 }
 0x1cf   :  { %v1106_v9 = vmul.f32 %v4677_v13, %v5550_v20  ;;  %vm1111_vm5 = vweird.f32 %v4677_v13  ;;  %v1098_v37 = vsel %vm5602_vm9, %v5548_v34, %v1094_v8  ;;  %v1049_v20 = vadd.f32 %v5542_v16, %v1048_v62  ;;  %1223 = vperm.xlu0 %4507, %v5593_v29   ;;  %1219 = vperm.xlu2 %4506, %v5396_v5  }
 0x1d0   :  { %vm1112_vm4 = vmor %vm1110_vm13, %vm1111_vm5  ;;  %vm1115_vm9 = vcmp.eq.f32.partialorder %v1114_v31, 8.507059e+37  ;;  %v1083_v34 = vsel %vm5616_vm0, %v5546_v25, %v1079_v57  ;;  %v1103_v59 = vsel %vm1100_vm8, %v1102_v41, %v1098_v37  ;;  %vm1085_vm5 = vcmp.eq.f32.partialorder %v1084_v26, 8.507059e+37  ;;  %v482_v31 = vld [vmem:[#allocation5 + $0x108] sm:$0xff]  ;;  %v473_v26 = vld [vmem:[#allocation5 + $0xc0] sm:$0xff] }
 0x1d1   :  { %v1107_v19 = vsub.f32 1.0, %v1106_v9  ;;  %v1034_v25 = vadd.f32 %v5540_v38, %v1033_v28  ;;  %v1072_v9 = vor.u32 1.1754944e-38, %v1071_v1  ;;  %vm5646_vm8 = vmor %vm1050_vm2, %vm1051_vm15  ;;  %v1125_v28 = vmul.f32 %v1103_v59, %v5511_v58  ;;  %v5721_v57 = vld [vmem:[#allocation7 + $0x28] sm:$0xff] }
 0x1d2   :  { %vm1070_vm15 = vcmp.eq.f32.partialorder %v1069_v2, 8.507059e+37  ;;  %v1053_v45 = vsel %vm5646_vm8, %v5542_v16, %v1049_v20  ;;  %v1019_v62 = vadd.f32 %v5537_v46, %v5572_v53  ;;  %vm5672_vm2 = vmor %vm1035_vm7, %vm1036_vm3  ;;  %v1024_v53 = vand.u32 2147483647, %v5515_v54  ;;  %v474_v37 = vld [vmem:[#allocation5 + $0xc8] sm:$0xff] }
 0x1d3   :  { %v1108_v39 = vmul.f32 %v4677_v13, %v1107_v19  ;;  %v480_v19 = vld [vmem:[#allocation5 + $0xf8] sm:$0xff]  ;;  %v1073_v8 = vsel %vm1070_vm15, %v1072_v9, %v1068_v61  ;;  %v1038_v32 = vsel %vm5672_vm2, %v5540_v38, %v1034_v25  ;;  %v1058_v2 = vsel %vm1055_vm12, %v1057_v14, %v1053_v45  ;;  %vm1022_vm3 = vmor %vm1020_vm11, %vm1021_vm14 }
 0x1d4   :  { %4273 = vmatmul.msk.f32.gmra.mxu0 %vm588_vm10, %v480_v19  ;;  %v1123_v4 = vmul.f32 %v1073_v8, %v5494_v47  ;;  %vm1040_vm7 = vcmp.eq.f32.partialorder %v1039_v11, 8.507059e+37  ;;  %v1122_v54 = vmul.f32 %v1058_v2, %v5492_v35  ;;  %vm1025_vm13 = vcmp.eq.f32.partialorder %v1024_v53, 8.507059e+37  ;;  %v481_v11 = vld [vmem:[#allocation5 + $0x100] sm:$0xff] }
 0x1d5   :  { %v1109_v27 = vadd.f32 %v4677_v13, %v1108_v39  ;;  %v5694_v39 = vld [vmem:[#allocation7 + $0x18] sm:$0xff]  ;;  %vm1155_vm0 = vcmask 408576  }
 0x1d6   :  { %1140 = vperm.xlu1 %4505, %v5694_v39  }
 0x1d7   :  { %v1113_v40 = vsel %vm1112_vm4, %v4677_v13, %v1109_v27  ;;  %v1088_v13 = vsel %vm1085_vm5, %v1087_v50, %v1083_v34  ;;  %4508 = vset.pattern.permute.xlu0 %v5017_v15  ;;  %1227 = vperm.xlu2 %4506, %v5652_v10   ;;  %v5020_v27 = vmov 12  }
 0x1d8   :  { %v1118_v56 = vsel %vm1115_vm9, %v1117_v44, %v1113_v40  ;;  %v1124_v16 = vmul.f32 %v1088_v13, %v5500_v23  ;;  %v1023_v23 = vsel %vm1022_vm3, %v5537_v46, %v1019_v62  ;;  %v470_v46 = vld [vmem:[#allocation5 + $0xa8] sm:$0xff] }
 0x1d9   :  { %v1126_v21 = vmul.f32 %v1118_v56, %v5528_v52  ;;  %v1041_v52 = vand.u32 2147483648, %v5518_v18  ;;  %v1028_v38 = vsel %vm1025_vm13, %v1027_v49, %v1023_v23  ;;  %v5699_v18 = vld [vmem:[#allocation7 + $0x20] sm:$0xff] }
 0x1da   :  { %1144 = vperm.xlu0 %4508, %v5699_v18   ;;  %v1120_v35 = vmul.f32 %v1028_v38, %v5485_v36  ;;  %v471_v36 = vld [vmem:[#allocation5 + $0xb0] sm:$0xff] }
 0x1db   :  { %4261 = vmatpush.msk.msrb.mxu3 %vm7586_vm6, %v1126_v21  ;;  %v1042_v42 = vor.u32 1.1754944e-38, %v1041_v52 }
 0x1dc   :  { %4274 = vmatmul.msk.f32.gmra.mxu0 %vm588_vm10, %v481_v11 }
 0x1dd   :  { %1190 = vmatpush.msrb.mxu3 %v1125_v28  ;;  %v1043_v3 = vsel %vm1040_vm7, %v1042_v42, %v1038_v32 }
 0x1de   :  { %v1121_v47 = vmul.f32 %v1043_v3, %v5487_v17  ;;  %4509 = vset.pattern.permute.xlu1 %v5018_v63  ;;  %v5716_v17 = vld [vmem:[#allocation7 + $0x30] sm:$0x3] }
 0x1df   :  { %1191 = vmatpush.msrb.mxu3 %v1124_v16  ;;  %1235 = vperm.xlu1 %4509, %v5699_v18  }
 0x1e0   :  { %1231 = vperm.xlu2 %4506, %v5694_v39  }
 0x1e1   :  { %1192 = vmatpush.msrb.mxu3 %v1123_v4 }
 0x1e2   :  { %4511 = vset.pattern.permute.xlu0 %v5018_v63 }
 0x1e3   :  { %1193 = vmatpush.msrb.mxu3 %v1122_v54  ;;  %1243 = vperm.xlu0 %4511, %v5716_v17  }
 0x1e4   :  { %4275 = vmatmul.msk.f32.gmra.mxu0 %vm588_vm10, %v482_v31 }
 0x1e5   :  { %1194 = vmatpush.msrb.mxu3 %v1121_v47 }
 0x1e7   :  { %1195 = vmatpush.msrb.mxu3 %v1120_v35  ;;  %1239 = vperm.xlu1 %4509, %v5721_v57  }
 0x1e8   :  { %4262 = vmatmul.msk.f32.vlgmr.msrb.gmra.mxu3 %vm1155_vm0, %v470_v46  ;;  %4510 = vset.pattern.permute.xlu2 %v5017_v15  ;;  %v475_v15 = vld [vmem:[#allocation5 + $0xd0] sm:$0xff] }
 0x1e9   :  { %4300 = vmatpush.msk.msra.mxu3 %vm7586_vm6, %v5346_v22  ;;  %1148 = vperm.xlu2 %4510, %v5721_v57  }
 0x1eb   :  { %1854 = vmatpush.msra.mxu3 %v5382_v51  ;;  %4515 = vset.pattern.permute.xlu0 %v5020_v27 }
 0x1ec   :  { %4276 = vmatmul.msk.f32.gmra.mxu0 %vm588_vm10, %v483_v7  ;;  %1459 = vperm.xlu0 %4515, %v5721_v57   ;;  %vm7615_vm10 = vcmask 80896  }
 0x1ed   :  { %4346 = vmatpush.msk.msrb.mxu3 %vm7586_vm6, %v5346_v22  ;;  %vm7620_vm8 = vmmov %vm7615_vm10 }
 0x1ef   :  { %2804 = vmatpush.msrb.mxu3 %v5382_v51  ;;  %4512 = vset.pattern.permute.xlu1 %v5019_v0 }
 0x1f0   :  { %4263 = vmatmul.msk.f32.gmra.mxu3 %vm1155_vm0, %v471_v36  ;;  %1428 = vperm.xlu1 %4512, %v5716_v17  }
 0x1f1   :  { %1152 = vperm.xlu2 %4510, %v5716_v17  }
 0x1f4   :  { %4518 = vset.pattern.permute.xlu0 %v5019_v0 }
 0x1f5   :  { %1408 = vperm.xlu0 %4518, %v5593_v29  }
 0x1f8   :  { %4264 = vmatmul.msk.f32.gmra.mxu3 %vm1155_vm0, %v472_v6  ;;  %4514 = vset.pattern.permute.xlu1 %v5020_v27 }
 0x1f9   :  { %4513 = vset.pattern.permute.xlu2 %v5019_v0  ;;  %1463 = vperm.xlu1 %4514, %v5716_v17  }
 0x1fa   :  { %1424 = vperm.xlu2 %4513, %v5721_v57  }
 0x200   :  { %4265 = vmatmul.msk.f32.gmra.mxu3 %vm1155_vm0, %v473_v26 }
 0x201   :  { %4516 = vset.pattern.permute.xlu1 %v5019_v0 }
 0x202   :  { %1420 = vperm.xlu2 %4513, %v5699_v18   ;;  %1416 = vperm.xlu1 %4516, %v5694_v39  }
 0x208   :  { %4266 = vmatmul.msk.f32.gmra.mxu3 %vm1155_vm0, %v474_v37 }
 0x20a   :  { %4517 = vset.pattern.permute.xlu2 %v5020_v27  ;;  %1412 = vperm.xlu1 %4516, %v5652_v10  }
 0x20b   :  { %1455 = vperm.xlu2 %4517, %v5699_v18  }
 0x210   :  { %4267 = vmatmul.msk.f32.gmra.mxu3 %vm1155_vm0, %v475_v15 }
 0x211   :  { %v1287_v44 = vpop.f32.mrf.mxu0 }
 0x212   :  { %4519 = vset.pattern.permute.xlu1 %v5020_v27 }
 0x213   :  { %1451 = vperm.xlu2 %4517, %v5694_v39   ;;  %1447 = vperm.xlu1 %4519, %v5652_v10   ;;  %v1129_v1 = vpop.permute.xlu2 %1128 }
 0x218   :  { %4268 = vmatmul.msk.f32.gmra.mxu3 %vm1155_vm0, %v476_v60 }
 0x21b   :  { %4520 = vset.pattern.permute.xlu2 %v5019_v0  ;;  %1443 = vperm.xlu1 %4519, %v5593_v29  }
 0x21c   :  { %1404 = vperm.xlu2 %4520, %v5396_v5  }
 0x220   :  { %4301 = vmatmul.msk.f32.vlgmr.msra.gmra.mxu3 %vm7615_vm10, %v1329_v12 }
 0x221   :  { %4392 = vmatpush.msk.msra.mxu3 %vm7586_vm6, %v5346_v22 }
 0x223   :  { %3754 = vmatpush.msra.mxu3 %v5382_v51 }
 0x224   :  { %4521 = vset.pattern.permute.xlu2 %v5020_v27 }
 0x225   :  { %1439 = vperm.xlu2 %4521, %v5396_v5   ;;  %v1290_v41 = vpop.f32.mrf.mxu0 }
 0x229   :  { %v1220_v56 = vpop.permute.xlu2 %1219 }
 0x22a   :  { %v1288_v62 = vadd.f32 %v1287_v44, %v1220_v56 }
 0x22c   :  { %v1133_v40 = vpop.permute.xlu1 %1132 }
 0x231   :  { %v1228_v24 = vpop.permute.xlu2 %1227 }
 0x23a   :  { %v1232_v13 = vpop.permute.xlu2 %1231 }
 0x23d   :  { %v1293_v34 = vpop.f32.mrf.mxu0 }
 0x23e   :  { %v1137_v51 = vpop.permute.xlu1 %1136  ;;  %v1294_v8 = vadd.f32 %v1293_v34, %v1228_v24 }
 0x241   :  { %v1224_v63 = vpop.permute.xlu0 %1223 }
 0x242   :  { %v1291_v52 = vadd.f32 %v1290_v41, %v1224_v63 }
 0x243   :  { %v1149_v58 = vpop.permute.xlu2 %1148 }
 0x248   :  { %v1141_v21 = vpop.permute.xlu1 %1140 }
 0x24b   :  { %v1153_v7 = vpop.permute.xlu2 %1152 }
 0x24c   :  { %v1145_v45 = vpop.permute.xlu0 %1144 }
 0x251   :  { %v1296_v59 = vpop.f32.mrf.mxu0  ;;  %v1236_v9 = vpop.permute.xlu1 %1235 }
 0x252   :  { %v1297_v53 = vadd.f32 %v1296_v59, %v1232_v13 }
 0x254   :  { %v1425_v24 = vpop.permute.xlu2 %1424 }
 0x255   :  { %v1244_v35 = vpop.permute.xlu0 %1243 }
 0x259   :  { %v1299_v25 = vpop.f32.mrf.mxu0  ;;  %v1240_v2 = vpop.permute.xlu1 %1239 }
 0x25a   :  { %v1300_v23 = vadd.f32 %v1299_v25, %v1236_v9 }
 0x261   :  { %v1302_v5 = vpop.f32.mrf.mxu0 }
 0x262   :  { %v1303_v38 = vadd.f32 %v1302_v5, %v1240_v2 }
 0x269   :  { %v1305_v46 = vpop.f32.mrf.mxu0 }
 0x26a   :  { %v1306_v31 = vadd.f32 %v1305_v46, %v1244_v35 }
 0x26b   :  { %v1197_v20 = vpop.f32.mrf.mxu3 }
 0x26c   :  { %v1198_v19 = vadd.f32 %v1197_v20, %v1129_v1 }
 0x26e   :  { %v5753_v42 = vadd.f32 %v1288_v62, %v1198_v19 }
 0x273   :  { %v1200_v22 = vpop.f32.mrf.mxu3 }
 0x274   :  { %v1201_v28 = vadd.f32 %v1200_v22, %v1133_v40 }
 0x276   :  { %v5751_v55 = vadd.f32 %v1291_v52, %v1201_v28 }
 0x278   :  { %v1343_v49 = vadd.f32 %v5751_v55, %v5753_v42 }
 0x27b   :  { %v1203_v50 = vpop.f32.mrf.mxu3 }
 0x27c   :  { %v1204_v14 = vadd.f32 %v1203_v50, %v1137_v51 }
 0x27e   :  { %v5755_v4 = vadd.f32 %v1294_v8, %v1204_v14  ;;  %v1429_v8 = vpop.permute.xlu1 %1428 }
 0x280   :  { %v1344_v11 = vadd.f32 %v1343_v49, %v5755_v4 }
 0x283   :  { %v1206_v61 = vpop.f32.mrf.mxu3 }
 0x284   :  { %v1207_v16 = vadd.f32 %v1206_v61, %v1141_v21 }
 0x286   :  { %v5759_v54 = vadd.f32 %v1297_v53, %v1207_v16  ;;  %v1464_v49 = vpop.permute.xlu1 %1463 }
 0x288   :  { %7616 = vst [vmem:[#allocation15_spill] sm:$0xff] %v5759_v54  ;;  %v1345_v6 = vadd.f32 %v1344_v11, %v5759_v54 }
 0x28b   :  { %v1209_v33 = vpop.f32.mrf.mxu3 }
 0x28c   :  { %v1210_v3 = vadd.f32 %v1209_v33, %v1145_v45 }
 0x28e   :  { %v5762_v36 = vadd.f32 %v1300_v23, %v1210_v3 }
 0x290   :  { %7617 = vst [vmem:[#allocation16_spill] sm:$0xff] %v5762_v36  ;;  %v1346_v37 = vadd.f32 %v1345_v6, %v5762_v36  ;;  %v1417_v6 = vpop.permute.xlu1 %1416 }
 0x293   :  { %v1212_v32 = vpop.f32.mrf.mxu3 }
 0x294   :  { %v1213_v47 = vadd.f32 %v1212_v32, %v1149_v58  ;;  %v1421_v32 = vpop.permute.xlu2 %1420 }
 0x296   :  { %v5765_v26 = vadd.f32 %v1303_v38, %v1213_v47 }
 0x298   :  { %7618 = vst [vmem:[#allocation17_spill] sm:$0xff] %v5765_v26  ;;  %v1347_v60 = vadd.f32 %v1346_v37, %v5765_v26 }
 0x29b   :  { %v1215_v0 = vpop.f32.mrf.mxu3 }
 0x29c   :  { %v1216_v27 = vadd.f32 %v1215_v0, %v1153_v7  ;;  %v1456_v35 = vpop.permute.xlu2 %1455 }
 0x29e   :  { %v5768_v15 = vadd.f32 %v1306_v31, %v1216_v27 }
 0x2a0   :  { %7619 = vst [vmem:[#allocation18_spill] sm:$0xff] %v5768_v15  ;;  %v1348_v12 = vsel %vm7586_vm6, %v5768_v15, 0.0 }
 0x2a1   :  { %v1349_v44 = vadd.f32 %v1348_v12, %v1347_v60  ;;  %v1413_v60 = vpop.permute.xlu1 %1412 }
 0x2a3   :  { %v1350_v41 = vrot.slane %v1349_v44, 4 }
 0x2a4   :  { %v1452_v0 = vpop.permute.xlu2 %1451 }
 0x2a5   :  { %v1351_v1 = vadd.f32 %v1350_v41, %v1349_v44 }
 0x2a7   :  { %v1352_v20 = vrot.slane %v1351_v1, 2 }
 0x2a9   :  { %v1353_v40 = vadd.f32 %v1352_v20, %v1351_v1  ;;  %v1460_v20 = vpop.permute.xlu0 %1459 }
 0x2ab   :  { %v1354_v34 = vrot.slane %v1353_v40, 1 }
 0x2ac   :  { %v1405_v44 = vpop.permute.xlu2 %1404 }
 0x2ad   :  { %v1355_v22 = vadd.f32 %v1354_v34, %v1353_v40 }
 0x2af   :  { %v1356_v56 = vmul.f32 %v1355_v22, %v5429_v48  ;;  %v1448_v22 = vpop.permute.xlu1 %1447 }
 0x2b1   :  { %v1357_v51 = vsub.f32 %v5753_v42, %v1356_v56  ;;  %v5776_v59 = vsub.f32 %v5751_v55, %v1356_v56  ;;  %v1359_v50 = vsub.f32 %v5755_v4, %v1356_v56  ;;  %v1360_v21 = vsub.f32 %v5759_v54, %v1356_v56 }
 0x2b2   :  { %v1361_v63 = vsub.f32 %v5762_v36, %v1356_v56  ;;  %v1363_v33 = vsub.f32 %v5768_v15, %v1356_v56  ;;  %v1362_v5 = vsub.f32 %v5765_v26, %v1356_v56 }
 0x2b3   :  { %v1364_v61 = vmul.f32 %v1357_v51, %v1357_v51  ;;  %v1365_v25 = vmul.f32 %v5776_v59, %v5776_v59  ;;  %v1366_v13 = vmul.f32 %v1359_v50, %v1359_v50  ;;  %v1367_v52 = vmul.f32 %v1360_v21, %v1360_v21 }
 0x2b4   :  { %v1368_v45 = vmul.f32 %v1361_v63, %v1361_v63  ;;  %v1370_v19 = vmul.f32 %v1363_v33, %v1363_v33  ;;  %v1369_v14 = vmul.f32 %v1362_v5, %v1362_v5 }
 0x2b5   :  { %v1371_v9 = vadd.f32 %v1365_v25, %v1364_v61 }
 0x2b6   :  { %v1376_v53 = vsel %vm7586_vm6, %v1370_v19, 0.0 }
 0x2b7   :  { %v1372_v28 = vadd.f32 %v1371_v9, %v1366_v13 }
 0x2b9   :  { %v1373_v62 = vadd.f32 %v1372_v28, %v1367_v52 }
 0x2bb   :  { %v1374_v58 = vadd.f32 %v1373_v62, %v1368_v45 }
 0x2bd   :  { %v1375_v16 = vadd.f32 %v1374_v58, %v1369_v14  ;;  %v1440_v14 = vpop.permute.xlu2 %1439 }
 0x2bf   :  { %v1377_v2 = vadd.f32 %v1376_v53, %v1375_v16 }
 0x2c1   :  { %v1378_v23 = vrot.slane %v1377_v2, 4 }
 0x2c3   :  { %v1379_v3 = vadd.f32 %v1378_v23, %v1377_v2 }
 0x2c5   :  { %v1380_v38 = vrot.slane %v1379_v3, 2 }
 0x2c7   :  { %v1381_v47 = vadd.f32 %v1380_v38, %v1379_v3  ;;  %v1444_v38 = vpop.permute.xlu1 %1443 }
 0x2c9   :  { %v1382_v46 = vrot.slane %v1381_v47, 1 }
 0x2cb   :  { %v1383_v11 = vadd.f32 %v1382_v46, %v1381_v47  ;;  %v5021_v47 = vmov 13  }
 0x2cc   :  { %4523 = vset.pattern.permute.xlu1 %v5021_v47  ;;  %4524 = vset.pattern.permute.xlu2 %v5021_v47 }
 0x2cd   :  { %v1384_v31 = vmul.f32 %v1383_v11, %v5429_v48  ;;  %1618 = vperm.xlu1 %4523, %v5593_v29   ;;  %4522 = vset.pattern.permute.xlu0 %v5021_v47  ;;  %v1324_v47 = vld [vmem:[#allocation5 + $0x160] sm:$0xff] }
 0x2ce   :  { %1622 = vperm.xlu2 %4524, %v5652_v10  }
 0x2cf   :  { %v1385_v7 = vadd.f32 1e-05, %v1384_v31 }
 0x2d1   :  { %4678 = vrsqrt.f32 %v1385_v7  ;;  %vm1392_vm9 = vweird.f32 %v1385_v7 }
 0x2d5   :  { %1626 = vperm.xlu1 %4523, %v5694_v39  }
 0x2d6   :  { %1630 = vperm.xlu2 %4524, %v5699_v18  }
 0x2d7   :  { %v4679_v27 = vpop.eup %4678 }
 0x2d8   :  { %v1387_v37 = vmul.f32 %v4679_v27, %v1385_v7  ;;  %vm1393_vm4 = vweird.f32 %v4679_v27 }
 0x2d9   :  { %vm1394_vm1 = vmor %vm1392_vm9, %vm1393_vm4 }
 0x2da   :  { %v1388_v12 = vmul.f32 %v4679_v27, %v1387_v37  ;;  %vm7625_vm4 = vmmov %vm7620_vm8 }
 0x2dc   :  { %v1389_v41 = vmul.f32 0.5, %v1388_v12 }
 0x2dd   :  { %1638 = vperm.xlu1 %4523, %v5716_v17  }
 0x2de   :  { %v1390_v1 = vsub.f32 1.5, %v1389_v41 }
 0x2e0   :  { %v1391_v40 = vmul.f32 %v4679_v27, %v1390_v1 }
 0x2e2   :  { %v1395_v34 = vsel %vm1394_vm1, %v4679_v27, %v1391_v40 }
 0x2e3   :  { %v1401_v56 = vmul.f32 %v1395_v34, %v1362_v5  ;;  %v1402_v61 = vmul.f32 %v1395_v34, %v1363_v33  ;;  %v1400_v25 = vmul.f32 %v1395_v34, %v1361_v63  ;;  %v1399_v13 = vmul.f32 %v1395_v34, %v1360_v21 }
 0x2e4   :  { %v1398_v9 = vmul.f32 %v1395_v34, %v1359_v50  ;;  %v1396_v52 = vmul.f32 %v1395_v34, %v1357_v51  ;;  %v1397_v53 = vmul.f32 %v1395_v34, %v5776_v59  ;;  %v1409_v51 = vpop.permute.xlu0 %1408 }
 0x2e5   :  { %v1436_v28 = vmul.f32 %v1425_v24, %v1401_v56  ;;  %v1437_v45 = vmul.f32 %v1429_v8, %v1402_v61  ;;  %v1435_v62 = vmul.f32 %v1421_v32, %v1400_v25  ;;  %v1434_v19 = vmul.f32 %v1417_v6, %v1399_v13  ;;  %v1323_v56 = vld [vmem:[#allocation5 + $0x158] sm:$0xff] }
 0x2e6   :  { %v1433_v58 = vmul.f32 %v1413_v60, %v1398_v9  ;;  %v1431_v16 = vmul.f32 %v1405_v44, %v1396_v52  ;;  %v1432_v32 = vmul.f32 %v1409_v51, %v1397_v53  ;;  %4294 = vmatmul.msk.f32.gmra.mxu2 %vm7620_vm8, %v1323_v56  ;;  %v5022_v56 = vmov 14  }
 0x2e7   :  { %v5788_v2 = vadd.f32 %v1464_v49, %v1437_v45  ;;  %v5790_v23 = vadd.f32 %v1456_v35, %v1435_v62  ;;  %v5792_v3 = vadd.f32 %v1452_v0, %v1434_v19  ;;  %v5794_v33 = vadd.f32 %v1460_v20, %v1436_v28  ;;  %v5808_v35 = vld [vmem:[#allocation7] sm:$0xff]  ;;  %4525 = vset.pattern.permute.xlu2 %v5022_v56 }
 0x2e8   :  { %v5796_v21 = vadd.f32 %v1448_v22, %v1433_v58  ;;  %v5798_v50 = vadd.f32 %v1440_v14, %v1431_v16  ;;  %1614 = vperm.xlu0 %4522, %v5808_v35   ;;  %v5811_v46 = vadd.f32 %v1444_v38, %v1432_v32  ;;  %1728 = vperm.xlu2 %4525, %v5716_v17  }
 0x2e9   :  { %v4283_v24 = vmul.f32 -1.442695, %v5788_v2  ;;  %v4281_v63 = vmul.f32 -1.442695, %v5790_v23  ;;  %v4280_v5 = vmul.f32 -1.442695, %v5792_v3  ;;  %4526 = vset.pattern.permute.xlu1 %v5022_v56 }
 0x2ea   :  { %v4282_v59 = vmul.f32 -1.442695, %v5794_v33  ;;  %v4279_v8 = vmul.f32 -1.442695, %v5796_v21  ;;  %v4277_v49 = vmul.f32 -1.442695, %v5798_v50  ;;  %1724 = vperm.xlu1 %4526, %v5721_v57  }
 0x2eb   :  { %4680 = vpow2.f32 %v4283_v24  ;;  %v4278_v29 = vmul.f32 -1.442695, %v5811_v46 }
 0x2ec   :  { %4682 = vpow2.f32 %v4281_v63 }
 0x2ed   :  { %4684 = vpow2.f32 %v4280_v5 }
 0x2ee   :  { %4686 = vpow2.f32 %v4282_v59  ;;  %4295 = vmatmul.msk.f32.gmra.mxu2 %vm7625_vm4, %v1324_v47 }
 0x2ef   :  { %4688 = vpow2.f32 %v4279_v8  ;;  %v5023_v8 = vmov 16  }
 0x2f0   :  { %4690 = vpow2.f32 %v4277_v49  ;;  %1634 = vperm.xlu0 %4522, %v5721_v57   ;;  %4527 = vset.pattern.permute.xlu2 %v5023_v8 }
 0x2f1   :  { %v4681_v11 = vpop.eup %4680  ;;  %1958 = vperm.xlu2 %4527, %v5721_v57  }
 0x2f2   :  { %v4683_v31 = vpop.eup %4682  ;;  %v1500_v6 = vadd.f32 1.0, %v4681_v11 }
 0x2f3   :  { %v4685_v7 = vpop.eup %4684  ;;  %v5813_v0 = vadd.f32 1.0, %v4683_v31 }
 0x2f4   :  { %v4687_v27 = vpop.eup %4686  ;;  %4692 = vrcp.f32 %v1500_v6  ;;  %v5818_v12 = vadd.f32 1.0, %v4685_v7  ;;  %v1600_v1 = vand.u32 2147483647, %v1500_v6  ;;  %v1602_v20 = vand.u32 2147483648, %v1500_v6 }
 0x2f5   :  { %v4689_v37 = vpop.eup %4688  ;;  %4694 = vrcp.f32 %v5813_v0  ;;  %v5820_v44 = vadd.f32 1.0, %v4687_v27  ;;  %v1572_v40 = vand.u32 2147483648, %v5813_v0  ;;  %vm1596_vm5 = vweird.f32 %v1500_v6 }
 0x2f6   :  { %v4691_v60 = vpop.eup %4690  ;;  %v5824_v41 = vadd.f32 1.0, %v4689_v37  ;;  %4696 = vpow2.f32 %v4278_v29  ;;  %vm5835_vm14 = vcmp.eq.f32.partialorder %v1600_v1, 8.507059e+37  ;;  %vm1566_vm15 = vweird.f32 %v5813_v0 }
 0x2f7   :  { %4698 = vrcp.f32 %v5818_v12  ;;  %v5829_v34 = vadd.f32 1.0, %v4691_v60  ;;  %v1570_v52 = vand.u32 2147483647, %v5813_v0  ;;  %v1603_v62 = vor.u32 1.1754944e-38, %v1602_v20 }
 0x2f8   :  { %4700 = vrcp.f32 %v5820_v44  ;;  %v5843_v19 = vor.u32 1.1754944e-38, %v1572_v40  ;;  %vm1551_vm2 = vweird.f32 %v5818_v12  ;;  %v1555_v16 = vand.u32 2147483647, %v5818_v12 }
 0x2f9   :  { %4702 = vrcp.f32 %v5824_v41  ;;  %v1557_v53 = vand.u32 2147483648, %v5818_v12  ;;  %vm1581_vm12 = vweird.f32 %v5820_v44  ;;  %vm5858_vm3 = vcmp.eq.f32.partialorder %v1570_v52, 8.507059e+37  ;;  %4529 = vset.pattern.permute.xlu2 %v5022_v56 }
 0x2fa   :  { %v4693_v22 = vpop.eup %4692  ;;  %4704 = vrcp.f32 %v5829_v34  ;;  %v1585_v49 = vand.u32 2147483647, %v5820_v44  ;;  %v1587_v38 = vand.u32 2147483648, %v5820_v44  ;;  %1720 = vperm.xlu2 %4529, %v5699_v18  }
 0x2fb   :  { %v5832_v61 = vpop.eup %4694  ;;  %v1592_v25 = vmul.f32 %v4693_v22, %v1500_v6  ;;  %vm1597_vm11 = vweird.f32 %v4693_v22 }
 0x2fc   :  { %v1562_v9 = vmul.f32 %v5832_v61, %v5813_v0  ;;  %v4697_v28 = vpop.eup %4696  ;;  %vm1567_vm7 = vweird.f32 %v5832_v61  ;;  %vm1598_vm13 = vmor %vm1596_vm5, %vm1597_vm11  ;;  %vm1536_vm5 = vweird.f32 %v5824_v41  ;;  %v1315_v0 = vld [vmem:[#allocation5 + $0x118] sm:$0xff] }
 0x2fd   :  { %v1593_v45 = vsub.f32 1.0, %v1592_v25  ;;  %v5847_v14 = vpop.eup %4698  ;;  %v5874_v40 = vadd.f32 1.0, %v4697_v28  ;;  %vm5888_vm1 = vmor %vm1566_vm15, %vm1567_vm7 }
 0x2fe   :  { %v1563_v58 = vsub.f32 1.0, %v1562_v9  ;;  %v4701_v51 = vpop.eup %4700  ;;  %v1547_v63 = vmul.f32 %v5847_v14, %v5818_v12  ;;  %vm1552_vm10 = vweird.f32 %v5847_v14  ;;  %vm7632_vm7 = vmmov %vm7625_vm4 }
 0x2ff   :  { %v1594_v24 = vmul.f32 %v4693_v22, %v1593_v45  ;;  %v5855_v5 = vpop.eup %4702  ;;  %v1577_v32 = vmul.f32 %v4701_v51, %v5820_v44  ;;  %vm1582_vm9 = vweird.f32 %v4701_v51  ;;  %vm5903_vm8 = vmor %vm1551_vm2, %vm1552_vm10  ;;  %4706 = vrcp.f32 %v5874_v40 }
 0x300   :  { %v1564_v59 = vmul.f32 %v5832_v61, %v1563_v58  ;;  %v1548_v31 = vsub.f32 1.0, %v1547_v63  ;;  %v1532_v7 = vmul.f32 %v5855_v5, %v5824_v41  ;;  %v5871_v37 = vpop.eup %4704  ;;  %vm1537_vm15 = vweird.f32 %v5855_v5  ;;  %vm1583_vm11 = vmor %vm1581_vm12, %vm1582_vm9 }
 0x301   :  { %v1595_v11 = vadd.f32 %v4693_v22, %v1594_v24  ;;  %v1578_v27 = vsub.f32 1.0, %v1577_v32  ;;  %v1502_v9 = vmul.f32 %v5871_v37, %v5829_v34  ;;  %v1542_v58 = vand.u32 2147483648, %v5824_v41  ;;  %vm1538_vm2 = vmor %vm1536_vm5, %vm1537_vm15 }
 0x302   :  { %v1565_v29 = vadd.f32 %v5832_v61, %v1564_v59  ;;  %v1549_v1 = vmul.f32 %v5847_v14, %v1548_v31  ;;  %v1533_v20 = vsub.f32 1.0, %v1532_v7  ;;  %v1540_v59 = vand.u32 2147483647, %v5824_v41 }
 0x303   :  { %v1599_v60 = vsel %vm1598_vm13, %v4693_v22, %v1595_v11  ;;  %v1579_v25 = vmul.f32 %v4701_v51, %v1578_v27  ;;  %v1503_v32 = vsub.f32 1.0, %v1502_v9  ;;  %vm1556_vm12 = vcmp.eq.f32.partialorder %v1555_v16, 8.507059e+37 }
 0x304   :  { %v1604_v6 = vsel %vm5835_vm14, %v1603_v62, %v1599_v60  ;;  %v1550_v13 = vadd.f32 %v5847_v14, %v1549_v1  ;;  %v1534_v28 = vmul.f32 %v5855_v5, %v1533_v20  ;;  %vm5907_vm14 = vcmp.eq.f32.partialorder %v1585_v49, 8.507059e+37  ;;  %v1325_v49 = vld [vmem:[#allocation5 + $0x168] sm:$0xff]  ;;  %v1326_v60 = vld [vmem:[#allocation5 + $0x170] sm:$0xff] }
 0x305   :  { %v1612_v22 = vmul.f32 %v1604_v6, %v5788_v2  ;;  %v1569_v2 = vsel %vm5888_vm1, %v5832_v61, %v1565_v29  ;;  %v1580_v45 = vadd.f32 %v4701_v51, %v1579_v25  ;;  %v1588_v61 = vor.u32 1.1754944e-38, %v1587_v38  ;;  %4296 = vmatmul.msk.f32.gmra.mxu2 %vm7632_vm7, %v1325_v49  ;;  %v4707_v41 = vpop.eup %4706  ;;  %vm7633_vm1 = vmmov %vm7632_vm7  ;;  %v1330_v62 = vld [vmem:[#allocation5 + $0x190] sm:$0xff] }
 0x306   :  { %v1535_v12 = vadd.f32 %v5855_v5, %v1534_v28  ;;  %v1554_v24 = vsel %vm5903_vm8, %v5847_v14, %v1550_v13  ;;  %v1574_v44 = vsel %vm5858_vm3, %v5843_v19, %v1569_v2  ;;  %v1558_v38 = vor.u32 1.1754944e-38, %v1557_v53  ;;  %vm7637_vm7 = vmmov %vm7633_vm1 }
 0x307   :  { %4284 = vmatpush.msk.msra.mxu1 %vm7586_vm6, %v1612_v22  ;;  %v1584_v63 = vsel %vm1583_vm11, %v4701_v51, %v1580_v45  ;;  %v1543_v31 = vor.u32 1.1754944e-38, %v1542_v58  ;;  %v1610_v19 = vmul.f32 %v1574_v44, %v5790_v23  ;;  %vm1541_vm3 = vcmp.eq.f32.partialorder %v1540_v59, 8.507059e+37  ;;  %vm7634_vm11 = vmmov %vm7633_vm1  ;;  %v1318_v58 = vld [vmem:[#allocation5 + $0x130] sm:$0xff] }
 0x308   :  { %v1589_v47 = vsel %vm5907_vm14, %v1588_v61, %v1584_v63  ;;  %v1539_v51 = vsel %vm1538_vm2, %v5855_v5, %v1535_v12  ;;  %v1559_v11 = vsel %vm1556_vm12, %v1558_v38, %v1554_v24  ;;  %v1504_v53 = vmul.f32 %v5871_v37, %v1503_v32  ;;  %vm7635_vm2 = vmmov %vm7633_vm1  ;;  %v1317_v61 = vld [vmem:[#allocation5 + $0x128] sm:$0xff]  ;;  %v1331_v12 = vld [vmem:[#allocation5 + $0x198] sm:$0xff] }
 0x309   :  { %v1611_v14 = vmul.f32 %v1589_v47, %v5794_v33  ;;  %v1544_v7 = vsel %vm1541_vm3, %v1543_v31, %v1539_v51  ;;  %v1609_v33 = vmul.f32 %v1559_v11, %v5792_v3  ;;  %v1517_v16 = vmul.f32 %v4707_v41, %v5874_v40  ;;  %vm7636_vm12 = vmmov %vm7633_vm1  ;;  %v1333_v24 = vld [vmem:[#allocation5 + $0x1a8] sm:$0xff]  ;;  %v1334_v59 = vld [vmem:[#allocation5 + $0x1b0] sm:$0xff] }
 0x30a   :  { %v5024_v5 = vmov 17   ;;  %v1608_v23 = vmul.f32 %v1544_v7, %v5796_v21  ;;  %v1505_v29 = vadd.f32 %v5871_v37, %v1504_v53  ;;  %vm1507_vm13 = vweird.f32 %v5871_v37  ;;  %4302 = vmatmul.msk.f32.gmra.mxu3 %vm7636_vm12, %v1330_v62  ;;  %vm7638_vm3 = vmmov %vm7633_vm1  ;;  %v5992_v63 = vld [vmem:[#allocation7 + $0x8] sm:$0xff]  ;;  %v1335_v32 = vld [vmem:[#allocation5 + $0x1b8] sm:$0x3] }
 0x30b   :  { %1675 = vmatpush.msra.mxu1 %v1611_v14  ;;  %4528 = vset.pattern.permute.xlu1 %v5024_v5  ;;  %v1518_v27 = vsub.f32 1.0, %v1517_v16  ;;  %vm1506_vm10 = vweird.f32 %v5829_v34  ;;  %v1512_v3 = vand.u32 2147483648, %v5829_v34  ;;  %v1527_v1 = vand.u32 2147483648, %v5874_v40 }
 0x30c   :  { %1997 = vperm.xlu1 %4528, %v5716_v17   ;;  %v1510_v20 = vand.u32 2147483647, %v5829_v34  ;;  %vm1522_vm4 = vweird.f32 %v4707_v41  ;;  %v1525_v25 = vand.u32 2147483647, %v5874_v40  ;;  %vm1508_vm9 = vmor %vm1506_vm10, %vm1507_vm13  ;;  %vm1521_vm5 = vweird.f32 %v5874_v40  ;;  %4533 = vset.pattern.permute.xlu2 %v5024_v5 }
 0x30d   :  { %1676 = vmatpush.msra.mxu1 %v1610_v19  ;;  %v1519_v6 = vmul.f32 %v4707_v41, %v1518_v27  ;;  %4297 = vmatmul.msk.f32.gmra.mxu2 %vm7633_vm1, %v1326_v60  ;;  %v1509_v21 = vsel %vm1508_vm9, %v5871_v37, %v1505_v29  ;;  %v1513_v22 = vor.u32 1.1754944e-38, %v1512_v3  ;;  %vm1523_vm8 = vmor %vm1521_vm5, %vm1522_vm4  ;;  %v1528_v52 = vor.u32 1.1754944e-38, %v1527_v1  ;;  %v1327_v37 = vld [vmem:[#allocation5 + $0x178] sm:$0xff] }
 0x30e   :  { %vm1511_vm14 = vcmp.eq.f32.partialorder %v1510_v20, 8.507059e+37  ;;  %vm1526_vm15 = vcmp.eq.f32.partialorder %v1525_v25, 8.507059e+37  ;;  %v5025_v45 = vmov 15   ;;  %1993 = vperm.xlu2 %4533, %v5721_v57   ;;  %vm7639_vm13 = vmmov %vm7633_vm1 }
 0x30f   :  { %1677 = vmatpush.msra.mxu1 %v1609_v33  ;;  %v1520_v9 = vadd.f32 %v4707_v41, %v1519_v6  ;;  %v1514_v13 = vsel %vm1511_vm14, %v1513_v22, %v1509_v21  ;;  %4530 = vset.pattern.permute.xlu0 %v5025_v45  ;;  %vm7640_vm10 = vmmov %vm7633_vm1 }
 0x310   :  { %v1606_v40 = vmul.f32 %v1514_v13, %v5798_v50  ;;  %1815 = vperm.xlu0 %4530, %v5716_v17   ;;  %v1316_v50 = vld [vmem:[#allocation5 + $0x120] sm:$0xff]  ;;  %vm7641_vm4 = vmmov %vm7633_vm1 }
 0x311   :  { %1678 = vmatpush.msra.mxu1 %v1608_v23  ;;  %v1524_v34 = vsel %vm1523_vm8, %v4707_v41, %v1520_v9 }
 0x312   :  { %v1529_v28 = vsel %vm1526_vm15, %v1528_v52, %v1524_v34  ;;  %4303 = vmatmul.msk.f32.gmra.mxu3 %vm7637_vm7, %v1331_v12  ;;  %v6034_v52 = vpop.f32.mrf.mxu2 }
 0x313   :  { %v1607_v2 = vmul.f32 %v1529_v28, %v5811_v46  ;;  %v1328_v46 = vld [vmem:[#allocation5 + $0x180] sm:$0x3] }
 0x314   :  { %4532 = vset.pattern.permute.xlu1 %v5023_v8 }
 0x315   :  { %1954 = vperm.xlu1 %4532, %v5699_v18   ;;  %1679 = vmatpush.msra.mxu1 %v1607_v2 }
 0x316   :  { %4298 = vmatmul.msk.f32.gmra.mxu2 %vm7634_vm11, %v1327_v37  ;;  %4535 = vset.pattern.permute.xlu2 %v5025_v45 }
 0x317   :  { %1680 = vmatpush.msra.mxu1 %v1606_v40  ;;  %1811 = vperm.xlu2 %4535, %v5721_v57   ;;  %v1319_v57 = vld [vmem:[#allocation5 + $0x138] sm:$0xff] }
 0x318   :  { %4285 = vmatmul.msk.f32.vlgmr.msra.gmra.mxu1 %vm1155_vm0, %v1315_v0  ;;  %4531 = vset.pattern.permute.xlu0 %v5023_v8 }
 0x319   :  { %1962 = vperm.xlu0 %4531, %v5716_v17   ;;  %v1332_v17 = vld [vmem:[#allocation5 + $0x1a0] sm:$0xff] }
 0x31a   :  { %4304 = vmatmul.msk.f32.gmra.mxu3 %vm7638_vm3, %v1332_v17 }
 0x31d   :  { %4534 = vset.pattern.permute.xlu1 %v5022_v56 }
 0x31e   :  { %1716 = vperm.xlu1 %4534, %v5694_v39   ;;  %4299 = vmatmul.msk.f32.gmra.mxu2 %vm7635_vm2, %v1328_v46 }
 0x31f   :  { %4537 = vset.pattern.permute.xlu2 %v5022_v56 }
 0x320   :  { %4286 = vmatmul.msk.f32.gmra.mxu1 %vm1155_vm0, %v1316_v50  ;;  %1712 = vperm.xlu2 %4537, %v5652_v10  }
 0x321   :  { %1950 = vperm.xlu0 %4531, %v5694_v39  }
 0x322   :  { %4305 = vmatmul.msk.f32.gmra.mxu3 %vm7639_vm13, %v1333_v24 }
 0x326   :  { %4536 = vset.pattern.permute.xlu1 %v5024_v5 }
 0x327   :  { %1989 = vperm.xlu1 %4536, %v5699_v18  }
 0x328   :  { %4287 = vmatmul.msk.f32.gmra.mxu1 %vm1155_vm0, %v1317_v61  ;;  %4539 = vset.pattern.permute.xlu2 %v5023_v8  ;;  %v6043_v61 = vpop.f32.mrf.mxu3 }
 0x329   :  { %4544 = vset.pattern.permute.xlu0 %v5022_v56  ;;  %1946 = vperm.xlu2 %4539, %v5652_v10  }
 0x32a   :  { %1704 = vperm.xlu0 %4544, %v5808_v35   ;;  %4306 = vmatmul.msk.f32.gmra.mxu3 %vm7640_vm10, %v1334_v59 }
 0x32f   :  { %4538 = vset.pattern.permute.xlu1 %v5025_v45 }
 0x330   :  { %1807 = vperm.xlu1 %4538, %v5699_v18   ;;  %4288 = vmatmul.msk.f32.gmra.mxu1 %vm1155_vm0, %v1318_v58  ;;  %v1320_v18 = vld [vmem:[#allocation5 + $0x140] sm:$0xff] }
 0x331   :  { %4541 = vset.pattern.permute.xlu2 %v5025_v45 }
 0x332   :  { %4545 = vset.pattern.permute.xlu0 %v5024_v5  ;;  %1803 = vperm.xlu2 %4541, %v5694_v39  }
 0x333   :  { %1985 = vperm.xlu0 %4545, %v5694_v39   ;;  %4307 = vmatmul.msk.f32.gmra.mxu3 %vm7641_vm4, %v1335_v32 }
 0x338   :  { %4540 = vset.pattern.permute.xlu1 %v5022_v56  ;;  %4289 = vmatmul.msk.f32.gmra.mxu1 %vm1155_vm0, %v1319_v57  ;;  %v1321_v56 = vld [vmem:[#allocation5 + $0x148] sm:$0x3] }
 0x339   :  { %1708 = vperm.xlu1 %4540, %v5992_v63  }
 0x33a   :  { %4543 = vset.pattern.permute.xlu2 %v5024_v5 }
 0x33b   :  { %1973 = vperm.xlu0 %4545, %v5808_v35   ;;  %1981 = vperm.xlu2 %4543, %v5652_v10  }
 0x33f   :  { %v1619_v39 = vpop.permute.xlu1 %1618 }
 0x340   :  { %4290 = vmatmul.msk.f32.gmra.mxu1 %vm1155_vm0, %v1320_v18 }
 0x341   :  { %4542 = vset.pattern.permute.xlu1 %v5023_v8 }
 0x342   :  { %1942 = vperm.xlu1 %4542, %v5992_v63  }
 0x343   :  { %4547 = vset.pattern.permute.xlu2 %v5023_v8 }
 0x344   :  { %1938 = vperm.xlu2 %4547, %v5808_v35  }
 0x347   :  { %v1627_v44 = vpop.permute.xlu1 %1626 }
 0x348   :  { %4291 = vmatmul.msk.f32.gmra.mxu1 %vm1155_vm0, %v1321_v56 }
 0x34a   :  { %4546 = vset.pattern.permute.xlu1 %v5025_v45 }
 0x34b   :  { %1799 = vperm.xlu1 %4546, %v5652_v10   ;;  %v1623_v10 = vpop.permute.xlu2 %1622 }
 0x34c   :  { %4549 = vset.pattern.permute.xlu2 %v5025_v45 }
 0x34d   :  { %1795 = vperm.xlu2 %4549, %v5992_v63  }
 0x34f   :  { %v1639_v14 = vpop.permute.xlu1 %1638 }
 0x353   :  { %4548 = vset.pattern.permute.xlu1 %v5024_v5  ;;  %v1631_v38 = vpop.permute.xlu2 %1630 }
 0x354   :  { %1977 = vperm.xlu1 %4548, %v5992_v63  }
 0x35b   :  { %v6020_v51 = vpop.permute.xlu2 %1728 }
 0x35c   :  { %4550 = vset.pattern.permute.xlu1 %v5025_v45  ;;  %v6022_v31 = vpop.permute.xlu1 %1724 }
 0x35d   :  { %1791 = vperm.xlu1 %4550, %v5808_v35   ;;  %v1615_v35 = vpop.permute.xlu0 %1614 }
 0x363   :  { %v6024_v19 = vpop.permute.xlu2 %1958 }
 0x365   :  { %v1635_v3 = vpop.permute.xlu0 %1634 }
 0x369   :  { %v6041_v50 = vpop.f32.mrf.mxu2 }
 0x36b   :  { %v6028_v7 = vpop.permute.xlu2 %1720 }
 0x371   :  { %v1775_v56 = vpop.f32.mrf.mxu2 }
 0x373   :  { %v6032_v20 = vpop.permute.xlu2 %1993 }
 0x37b   :  { %v6039_v40 = vpop.permute.xlu2 %1811 }
 0x37e   :  { %v6026_v41 = vpop.permute.xlu1 %1997 }
 0x383   :  { %v1713_v17 = vpop.permute.xlu2 %1712 }
 0x387   :  { %v6030_v60 = vpop.permute.xlu1 %1954 }
 0x390   :  { %v6037_v37 = vpop.permute.xlu1 %1716 }
 0x395   :  { %v1682_v49 = vpop.f32.mrf.mxu1 }
 0x396   :  { %v1683_v16 = vadd.f32 %v1682_v49, %v1615_v35  ;;  %v6072_v35 = vpop.permute.xlu2 %1946 }
 0x399   :  { %v6045_v58 = vpop.permute.xlu1 %1989 }
 0x39d   :  { %v1685_v47 = vpop.f32.mrf.mxu1 }
 0x39e   :  { %v1686_v33 = vadd.f32 %v1685_v47, %v1619_v39 }
 0x3a0   :  { %v1877_v29 = vadd.f32 %v1686_v33, %v1683_v16 }
 0x3a5   :  { %v1688_v11 = vpop.f32.mrf.mxu1 }
 0x3a6   :  { %v1689_v5 = vadd.f32 %v1688_v11, %v1623_v10 }
 0x3a8   :  { %v1878_v1 = vadd.f32 %v1877_v29, %v1689_v5 }
 0x3ad   :  { %v1691_v53 = vpop.f32.mrf.mxu1 }
 0x3ae   :  { %v1692_v27 = vadd.f32 %v1691_v53, %v1627_v44  ;;  %v6060_v44 = vpop.permute.xlu0 %1815  ;;  %v6068_v53 = vpop.permute.xlu1 %1807 }
 0x3b0   :  { %v1879_v25 = vadd.f32 %v1878_v1, %v1692_v27 }
 0x3b5   :  { %v1694_v8 = vpop.f32.mrf.mxu1 }
 0x3b6   :  { %v1695_v6 = vadd.f32 %v1694_v8, %v1631_v38  ;;  %v6062_v38 = vpop.f32.mrf.mxu3 }
 0x3b8   :  { %v1880_v9 = vadd.f32 %v1879_v25, %v1695_v6 }
 0x3bd   :  { %v1697_v23 = vpop.f32.mrf.mxu1 }
 0x3be   :  { %v1698_v21 = vadd.f32 %v1697_v23, %v1635_v3 }
 0x3c0   :  { %v1881_v13 = vadd.f32 %v1880_v9, %v1698_v21 }
 0x3c5   :  { %v1700_v22 = vpop.f32.mrf.mxu1 }
 0x3c6   :  { %v1701_v34 = vadd.f32 %v1700_v22, %v1639_v14  ;;  %v6085_v22 = vpop.permute.xlu0 %1962 }
 0x3c8   :  { %v1882_v28 = vsel %vm7586_vm6, %v1701_v34, 0.0 }
 0x3c9   :  { %v1883_v2 = vadd.f32 %v1882_v28, %v1881_v13  ;;  %v1709_v13 = vpop.permute.xlu1 %1708 }
 0x3cb   :  { %v1884_v0 = vrot.slane %v1883_v2, 4 }
 0x3cd   :  { %v1885_v45 = vadd.f32 %v1884_v0, %v1883_v2  ;;  %v6089_v2 = vpop.permute.xlu2 %1803 }
 0x3cf   :  { %v1886_v46 = vrot.slane %v1885_v45, 2 }
 0x3d1   :  { %v1887_v62 = vadd.f32 %v1886_v46, %v1885_v45 }
 0x3d3   :  { %v1888_v12 = vrot.slane %v1887_v62, 1 }
 0x3d5   :  { %v1889_v57 = vadd.f32 %v1888_v12, %v1887_v62 }
 0x3d7   :  { %v1890_v24 = vmul.f32 %v1889_v57, %v5429_v48  ;;  %v1951_v57 = vpop.permute.xlu0 %1950 }
 0x3d9   :  { %v6048_v18 = vsub.f32 %v1686_v33, %v1890_v24  ;;  %v6050_v59 = vsub.f32 %v1683_v16, %v1890_v24  ;;  %v6052_v32 = vsub.f32 %v1689_v5, %v1890_v24  ;;  %v6054_v39 = vsub.f32 %v1692_v27, %v1890_v24 }
 0x3da   :  { %v6064_v47 = vsub.f32 %v1695_v6, %v1890_v24  ;;  %v6070_v8 = vsub.f32 %v1701_v34, %v1890_v24  ;;  %v6074_v33 = vsub.f32 %v1698_v21, %v1890_v24  ;;  %v1778_v6 = vpop.f32.mrf.mxu2  ;;  %v6087_v34 = vpop.f32.mrf.mxu3 }
 0x3db   :  { %v1898_v10 = vmul.f32 %v6050_v59, %v6050_v59  ;;  %v1899_v49 = vmul.f32 %v6048_v18, %v6048_v18  ;;  %v1900_v14 = vmul.f32 %v6052_v32, %v6052_v32  ;;  %v1901_v16 = vmul.f32 %v6054_v39, %v6054_v39 }
 0x3dc   :  { %v1902_v23 = vmul.f32 %v6064_v47, %v6064_v47  ;;  %v1904_v27 = vmul.f32 %v6070_v8, %v6070_v8  ;;  %v1903_v3 = vmul.f32 %v6074_v33, %v6074_v33 }
 0x3dd   :  { %v1905_v11 = vadd.f32 %v1899_v49, %v1898_v10  ;;  %v1943_v10 = vpop.permute.xlu1 %1942 }
 0x3de   :  { %v1910_v21 = vsel %vm7586_vm6, %v1904_v27, 0.0 }
 0x3df   :  { %v1906_v5 = vadd.f32 %v1905_v11, %v1900_v14  ;;  %v1982_v14 = vpop.permute.xlu2 %1981 }
 0x3e1   :  { %v1907_v29 = vadd.f32 %v1906_v5, %v1901_v16 }
 0x3e2   :  { %v1781_v46 = vpop.f32.mrf.mxu2  ;;  %v6091_v24 = vpop.f32.mrf.mxu3 }
 0x3e3   :  { %v1908_v1 = vadd.f32 %v1907_v29, %v1902_v23  ;;  %v1705_v23 = vpop.permute.xlu0 %1704 }
 0x3e4   :  { %v1770_v26 = vadd.f32 %v6034_v52, %v1705_v23 }
 0x3e5   :  { %v1909_v25 = vadd.f32 %v1908_v1, %v1903_v3  ;;  %v1800_v27 = vpop.permute.xlu1 %1799 }
 0x3e7   :  { %v1911_v9 = vadd.f32 %v1910_v21, %v1909_v25  ;;  %v1939_v3 = vpop.permute.xlu2 %1938 }
 0x3e9   :  { %v1912_v28 = vrot.slane %v1911_v9, 4 }
 0x3ea   :  { %v1784_v5 = vpop.f32.mrf.mxu2  ;;  %v1868_v29 = vpop.f32.mrf.mxu3 }
 0x3eb   :  { %v1913_v0 = vadd.f32 %v1912_v28, %v1911_v9  ;;  %v1986_v28 = vpop.permute.xlu0 %1985 }
 0x3ed   :  { %v1914_v45 = vrot.slane %v1913_v0, 2  ;;  %v1978_v15 = vpop.permute.xlu1 %1977 }
 0x3ef   :  { %v1915_v62 = vadd.f32 %v1914_v45, %v1913_v0  ;;  %v1779_v0 = vadd.f32 %v1778_v6, %v6037_v37  ;;  %v1782_v45 = vadd.f32 %v1781_v46, %v6028_v7 }
 0x3f1   :  { %v1916_v12 = vrot.slane %v1915_v62, 1  ;;  %v2010_v36 = vadd.f32 1.0, %v1779_v0  ;;  %v2011_v54 = vadd.f32 1.0, %v1782_v45 }
 0x3f2   :  { %v1787_v21 = vpop.f32.mrf.mxu2  ;;  %v1871_v30 = vpop.f32.mrf.mxu3 }
 0x3f3   :  { %v1917_v49 = vadd.f32 %v1916_v12, %v1915_v62  ;;  %v1785_v12 = vadd.f32 %v1784_v5, %v6022_v31  ;;  %v1788_v43 = vadd.f32 %v1787_v21, %v6020_v51  ;;  %v1872_v51 = vadd.f32 %v1871_v30, %v6039_v40 }
 0x3f5   :  { %v1918_v11 = vmul.f32 %v1917_v49, %v5429_v48  ;;  %v1776_v49 = vadd.f32 %v1775_v56, %v1713_v17  ;;  %v2012_v7 = vadd.f32 1.0, %v1785_v12  ;;  %v2013_v31 = vadd.f32 1.0, %v1788_v43 }
 0x3f7   :  { %v1919_v16 = vadd.f32 1e-05, %v1918_v11  ;;  %v1773_v11 = vadd.f32 %v6041_v50, %v1709_v13  ;;  %v2009_v6 = vadd.f32 1.0, %v1776_v49  ;;  %v2007_v50 = vadd.f32 1.0, %v1770_v26 }
 0x3f9   :  { %4708 = vrsqrt.f32 %v1919_v16  ;;  %vm1926_vm1 = vweird.f32 %v1919_v16  ;;  %v2008_v46 = vadd.f32 1.0, %v1773_v11 }
 0x3ff   :  { %v4709_v1 = vpop.eup %4708 }
 0x400   :  { %v1921_v25 = vmul.f32 %v4709_v1, %v1919_v16  ;;  %vm1927_vm9 = vweird.f32 %v4709_v1  ;;  %v1869_v16 = vadd.f32 %v1868_v29, %v6068_v53 }
 0x401   :  { %vm1928_vm5 = vmor %vm1926_vm1, %vm1927_vm9 }
 0x402   :  { %v1922_v9 = vmul.f32 %v4709_v1, %v1921_v25  ;;  %v1796_v25 = vpop.permute.xlu2 %1795 }
 0x403   :  { %v1860_v56 = vadd.f32 %v6062_v38, %v1796_v25 }
 0x404   :  { %v1923_v62 = vmul.f32 0.5, %v1922_v9 }
 0x406   :  { %v1924_v48 = vsub.f32 1.5, %v1923_v62 }
 0x408   :  { %v1925_v37 = vmul.f32 %v4709_v1, %v1924_v48 }
 0x40a   :  { %v1929_v17 = vsel %vm1928_vm5, %v4709_v1, %v1925_v37  ;;  %v1874_v1 = vpop.f32.mrf.mxu3 }
 0x40b   :  { %v1932_v13 = vmul.f32 %v1929_v17, %v6052_v32  ;;  %v1931_v52 = vmul.f32 %v1929_v17, %v6048_v18  ;;  %v1936_v5 = vmul.f32 %v1929_v17, %v6070_v8  ;;  %v1933_v48 = vmul.f32 %v1929_v17, %v6054_v39  ;;  %v1974_v18 = vpop.permute.xlu0 %1973 }
 0x40c   :  { %v1934_v23 = vmul.f32 %v1929_v17, %v6064_v47  ;;  %v1930_v43 = vmul.f32 %v1929_v17, %v6050_v59  ;;  %v1935_v26 = vmul.f32 %v1929_v17, %v6074_v33  ;;  %v1863_v8 = vadd.f32 %v6087_v34, %v1800_v27 }
 0x40d   :  { %v1967_v30 = vmul.f32 %v6072_v35, %v1932_v13  ;;  %v1966_v40 = vmul.f32 %v1943_v10, %v1931_v52  ;;  %v1971_v38 = vmul.f32 %v6085_v22, %v1936_v5  ;;  %v1968_v32 = vmul.f32 %v1951_v57, %v1933_v48  ;;  %v1792_v10 = vpop.permute.xlu1 %1791 }
 0x40e   :  { %v1969_v39 = vmul.f32 %v6030_v60, %v1934_v23  ;;  %v1965_v21 = vmul.f32 %v1939_v3, %v1930_v43  ;;  %v1970_v53 = vmul.f32 %v6024_v19, %v1935_v26  ;;  %v1875_v57 = vadd.f32 %v1874_v1, %v6060_v44 }
 0x40f   :  { %v2006_v47 = vadd.f32 %v6026_v41, %v1971_v38  ;;  %v2002_v59 = vadd.f32 %v1982_v14, %v1967_v30  ;;  %v2001_v29 = vadd.f32 %v1978_v15, %v1966_v40  ;;  %v2003_v33 = vadd.f32 %v1986_v28, %v1968_v32 }
 0x410   :  { %v2004_v35 = vadd.f32 %v6045_v58, %v1969_v39  ;;  %v2005_v22 = vadd.f32 %v6032_v20, %v1970_v53  ;;  %v2000_v9 = vadd.f32 %v1974_v18, %v1965_v21  ;;  %v1866_v19 = vadd.f32 %v6091_v24, %v6089_v2 }
 0x411   :  { %v2016_v0 = vmul.f32 %v2009_v6, %v2002_v59  ;;  %v2015_v34 = vmul.f32 %v2008_v46, %v2001_v29  ;;  %v2020_v27 = vmul.f32 %v2013_v31, %v2006_v47  ;;  %v2017_v60 = vmul.f32 %v2010_v36, %v2003_v33 }
 0x412   :  { %v2018_v3 = vmul.f32 %v2011_v54, %v2004_v35  ;;  %v2019_v41 = vmul.f32 %v2012_v7, %v2005_v22  ;;  %v2014_v14 = vmul.f32 %v2007_v50, %v2000_v9  ;;  %v1857_v58 = vadd.f32 %v6043_v61, %v1792_v10 }
 0x413   :  { %v6121_v15 = vadd.f32 %v2016_v0, %v1863_v8  ;;  %v6124_v28 = vadd.f32 %v2015_v34, %v1860_v56  ;;  %v6126_v20 = vadd.f32 %v2020_v27, %v1875_v57  ;;  %v6132_v62 = vadd.f32 %v2017_v60, %v1866_v19 }
 0x414   :  { %v6128_v44 = vadd.f32 %v2018_v3, %v1869_v16  ;;  %v6130_v45 = vadd.f32 %v2019_v41, %v1872_v51  ;;  %v6135_v2 = vadd.f32 %v2014_v14, %v1857_v58 }
 0x415   :  { %v4310_v36 = vmul.f32 -1.442695, %v6121_v15  ;;  %v4309_v61 = vmul.f32 -1.442695, %v6124_v28  ;;  %v4314_v12 = vmul.f32 -1.442695, %v6126_v20 }
 0x416   :  { %v4312_v54 = vmul.f32 -1.442695, %v6128_v44  ;;  %v4313_v24 = vmul.f32 -1.442695, %v6130_v45  ;;  %v4311_v49 = vmul.f32 -1.442695, %v6132_v62 }
 0x417   :  { %4710 = vpow2.f32 %v4310_v36  ;;  %v4308_v11 = vmul.f32 -1.442695, %v6135_v2 }
 0x418   :  { %4712 = vpow2.f32 %v4312_v54 }
 0x419   :  { %4714 = vpow2.f32 %v4313_v24 }
 0x41a   :  { %4716 = vpow2.f32 %v4309_v61 }
 0x41b   :  { %4718 = vpow2.f32 %v4314_v12 }
 0x41c   :  { %4720 = vpow2.f32 %v4311_v49 }
 0x41d   :  { %v4711_v25 = vpop.eup %4710  ;;  %4722 = vpow2.f32 %v4308_v11 }
 0x41e   :  { %v4713_v37 = vpop.eup %4712  ;;  %v6143_v7 = vadd.f32 1.0, %v4711_v25  ;;  %v1340_v25 = vld [vmem:[#allocation5 + $0x1e0] sm:$0xff] }
 0x41f   :  { %v4715_v6 = vpop.eup %4714  ;;  %v6145_v46 = vadd.f32 1.0, %v4713_v37 }
 0x420   :  { %v4717_v31 = vpop.eup %4716  ;;  %4724 = vrcp.f32 %v6143_v7  ;;  %v2054_v17 = vadd.f32 1.0, %v4715_v6  ;;  %v2095_v1 = vand.u32 2147483647, %v6143_v7  ;;  %vm2091_vm3 = vweird.f32 %v6143_v7 }
 0x421   :  { %v4719_v50 = vpop.eup %4718  ;;  %4726 = vrcp.f32 %v6145_v46  ;;  %v6149_v51 = vadd.f32 1.0, %v4717_v31  ;;  %vm2121_vm8 = vweird.f32 %v6145_v46  ;;  %v2125_v39 = vand.u32 2147483647, %v6145_v46 }
 0x422   :  { %v4721_v56 = vpop.eup %4720  ;;  %4728 = vrcp.f32 %v2054_v17  ;;  %v6151_v13 = vadd.f32 1.0, %v4719_v50  ;;  %v2142_v23 = vand.u32 2147483648, %v2054_v17  ;;  %v2140_v30 = vand.u32 2147483647, %v2054_v17 }
 0x423   :  { %v4723_v52 = vpop.eup %4722  ;;  %4730 = vrcp.f32 %v6149_v51  ;;  %v6154_v5 = vadd.f32 1.0, %v4721_v56  ;;  %vm2136_vm15 = vweird.f32 %v2054_v17  ;;  %v2127_v34 = vand.u32 2147483648, %v6145_v46 }
 0x424   :  { %4732 = vrcp.f32 %v6151_v13  ;;  %v6160_v16 = vadd.f32 1.0, %v4723_v52  ;;  %v2155_v26 = vand.u32 2147483647, %v6151_v13  ;;  %vm2151_vm14 = vweird.f32 %v6151_v13 }
 0x425   :  { %4734 = vrcp.f32 %v6154_v5  ;;  %v2157_v53 = vand.u32 2147483648, %v6151_v13  ;;  %v2143_v47 = vor.u32 1.1754944e-38, %v2142_v23  ;;  %vm6184_vm2 = vcmp.eq.f32.partialorder %v2140_v30, 8.507059e+37 }
 0x426   :  { %v6158_v48 = vpop.eup %4724  ;;  %4736 = vrcp.f32 %v6160_v16  ;;  %vm6180_vm11 = vcmp.eq.f32.partialorder %v2155_v26, 8.507059e+37  ;;  %v2110_v60 = vand.u32 2147483647, %v6154_v5  ;;  %vm6195_vm7 = vcmp.eq.f32.partialorder %v2125_v39, 8.507059e+37 }
 0x427   :  { %v6162_v43 = vpop.eup %4726  ;;  %v2087_v40 = vmul.f32 %v6158_v48, %v6143_v7  ;;  %v2112_v36 = vand.u32 2147483648, %v6154_v5  ;;  %v2158_v11 = vor.u32 1.1754944e-38, %v2157_v53  ;;  %vm2106_vm9 = vweird.f32 %v6154_v5 }
 0x428   :  { %v4729_v38 = vpop.eup %4728  ;;  %v2117_v32 = vmul.f32 %v6162_v43, %v6145_v46  ;;  %vm2122_vm10 = vweird.f32 %v6162_v43  ;;  %v2097_v6 = vand.u32 2147483648, %v6143_v7  ;;  %v2128_v52 = vor.u32 1.1754944e-38, %v2127_v34  ;;  %v6300_v7 = vld [vmem:[#allocation7 + $0x18] sm:$0xff] }
 0x429   :  { %v6171_v18 = vpop.eup %4730  ;;  %v2132_v8 = vmul.f32 %v4729_v38, %v2054_v17  ;;  %v2088_v57 = vsub.f32 1.0, %v2087_v40  ;;  %vm2137_vm12 = vweird.f32 %v4729_v38  ;;  %vm6220_vm1 = vmor %vm2121_vm8, %vm2122_vm10  ;;  %vm2092_vm8 = vweird.f32 %v6158_v48 }
 0x42a   :  { %v4733_v21 = vpop.eup %4732  ;;  %v2118_v59 = vsub.f32 1.0, %v2117_v32  ;;  %v2072_v9 = vmul.f32 %v6171_v18, %v6149_v51  ;;  %vm6207_vm4 = vmor %vm2136_vm15, %vm2137_vm12  ;;  %vm6230_vm12 = vcmp.eq.f32.partialorder %v2110_v60, 8.507059e+37  ;;  %v2113_v40 = vor.u32 1.1754944e-38, %v2112_v36  ;;  %v1336_v36 = vld [vmem:[#allocation5 + $0x1c0] sm:$0xff] }
 0x42b   :  { %v6177_v29 = vpop.eup %4734  ;;  %v2147_v33 = vmul.f32 %v4733_v21, %v6151_v13  ;;  %v2133_v10 = vsub.f32 1.0, %v2132_v8  ;;  %vm2152_vm13 = vweird.f32 %v4733_v21  ;;  %v2089_v12 = vmul.f32 %v6158_v48, %v2088_v57 }
 0x42c   :  { %v2119_v0 = vmul.f32 %v6162_v43, %v2118_v59  ;;  %v2102_v27 = vmul.f32 %v6177_v29, %v6154_v5  ;;  %v2073_v14 = vsub.f32 1.0, %v2072_v9  ;;  %v6204_v49 = vpop.eup %4736  ;;  %vm2107_vm5 = vweird.f32 %v6177_v29  ;;  %vm2153_vm15 = vmor %vm2151_vm14, %vm2152_vm13 }
 0x42d   :  { %v2148_v19 = vsub.f32 1.0, %v2147_v33  ;;  %v2134_v3 = vmul.f32 %v4729_v38, %v2133_v10  ;;  %vm6245_vm14 = vmor %vm2106_vm9, %vm2107_vm5  ;;  %v2098_v39 = vor.u32 1.1754944e-38, %v2097_v6  ;;  %vm2076_vm13 = vweird.f32 %v6149_v51  ;;  %v1342_v6 = vld [vmem:[#allocation5 + $0x1f0] sm:$0x3] }
 0x42e   :  { %v2103_v58 = vsub.f32 1.0, %v2102_v27  ;;  %v2120_v61 = vadd.f32 %v6162_v43, %v2119_v0  ;;  %v2074_v56 = vmul.f32 %v6171_v18, %v2073_v14  ;;  %v2080_v10 = vand.u32 2147483647, %v6149_v51 }
 0x42f   :  { %v2149_v54 = vmul.f32 %v4733_v21, %v2148_v19  ;;  %v2135_v24 = vadd.f32 %v4729_v38, %v2134_v3  ;;  %v2067_v0 = vand.u32 2147483648, %v6160_v16  ;;  %vm2096_vm10 = vcmp.eq.f32.partialorder %v2095_v1, 8.507059e+37  ;;  %v6294_v3 = vld [vmem:[#allocation7] sm:$0xff] }
 0x430   :  { %v2104_v37 = vmul.f32 %v6177_v29, %v2103_v58  ;;  %v2124_v30 = vsel %vm6220_vm1, %v6162_v43, %v2120_v61  ;;  %v2075_v59 = vadd.f32 %v6171_v18, %v2074_v56  ;;  %v2065_v34 = vand.u32 2147483647, %v6160_v16  ;;  %v6314_v61 = vld [vmem:[#allocation7 + $0x30] sm:$0x3] }
 0x431   :  { %v2150_v31 = vadd.f32 %v4733_v21, %v2149_v54  ;;  %v2139_v50 = vsel %vm6207_vm4, %v4729_v38, %v2135_v24  ;;  %v2090_v38 = vadd.f32 %v6158_v48, %v2089_v12  ;;  %v2129_v5 = vsel %vm6195_vm7, %v2128_v52, %v2124_v30  ;;  %v6307_v54 = vld [vmem:[#allocation7 + $0x20] sm:$0xff]  ;;  %v6310_v24 = vld [vmem:[#allocation7 + $0x10] sm:$0xff] }
 0x432   :  { %v2105_v23 = vadd.f32 %v6177_v29, %v2104_v37  ;;  %v2144_v32 = vsel %vm6184_vm2, %v2143_v47, %v2139_v50  ;;  %vm6263_vm2 = vmor %vm2091_vm3, %vm2092_vm8  ;;  %vm2062_vm3 = vweird.f32 %v6204_v49  ;;  %vm2061_vm4 = vweird.f32 %v6160_v16  ;;  %v1341_v37 = vld [vmem:[#allocation5 + $0x1e8] sm:$0xff]  ;;  %v7660_v47 = vld [vmem:[#allocation15_spill] sm:$0xff] }
 0x433   :  { %v2154_v46 = vsel %vm2153_vm15, %v4733_v21, %v2150_v31  ;;  %v2057_v21 = vmul.f32 %v6204_v49, %v6160_v16  ;;  %v2166_v33 = vmul.f32 %v2144_v32, %v6130_v45  ;;  %v2094_v35 = vsel %vm6263_vm2, %v6158_v48, %v2090_v38  ;;  %vm2063_vm1 = vmor %vm2061_vm4, %vm2062_vm3 }
 0x434   :  { %v2159_v13 = vsel %vm6180_vm11, %v2158_v11, %v2154_v46  ;;  %v2109_v53 = vsel %vm6245_vm14, %v6177_v29, %v2105_v23  ;;  %vm2077_vm11 = vweird.f32 %v6171_v18  ;;  %v5026_v45 = vmov 18   ;;  %v1339_v11 = vld [vmem:[#allocation5 + $0x1d8] sm:$0xff] }
 0x435   :  { %v2167_v43 = vmul.f32 %v2159_v13, %v6126_v20  ;;  %v2082_v20 = vand.u32 2147483648, %v6149_v51  ;;  %v2058_v29 = vsub.f32 1.0, %v2057_v21  ;;  %v2114_v22 = vsel %vm6230_vm12, %v2113_v40, %v2109_v53  ;;  %vm6277_vm7 = vmor %vm2076_vm13, %vm2077_vm11  ;;  %4552 = vset.pattern.permute.xlu1 %v5026_v45  ;;  %4551 = vset.pattern.permute.xlu2 %v5026_v45 }
 0x436   :  { %v2165_v48 = vmul.f32 %v2129_v5, %v6128_v44  ;;  %v2079_v51 = vsel %vm6277_vm7, %v6171_v18, %v2075_v59  ;;  %2173 = vperm.xlu1 %4552, %v5992_v63   ;;  %v2099_v27 = vsel %vm2096_vm10, %v2098_v39, %v2094_v35  ;;  %4553 = vset.pattern.permute.xlu0 %v5026_v45  ;;  %vm2081_vm9 = vcmp.eq.f32.partialorder %v2080_v10, 8.507059e+37  ;;  %v7665_v45 = vld [vmem:[#allocation18_spill] sm:$0xff] }
 0x437   :  { %4315 = vmatpush.msk.msra.mxu0 %vm7586_vm6, %v2167_v43  ;;  %v2059_v9 = vmul.f32 %v6204_v49, %v2058_v29  ;;  %v2083_v60 = vor.u32 1.1754944e-38, %v2082_v20  ;;  %2169 = vperm.xlu2 %4551, %v6294_v3   ;;  %v2164_v44 = vmul.f32 %v2114_v22, %v6132_v62  ;;  %v2068_v16 = vor.u32 1.1754944e-38, %v2067_v0  ;;  %v7663_v22 = vld [vmem:[#allocation17_spill] sm:$0xff] }
 0x438   :  { %2181 = vperm.xlu0 %4553, %v6300_v7   ;;  %v2163_v41 = vmul.f32 %v2099_v27, %v6121_v15  ;;  %vm2066_vm5 = vcmp.eq.f32.partialorder %v2065_v34, 8.507059e+37  ;;  %v1337_v15 = vld [vmem:[#allocation5 + $0x1c8] sm:$0xff]  ;;  %v5027_v12 = vmov 20   ;;  %vm7668_vm14 = vcmask 80896  }
 0x439   :  { %2230 = vmatpush.msra.mxu0 %v2166_v33  ;;  %v2060_v19 = vadd.f32 %v6204_v49, %v2059_v9  ;;  %v2084_v1 = vsel %vm2081_vm9, %v2083_v60, %v2079_v51  ;;  %v7661_v33 = vld [vmem:[#allocation16_spill] sm:$0xff] }
 0x43a   :  { %v2162_v62 = vmul.f32 %v2084_v1, %v6124_v28  ;;  %v6317_v28 = vld [vmem:[#allocation7 + $0x28] sm:$0xff] }
 0x43b   :  { %2231 = vmatpush.msra.mxu0 %v2165_v48  ;;  %v2064_v18 = vsel %vm2063_vm1, %v6204_v49, %v2060_v19  ;;  %v5028_v49 = vmov 19   ;;  %vm7673_vm1 = vmmov %vm7668_vm14 }
 0x43c   :  { %v2069_v14 = vsel %vm2066_vm5, %v2068_v16, %v2064_v18 }
 0x43d   :  { %2232 = vmatpush.msra.mxu0 %v2164_v44  ;;  %v2161_v58 = vmul.f32 %v2069_v14, %v6135_v2  ;;  %v1338_v2 = vld [vmem:[#allocation5 + $0x1d0] sm:$0xff] }
 0x43e   :  { %2185 = vperm.xlu1 %4552, %v6307_v54  }
 0x43f   :  { %2233 = vmatpush.msra.mxu0 %v2163_v41  ;;  %2177 = vperm.xlu2 %4551, %v6310_v24   ;;  %v7667_v41 = vld [vmem:[#allocation14_spill] sm:$0xff] }
 0x440   :  { %4555 = vset.pattern.permute.xlu0 %v5028_v49 }
 0x441   :  { %2234 = vmatpush.msra.mxu0 %v2162_v62  ;;  %2374 = vperm.xlu0 %4555, %v6317_v28  }
 0x443   :  { %2235 = vmatpush.msra.mxu0 %v2161_v58 }
 0x444   :  { %4316 = vmatmul.msk.f32.vlgmr.msra.gmra.mxu0 %vm1155_vm0, %v1336_v36 }
 0x446   :  { %2193 = vperm.xlu1 %4552, %v6314_v61  }
 0x447   :  { %2189 = vperm.xlu2 %4551, %v6317_v28  }
 0x449   :  { %4557 = vset.pattern.permute.xlu0 %v5027_v12 }
 0x44a   :  { %2405 = vperm.xlu0 %4557, %v6307_v54  }
 0x44c   :  { %4317 = vmatmul.msk.f32.gmra.mxu0 %vm1155_vm0, %v1337_v15 }
 0x44e   :  { %4556 = vset.pattern.permute.xlu1 %v5027_v12 }
 0x44f   :  { %4554 = vset.pattern.permute.xlu2 %v5028_v49  ;;  %2413 = vperm.xlu1 %4556, %v6314_v61  }
 0x450   :  { %2378 = vperm.xlu2 %4554, %v6314_v61  }
 0x452   :  { %4560 = vset.pattern.permute.xlu0 %v5028_v49 }
 0x453   :  { %2354 = vperm.xlu0 %4560, %v6294_v3  }
 0x454   :  { %4318 = vmatmul.msk.f32.gmra.mxu0 %vm1155_vm0, %v1338_v2 }
 0x457   :  { %2409 = vperm.xlu1 %4556, %v6317_v28  }
 0x458   :  { %2370 = vperm.xlu2 %4554, %v6307_v54  }
 0x45c   :  { %4319 = vmatmul.msk.f32.gmra.mxu0 %vm1155_vm0, %v1339_v11 }
 0x45f   :  { %4558 = vset.pattern.permute.xlu1 %v5028_v49 }
 0x460   :  { %2366 = vperm.xlu2 %4554, %v6300_v7   ;;  %2362 = vperm.xlu1 %4558, %v6310_v24  }
 0x464   :  { %4320 = vmatmul.msk.f32.gmra.mxu0 %vm1155_vm0, %v1340_v25 }
 0x468   :  { %4559 = vset.pattern.permute.xlu2 %v5027_v12  ;;  %2358 = vperm.xlu1 %4558, %v5992_v63  }
 0x469   :  { %2401 = vperm.xlu2 %4559, %v6300_v7  }
 0x46c   :  { %4321 = vmatmul.msk.f32.gmra.mxu0 %vm1155_vm0, %v1341_v37 }
 0x470   :  { %4561 = vset.pattern.permute.xlu1 %v5027_v12 }
 0x471   :  { %2397 = vperm.xlu2 %4559, %v6310_v24   ;;  %2393 = vperm.xlu1 %4561, %v5992_v63  }
 0x474   :  { %4322 = vmatmul.msk.f32.gmra.mxu0 %vm1155_vm0, %v1342_v6 }
 0x479   :  { %2389 = vperm.xlu2 %4559, %v6294_v3  }
 0x491   :  { %v2170_v52 = vpop.permute.xlu2 %2169 }
 0x499   :  { %v2178_v46 = vpop.permute.xlu2 %2177 }
 0x4a1   :  { %v2190_v59 = vpop.permute.xlu2 %2189 }
 0x4a8   :  { %v2174_v23 = vpop.permute.xlu1 %2173 }
 0x4aa   :  { %v2182_v40 = vpop.permute.xlu0 %2181  ;;  %v2379_v49 = vpop.permute.xlu2 %2378 }
 0x4b0   :  { %v2186_v32 = vpop.permute.xlu1 %2185 }
 0x4b8   :  { %v2194_v10 = vpop.permute.xlu1 %2193 }
 0x4c1   :  { %v2237_v31 = vpop.f32.mrf.mxu0 }
 0x4c2   :  { %v2238_v38 = vadd.f32 %v2237_v31, %v2170_v52 }
 0x4c4   :  { %v6344_v21 = vadd.f32 %v2238_v38, %v5753_v42  ;;  %v2414_v38 = vpop.permute.xlu1 %2413 }
 0x4c9   :  { %v2240_v50 = vpop.f32.mrf.mxu0 }
 0x4ca   :  { %v2241_v30 = vadd.f32 %v2240_v50, %v2174_v23 }
 0x4cc   :  { %v6341_v8 = vadd.f32 %v2241_v30, %v5751_v55 }
 0x4ce   :  { %v2293_v5 = vadd.f32 %v6341_v8, %v6344_v21 }
 0x4d1   :  { %v2243_v17 = vpop.f32.mrf.mxu0 }
 0x4d2   :  { %v2244_v13 = vadd.f32 %v2243_v17, %v2178_v46 }
 0x4d4   :  { %v6347_v43 = vadd.f32 %v2244_v13, %v5755_v4 }
 0x4d6   :  { %v2294_v55 = vadd.f32 %v2293_v5, %v6347_v43  ;;  %v2410_v5 = vpop.permute.xlu1 %2409 }
 0x4d9   :  { %v2246_v56 = vpop.f32.mrf.mxu0 }
 0x4da   :  { %v2247_v39 = vadd.f32 %v2246_v56, %v2182_v40 }
 0x4dc   :  { %v6352_v20 = vadd.f32 %v2247_v39, %v7660_v47 }
 0x4de   :  { %v2295_v42 = vadd.f32 %v2294_v55, %v6352_v20 }
 0x4e1   :  { %v2249_v26 = vpop.f32.mrf.mxu0 }
 0x4e2   :  { %v2250_v53 = vadd.f32 %v2249_v26, %v2186_v32  ;;  %v2371_v32 = vpop.permute.xlu2 %2370 }
 0x4e4   :  { %v6356_v35 = vadd.f32 %v2250_v53, %v7661_v33 }
 0x4e6   :  { %7662 = vst [vmem:[#allocation15_spill] sm:$0xff] %v6356_v35  ;;  %v2296_v0 = vadd.f32 %v2295_v42, %v6356_v35 }
 0x4e9   :  { %v2252_v63 = vpop.f32.mrf.mxu0 }
 0x4ea   :  { %v2253_v29 = vadd.f32 %v2252_v63, %v2190_v59 }
 0x4ec   :  { %v6360_v4 = vadd.f32 %v2253_v29, %v7663_v22  ;;  %v2367_v29 = vpop.permute.xlu2 %2366  ;;  %v2363_v22 = vpop.permute.xlu1 %2362 }
 0x4ee   :  { %7664 = vst [vmem:[#allocation16_spill] sm:$0xff] %v6360_v4  ;;  %v2297_v51 = vadd.f32 %v2296_v0, %v6360_v4 }
 0x4f1   :  { %v2255_v57 = vpop.f32.mrf.mxu0 }
 0x4f2   :  { %v2256_v9 = vadd.f32 %v2255_v57, %v2194_v10  ;;  %v2375_v10 = vpop.permute.xlu0 %2374 }
 0x4f4   :  { %v6364_v48 = vadd.f32 %v2256_v9, %v7665_v45  ;;  %v2402_v57 = vpop.permute.xlu2 %2401 }
 0x4f6   :  { %7666 = vst [vmem:[#allocation17_spill] sm:$0xff] %v6364_v48  ;;  %v2298_v34 = vsel %vm7586_vm6, %v6364_v48, 0.0 }
 0x4f7   :  { %v2299_v27 = vadd.f32 %v2298_v34, %v2297_v51 }
 0x4f9   :  { %v2300_v60 = vrot.slane %v2299_v27, 4 }
 0x4fa   :  { %v2406_v45 = vpop.permute.xlu0 %2405 }
 0x4fb   :  { %v2301_v19 = vadd.f32 %v2300_v60, %v2299_v27  ;;  %v2359_v27 = vpop.permute.xlu1 %2358 }
 0x4fc   :  { %v2398_v60 = vpop.permute.xlu2 %2397 }
 0x4fd   :  { %v2302_v44 = vrot.slane %v2301_v19, 2 }
 0x4ff   :  { %v2303_v1 = vadd.f32 %v2302_v44, %v2301_v19 }
 0x501   :  { %v2304_v18 = vrot.slane %v2303_v1, 1 }
 0x503   :  { %v2305_v16 = vadd.f32 %v2304_v18, %v2303_v1 }
 0x505   :  { %v2306_v14 = vmul.f32 %v2305_v16, %v7667_v41 }
 0x507   :  { %v2307_v62 = vsub.f32 %v6344_v21, %v2306_v14  ;;  %v2308_v58 = vsub.f32 %v6341_v8, %v2306_v14  ;;  %v2309_v36 = vsub.f32 %v6347_v43, %v2306_v14  ;;  %v2310_v15 = vsub.f32 %v6352_v20, %v2306_v14 }
 0x508   :  { %v2311_v11 = vsub.f32 %v6356_v35, %v2306_v14  ;;  %v2313_v6 = vsub.f32 %v6364_v48, %v2306_v14  ;;  %v2312_v31 = vsub.f32 %v6360_v4, %v2306_v14 }
 0x509   :  { %v2314_v2 = vmul.f32 %v2307_v62, %v2307_v62  ;;  %v2315_v12 = vmul.f32 %v2308_v58, %v2308_v58  ;;  %v2316_v25 = vmul.f32 %v2309_v36, %v2309_v36  ;;  %v2317_v50 = vmul.f32 %v2310_v15, %v2310_v15 }
 0x50a   :  { %v2318_v56 = vmul.f32 %v2311_v11, %v2311_v11  ;;  %v2320_v23 = vmul.f32 %v2313_v6, %v2313_v6  ;;  %v2319_v26 = vmul.f32 %v2312_v31, %v2312_v31 }
 0x50b   :  { %v2321_v37 = vadd.f32 %v2315_v12, %v2314_v2  ;;  %v2355_v12 = vpop.permute.xlu0 %2354 }
 0x50c   :  { %v2326_v40 = vsel %vm7586_vm6, %v2320_v23, 0.0 }
 0x50d   :  { %v2322_v17 = vadd.f32 %v2321_v37, %v2316_v25 }
 0x50f   :  { %v2323_v52 = vadd.f32 %v2322_v17, %v2317_v50 }
 0x511   :  { %v2324_v46 = vadd.f32 %v2323_v52, %v2318_v56 }
 0x513   :  { %v2325_v30 = vadd.f32 %v2324_v46, %v2319_v26 }
 0x515   :  { %v2327_v13 = vadd.f32 %v2326_v40, %v2325_v30  ;;  %v2394_v40 = vpop.permute.xlu1 %2393 }
 0x517   :  { %v2328_v39 = vrot.slane %v2327_v13, 4 }
 0x519   :  { %v2329_v63 = vadd.f32 %v2328_v39, %v2327_v13 }
 0x51b   :  { %v2330_v53 = vrot.slane %v2329_v63, 2 }
 0x51d   :  { %v2331_v59 = vadd.f32 %v2330_v53, %v2329_v63 }
 0x51f   :  { %v2332_v47 = vrot.slane %v2331_v59, 1 }
 0x521   :  { %v2333_v55 = vadd.f32 %v2332_v47, %v2331_v59  ;;  %v6401_v47 = vld [vmem:[#allocation7 + $0x8] sm:$0xff] }
 0x523   :  { %v2334_v33 = vmul.f32 %v2333_v55, %v7667_v41 }
 0x525   :  { %v2335_v42 = vadd.f32 1e-05, %v2334_v33 }
 0x527   :  { %4738 = vrsqrt.f32 %v2335_v42  ;;  %vm2342_vm12 = vweird.f32 %v2335_v42 }
 0x52d   :  { %v4739_v9 = vpop.eup %4738 }
 0x52e   :  { %v2337_v0 = vmul.f32 %v4739_v9, %v2335_v42  ;;  %vm2343_vm15 = vweird.f32 %v4739_v9 }
 0x52f   :  { %vm2344_vm8 = vmor %vm2342_vm12, %vm2343_vm15 }
 0x530   :  { %v2338_v51 = vmul.f32 %v4739_v9, %v2337_v0  ;;  %vm7676_vm12 = vmmov %vm7673_vm1 }
 0x532   :  { %v2339_v34 = vmul.f32 0.5, %v2338_v51 }
 0x534   :  { %v2340_v19 = vsub.f32 1.5, %v2339_v34 }
 0x536   :  { %v2341_v44 = vmul.f32 %v4739_v9, %v2340_v19 }
 0x538   :  { %v2345_v1 = vsel %vm2344_vm8, %v4739_v9, %v2341_v44 }
 0x539   :  { %v2352_v18 = vmul.f32 %v2345_v1, %v2313_v6  ;;  %v2350_v16 = vmul.f32 %v2345_v1, %v2311_v11  ;;  %v2349_v14 = vmul.f32 %v2345_v1, %v2310_v15  ;;  %v2351_v2 = vmul.f32 %v2345_v1, %v2312_v31  ;;  %v2390_v11 = vpop.permute.xlu2 %2389 }
 0x53a   :  { %v2348_v25 = vmul.f32 %v2345_v1, %v2309_v36  ;;  %v2347_v37 = vmul.f32 %v2345_v1, %v2308_v58  ;;  %v2346_v50 = vmul.f32 %v2345_v1, %v2307_v62 }
 0x53b   :  { %v2387_v17 = vmul.f32 %v2379_v49, %v2352_v18  ;;  %v2385_v56 = vmul.f32 %v2371_v32, %v2350_v16  ;;  %v2384_v52 = vmul.f32 %v2367_v29, %v2349_v14  ;;  %v2386_v23 = vmul.f32 %v2375_v10, %v2351_v2 }
 0x53c   :  { %v2383_v26 = vmul.f32 %v2363_v22, %v2348_v25  ;;  %v2382_v46 = vmul.f32 %v2359_v27, %v2347_v37  ;;  %v2381_v30 = vmul.f32 %v2355_v12, %v2346_v50  ;;  %v2272_v27 = vld [vmem:[#allocation5 + $0x230] sm:$0xff] }
 0x53d   :  { %v6379_v13 = vadd.f32 %v2414_v38, %v2387_v17  ;;  %v6381_v39 = vadd.f32 %v2402_v57, %v2384_v52  ;;  %v6383_v6 = vadd.f32 %v2410_v5, %v2386_v23  ;;  %v6385_v15 = vadd.f32 %v2406_v45, %v2385_v56  ;;  %4339 = vmatmul.msk.f32.vlgmr.msrb.gmra.mxu2 %vm7668_vm14, %v2272_v27 }
 0x53e   :  { %v6387_v36 = vadd.f32 %v2398_v60, %v2383_v26  ;;  %v6389_v62 = vadd.f32 %v2390_v11, %v2381_v30  ;;  %v6394_v32 = vadd.f32 %v2394_v40, %v2382_v46  ;;  %v5029_v5 = vmov 21  }
 0x53f   :  { %v4329_v58 = vmul.f32 -1.442695, %v6379_v13  ;;  %v4326_v49 = vmul.f32 -1.442695, %v6381_v39  ;;  %v4328_v31 = vmul.f32 -1.442695, %v6383_v6  ;;  %4562 = vset.pattern.permute.xlu1 %v5029_v5  ;;  %4563 = vset.pattern.permute.xlu2 %v5029_v5 }
 0x540   :  { %v4325_v38 = vmul.f32 -1.442695, %v6387_v36  ;;  %v4327_v63 = vmul.f32 -1.442695, %v6385_v15  ;;  %v4323_v53 = vmul.f32 -1.442695, %v6389_v62  ;;  %2564 = vperm.xlu1 %4562, %v6294_v3   ;;  %2568 = vperm.xlu2 %4563, %v6401_v47  }
 0x541   :  { %4740 = vpow2.f32 %v4329_v58  ;;  %v4324_v59 = vmul.f32 -1.442695, %v6394_v32  ;;  %4564 = vset.pattern.permute.xlu0 %v5029_v5 }
 0x542   :  { %4742 = vpow2.f32 %v4326_v49  ;;  %2572 = vperm.xlu0 %4564, %v6310_v24  }
 0x543   :  { %4744 = vpow2.f32 %v4328_v31 }
 0x544   :  { %4746 = vpow2.f32 %v4325_v38 }
 0x545   :  { %4748 = vpow2.f32 %v4327_v63 }
 0x546   :  { %4750 = vpow2.f32 %v4323_v53  ;;  %v2279_v53 = vld [vmem:[#allocation5 + $0x268] sm:$0xff] }
 0x547   :  { %v4741_v29 = vpop.eup %4740  ;;  %4752 = vpow2.f32 %v4324_v59  ;;  %v2273_v59 = vld [vmem:[#allocation5 + $0x238] sm:$0xff]  ;;  %4347 = vmatmul.msk.f32.vlgmr.msrb.gmra.mxu3 %vm7673_vm1, %v2279_v53 }
 0x548   :  { %v4743_v55 = vpop.eup %4742  ;;  %v6404_v33 = vadd.f32 1.0, %v4741_v29  ;;  %2576 = vperm.xlu1 %4562, %v6300_v7   ;;  %2580 = vperm.xlu2 %4563, %v6307_v54  }
 0x549   :  { %v4745_v42 = vpop.eup %4744  ;;  %v6407_v10 = vadd.f32 1.0, %v4743_v55  ;;  %4340 = vmatmul.msk.f32.gmra.mxu2 %vm7676_vm12, %v2273_v59 }
 0x54a   :  { %v4747_v22 = vpop.eup %4746  ;;  %4754 = vrcp.f32 %v6404_v33  ;;  %v6411_v0 = vadd.f32 1.0, %v4745_v42  ;;  %v2550_v60 = vand.u32 2147483647, %v6404_v33  ;;  %v2552_v19 = vand.u32 2147483648, %v6404_v33 }
 0x54b   :  { %v4749_v57 = vpop.eup %4748  ;;  %4756 = vrcp.f32 %v6407_v10  ;;  %v6413_v45 = vadd.f32 1.0, %v4747_v22  ;;  %v2507_v1 = vand.u32 2147483648, %v6407_v10  ;;  %vm2546_vm11 = vweird.f32 %v6404_v33 }
 0x54c   :  { %v4751_v9 = vpop.eup %4750  ;;  %v6415_v34 = vadd.f32 1.0, %v4749_v57  ;;  %4758 = vrcp.f32 %v6411_v0  ;;  %vm2501_vm2 = vweird.f32 %v6407_v10  ;;  %v2505_v25 = vand.u32 2147483647, %v6407_v10 }
 0x54d   :  { %v4753_v51 = vpop.eup %4752  ;;  %v6420_v44 = vadd.f32 1.0, %v4751_v9  ;;  %4760 = vrcp.f32 %v6413_v45  ;;  %v2492_v16 = vand.u32 2147483648, %v6413_v45  ;;  %vm6438_vm13 = vcmp.eq.f32.partialorder %v2550_v60, 8.507059e+37 }
 0x54e   :  { %4762 = vrcp.f32 %v6415_v34  ;;  %v6430_v14 = vadd.f32 1.0, %v4753_v51  ;;  %v2522_v37 = vand.u32 2147483648, %v6415_v34  ;;  %v2553_v17 = vor.u32 1.1754944e-38, %v2552_v19 }
 0x54f   :  { %4764 = vrcp.f32 %v6420_v44  ;;  %v6445_v23 = vor.u32 1.1754944e-38, %v2507_v1  ;;  %v2520_v26 = vand.u32 2147483647, %v6415_v34  ;;  %v2490_v40 = vand.u32 2147483647, %v6413_v45 }
 0x550   :  { %v4755_v18 = vpop.eup %4754  ;;  %4766 = vrcp.f32 %v6430_v14  ;;  %v6452_v11 = vor.u32 1.1754944e-38, %v2492_v16  ;;  %vm6457_vm10 = vcmp.eq.f32.partialorder %v2505_v25, 8.507059e+37  ;;  %vm2516_vm4 = vweird.f32 %v6415_v34  ;;  %2584 = vperm.xlu1 %4562, %v6317_v28   ;;  %2588 = vperm.xlu2 %4563, %v6314_v61  }
 0x551   :  { %v6432_v2 = vpop.eup %4756  ;;  %v2542_v12 = vmul.f32 %v4755_v18, %v6404_v33  ;;  %vm2547_vm7 = vweird.f32 %v4755_v18  ;;  %v6462_v38 = vor.u32 1.1754944e-38, %v2522_v37  ;;  %vm2486_vm9 = vweird.f32 %v6413_v45 }
 0x552   :  { %v2497_v56 = vmul.f32 %v6432_v2, %v6407_v10  ;;  %v6449_v46 = vpop.eup %4758  ;;  %vm2502_vm3 = vweird.f32 %v6432_v2  ;;  %v2475_v42 = vand.u32 2147483647, %v6430_v14  ;;  %v2477_v22 = vand.u32 2147483648, %v6430_v14  ;;  %vm2548_vm8 = vmor %vm2546_vm11, %vm2547_vm7 }
 0x553   :  { %v2543_v52 = vsub.f32 1.0, %v2542_v12  ;;  %v6454_v58 = vpop.eup %4760  ;;  %v2527_v63 = vmul.f32 %v6449_v46, %v6411_v0  ;;  %vm6478_vm5 = vcmp.eq.f32.partialorder %v2520_v26, 8.507059e+37  ;;  %vm2531_vm15 = vweird.f32 %v6411_v0  ;;  %vm6505_vm11 = vmor %vm2501_vm2, %vm2502_vm3 }
 0x554   :  { %v2498_v30 = vsub.f32 1.0, %v2497_v56  ;;  %v6466_v5 = vpop.eup %4762  ;;  %v2482_v55 = vmul.f32 %v6454_v58, %v6413_v45  ;;  %vm2471_vm14 = vweird.f32 %v6430_v14  ;;  %v2535_v16 = vand.u32 2147483647, %v6411_v0 }
 0x555   :  { %v2544_v49 = vmul.f32 %v4755_v18, %v2543_v52  ;;  %v2512_v9 = vmul.f32 %v6466_v5, %v6415_v34  ;;  %v2528_v27 = vsub.f32 1.0, %v2527_v63  ;;  %v6485_v60 = vpop.eup %4764  ;;  %v2537_v12 = vand.u32 2147483648, %v6411_v0 }
 0x556   :  { %v2499_v29 = vmul.f32 %v6432_v2, %v2498_v30  ;;  %v2483_v1 = vsub.f32 1.0, %v2482_v55  ;;  %v6494_v25 = vpop.eup %4766  ;;  %v2452_v26 = vmul.f32 %v6485_v60, %v6420_v44  ;;  %vm6510_vm7 = vcmp.eq.f32.partialorder %v2490_v40, 8.507059e+37  ;;  %v2280_v55 = vld [vmem:[#allocation5 + $0x270] sm:$0xff]  ;;  %v2275_v30 = vld [vmem:[#allocation5 + $0x248] sm:$0xff] }
 0x557   :  { %v2545_v57 = vadd.f32 %v4755_v18, %v2544_v49  ;;  %v2513_v56 = vsub.f32 1.0, %v2512_v9  ;;  %v2529_v52 = vmul.f32 %v6449_v46, %v2528_v27  ;;  %v2467_v63 = vmul.f32 %v6494_v25, %v6430_v14 }
 0x558   :  { %v2500_v19 = vadd.f32 %v6432_v2, %v2499_v29  ;;  %v2484_v49 = vmul.f32 %v6454_v58, %v2483_v1  ;;  %vm2532_vm1 = vweird.f32 %v6449_v46  ;;  %vm2517_vm2 = vweird.f32 %v6466_v5 }
 0x559   :  { %v2549_v37 = vsel %vm2548_vm8, %v4755_v18, %v2545_v57  ;;  %v2468_v53 = vsub.f32 1.0, %v2467_v63  ;;  %v2530_v59 = vadd.f32 %v6449_v46, %v2529_v52  ;;  %vm2533_vm3 = vmor %vm2531_vm15, %vm2532_vm1  ;;  %vm2536_vm12 = vcmp.eq.f32.partialorder %v2535_v16, 8.507059e+37  ;;  %v2274_v57 = vld [vmem:[#allocation5 + $0x240] sm:$0xff]  ;;  %v2265_v18 = vld [vmem:[#allocation5 + $0x1f8] sm:$0xff] }
 0x55a   :  { %v2554_v33 = vsel %vm6438_vm13, %v2553_v17, %v2549_v37  ;;  %v2504_v10 = vsel %vm6505_vm11, %v6432_v2, %v2500_v19  ;;  %v2514_v17 = vmul.f32 %v6466_v5, %v2513_v56  ;;  %v2485_v40 = vadd.f32 %v6454_v58, %v2484_v49  ;;  %vm2518_vm8 = vmor %vm2516_vm4, %vm2517_vm2  ;;  %v2276_v63 = vld [vmem:[#allocation5 + $0x250] sm:$0xff] }
 0x55b   :  { %v2562_v50 = vmul.f32 %v2554_v33, %v6379_v13  ;;  %vm2487_vm13 = vweird.f32 %v6454_v58  ;;  %v2538_v13 = vor.u32 1.1754944e-38, %v2537_v12  ;;  %v2453_v2 = vsub.f32 1.0, %v2452_v26  ;;  %v2281_v33 = vld [vmem:[#allocation5 + $0x278] sm:$0xff] }
 0x55c   :  { %v2515_v29 = vadd.f32 %v6466_v5, %v2514_v17  ;;  %v2509_v9 = vsel %vm6457_vm10, %v6445_v23, %v2504_v10  ;;  %v2469_v27 = vmul.f32 %v6494_v25, %v2468_v53  ;;  %vm2472_vm11 = vweird.f32 %v6494_v25  ;;  %vm6543_vm15 = vmor %vm2486_vm9, %vm2487_vm13  ;;  %v2277_v10 = vld [vmem:[#allocation5 + $0x258] sm:$0xff]  ;;  %v2267_v17 = vld [vmem:[#allocation5 + $0x208] sm:$0xff] }
 0x55d   :  { %4330 = vmatpush.msk.msrb.mxu1 %vm7586_vm6, %v2562_v50  ;;  %v2534_v19 = vsel %vm2533_vm3, %v6449_v46, %v2530_v59  ;;  %vm7681_vm6 = vcmask 80896   ;;  %v2454_v31 = vmul.f32 %v6485_v60, %v2453_v2  ;;  %vm2457_vm10 = vweird.f32 %v6485_v60  ;;  %v2283_v50 = vld [vmem:[#allocation5 + $0x288] sm:$0xff]  ;;  %v2285_v53 = vld [vmem:[#allocation5 + $0x298] sm:$0x3] }
 0x55e   :  { %4348 = vmatmul.msk.f32.gmra.mxu3 %vm7681_vm6, %v2280_v55  ;;  %v2519_v23 = vsel %vm2518_vm8, %v6466_v5, %v2515_v29  ;;  %v2539_v34 = vsel %vm2536_vm12, %v2538_v13, %v2534_v19  ;;  %vm7684_vm4 = vmmov %vm7681_vm6  ;;  %v2489_v46 = vsel %vm6543_vm15, %v6454_v58, %v2485_v40  ;;  %v2470_v1 = vadd.f32 %v6494_v25, %v2469_v27  ;;  %v2284_v40 = vld [vmem:[#allocation5 + $0x290] sm:$0xff]  ;;  %v2269_v59 = vld [vmem:[#allocation5 + $0x218] sm:$0xff] }
 0x55f   :  { %4341 = vmatmul.msk.f32.gmra.mxu2 %vm7684_vm4, %v2274_v57  ;;  %v2524_v45 = vsel %vm6478_vm5, %v6462_v38, %v2519_v23  ;;  %v2561_v16 = vmul.f32 %v2539_v34, %v6383_v6  ;;  %vm6561_vm6 = vmor %vm2471_vm14, %vm2472_vm11  ;;  %v2455_v12 = vadd.f32 %v6485_v60, %v2454_v31  ;;  %vm2456_vm9 = vweird.f32 %v6420_v44  ;;  %v2270_v29 = vld [vmem:[#allocation5 + $0x220] sm:$0xff]  ;;  %v2271_v13 = vld [vmem:[#allocation5 + $0x228] sm:$0x3] }
 0x560   :  { %v2460_v58 = vand.u32 2147483647, %v6420_v44  ;;  %v2462_v37 = vand.u32 2147483648, %v6420_v44  ;;  %v2560_v38 = vmul.f32 %v2524_v45, %v6385_v15  ;;  %v2474_v6 = vsel %vm6561_vm6, %v6494_v25, %v2470_v1  ;;  %vm6580_vm5 = vmor %vm2456_vm9, %vm2457_vm10 }
 0x561   :  { %2625 = vmatpush.msrb.mxu1 %v2561_v16  ;;  %v2494_v51 = vsel %vm6510_vm7, %v6452_v11, %v2489_v46  ;;  %v2478_v56 = vor.u32 1.1754944e-38, %v2477_v22  ;;  %v5030_v44 = vmov 24   ;;  %v5031_v15 = vmov 22   ;;  %vm7689_vm1 = vmmov %vm7684_vm4 }
 0x562   :  { %4565 = vset.pattern.permute.xlu1 %v5030_v44  ;;  %4566 = vset.pattern.permute.xlu2 %v5031_v15  ;;  %v2559_v25 = vmul.f32 %v2509_v9, %v6381_v39  ;;  %vm2476_vm14 = vcmp.eq.f32.partialorder %v2475_v42, 8.507059e+37  ;;  %v2459_v11 = vsel %vm6580_vm5, %v6485_v60, %v2455_v12  ;;  %v2463_v26 = vor.u32 1.1754944e-38, %v2462_v37  ;;  %vm7690_vm2 = vmmov %vm7689_vm1 }
 0x563   :  { %2626 = vmatpush.msrb.mxu1 %v2560_v38  ;;  %2912 = vperm.xlu1 %4565, %v6314_v61   ;;  %v2479_v22 = vsel %vm2476_vm14, %v2478_v56, %v2474_v6  ;;  %v2558_v49 = vmul.f32 %v2494_v51, %v6387_v36  ;;  %vm2461_vm7 = vcmp.eq.f32.partialorder %v2460_v58, 8.507059e+37  ;;  %v5032_v14 = vmov 25   ;;  %v2282_v36 = vld [vmem:[#allocation5 + $0x280] sm:$0xff]  ;;  %vm7691_vm13 = vmmov %vm7689_vm1 }
 0x564   :  { %2674 = vperm.xlu2 %4566, %v6317_v28   ;;  %v2464_v39 = vsel %vm2461_vm7, %v2463_v26, %v2459_v11  ;;  %4570 = vset.pattern.permute.xlu0 %v5032_v14  ;;  %v2557_v42 = vmul.f32 %v2479_v22, %v6394_v32  ;;  %vm7692_vm3 = vmmov %vm7689_vm1  ;;  %v5033_v32 = vmov 23   ;;  %vm7698_vm4 = vcmask 1041408  }
 0x565   :  { %2627 = vmatpush.msrb.mxu1 %v2559_v25  ;;  %2943 = vperm.xlu0 %4570, %v6317_v28   ;;  %v2556_v60 = vmul.f32 %v2464_v39, %v6389_v62  ;;  %v2266_v62 = vld [vmem:[#allocation5 + $0x200] sm:$0xff]  ;;  %vm7693_vm12 = vmmov %vm7689_vm1 }
 0x566   :  { %4349 = vmatmul.msk.f32.gmra.mxu3 %vm7689_vm1, %v2281_v33  ;;  %vm7694_vm8 = vmmov %vm7689_vm1 }
 0x567   :  { %4342 = vmatmul.msk.f32.gmra.mxu2 %vm7690_vm2, %v2275_v30  ;;  %2628 = vmatpush.msrb.mxu1 %v2558_v49  ;;  %vm7695_vm11 = vmmov %vm7689_vm1 }
 0x568   :  { %vm7696_vm15 = vmmov %vm7689_vm1 }
 0x569   :  { %2629 = vmatpush.msrb.mxu1 %v2557_v42  ;;  %vm7697_vm10 = vmmov %vm7689_vm1 }
 0x56a   :  { %vm7699_vm6 = vmmov %vm7698_vm4 }
 0x56b   :  { %2630 = vmatpush.msrb.mxu1 %v2556_v60  ;;  %2908 = vperm.xlu1 %4565, %v6317_v28  }
 0x56c   :  { %4331 = vmatmul.msk.f32.vlgmr.msrb.gmra.mxu1 %vm1155_vm0, %v2265_v18  ;;  %4567 = vset.pattern.permute.xlu2 %v5032_v14 }
 0x56d   :  { %2947 = vperm.xlu2 %4567, %v6314_v61   ;;  %4571 = vset.pattern.permute.xlu0 %v5031_v15 }
 0x56e   :  { %4350 = vmatmul.msk.f32.gmra.mxu3 %vm7691_vm13, %v2282_v36  ;;  %2678 = vperm.xlu0 %4571, %v6314_v61  }
 0x56f   :  { %4343 = vmatmul.msk.f32.gmra.mxu2 %vm7692_vm3, %v2276_v63 }
 0x573   :  { %4568 = vset.pattern.permute.xlu1 %v5033_v32 }
 0x574   :  { %4332 = vmatmul.msk.f32.gmra.mxu1 %vm1155_vm0, %v2266_v62  ;;  %2765 = vperm.xlu1 %4568, %v6314_v61   ;;  %v2268_v61 = vld [vmem:[#allocation5 + $0x210] sm:$0xff] }
 0x575   :  { %4569 = vset.pattern.permute.xlu2 %v5030_v44 }
 0x576   :  { %4351 = vmatmul.msk.f32.gmra.mxu3 %vm7693_vm12, %v2283_v50  ;;  %2904 = vperm.xlu2 %4569, %v6307_v54  }
 0x577   :  { %4344 = vmatmul.msk.f32.gmra.mxu2 %vm7694_vm8, %v2277_v10  ;;  %2670 = vperm.xlu0 %4571, %v6307_v54  }
 0x57c   :  { %4333 = vmatmul.msk.f32.gmra.mxu1 %vm1155_vm0, %v2267_v17  ;;  %4572 = vset.pattern.permute.xlu1 %v5031_v15 }
 0x57d   :  { %2666 = vperm.xlu1 %4572, %v6300_v7  }
 0x57e   :  { %4352 = vmatmul.msk.f32.gmra.mxu3 %vm7695_vm11, %v2284_v40  ;;  %4573 = vset.pattern.permute.xlu2 %v5033_v32 }
 0x57f   :  { %2761 = vperm.xlu2 %4573, %v6317_v28   ;;  %2662 = vperm.xlu0 %4571, %v6310_v24   ;;  %v2278_v28 = vld [vmem:[#allocation5 + $0x260] sm:$0x3] }
 0x580   :  { %4345 = vmatmul.msk.f32.gmra.mxu2 %vm7697_vm10, %v2278_v28 }
 0x584   :  { %4334 = vmatmul.msk.f32.gmra.mxu1 %vm1155_vm0, %v2268_v61 }
 0x585   :  { %4574 = vset.pattern.permute.xlu1 %v5030_v44 }
 0x586   :  { %4353 = vmatmul.msk.f32.gmra.mxu3 %vm7696_vm15, %v2285_v53  ;;  %2900 = vperm.xlu1 %4574, %v6300_v7  }
 0x587   :  { %4575 = vset.pattern.permute.xlu2 %v5032_v14  ;;  %4580 = vset.pattern.permute.xlu0 %v5033_v32 }
 0x588   :  { %2939 = vperm.xlu2 %4575, %v6307_v54   ;;  %2753 = vperm.xlu0 %4580, %v6300_v7  }
 0x58c   :  { %4335 = vmatmul.msk.f32.gmra.mxu1 %vm1155_vm0, %v2269_v59 }
 0x58e   :  { %4576 = vset.pattern.permute.xlu1 %v5033_v32 }
 0x58f   :  { %2757 = vperm.xlu1 %4576, %v6307_v54  }
 0x590   :  { %4577 = vset.pattern.permute.xlu2 %v5030_v44  ;;  %4585 = vset.pattern.permute.xlu0 %v5030_v44 }
 0x591   :  { %2896 = vperm.xlu2 %4577, %v6310_v24   ;;  %2888 = vperm.xlu0 %4585, %v6294_v3  }
 0x594   :  { %4336 = vmatmul.msk.f32.gmra.mxu1 %vm1155_vm0, %v2270_v29 }
 0x597   :  { %4578 = vset.pattern.permute.xlu1 %v5032_v14 }
 0x598   :  { %2935 = vperm.xlu1 %4578, %v6300_v7  }
 0x599   :  { %4579 = vset.pattern.permute.xlu2 %v5031_v15 }
 0x59a   :  { %2658 = vperm.xlu2 %4579, %v6401_v47   ;;  %v2569_v54 = vpop.permute.xlu2 %2568 }
 0x59c   :  { %4337 = vmatmul.msk.f32.gmra.mxu1 %vm1155_vm0, %v2271_v13 }
 0x5a0   :  { %4581 = vset.pattern.permute.xlu1 %v5030_v44 }
 0x5a1   :  { %2892 = vperm.xlu1 %4581, %v6401_v47  }
 0x5a2   :  { %4582 = vset.pattern.permute.xlu2 %v5032_v14  ;;  %v2581_v57 = vpop.permute.xlu2 %2580 }
 0x5a3   :  { %2931 = vperm.xlu2 %4582, %v6310_v24  }
 0x5a9   :  { %4583 = vset.pattern.permute.xlu1 %v5031_v15 }
 0x5aa   :  { %2654 = vperm.xlu1 %4583, %v6294_v3   ;;  %v2589_v19 = vpop.permute.xlu2 %2588 }
 0x5ab   :  { %4584 = vset.pattern.permute.xlu2 %v5033_v32 }
 0x5ac   :  { %2749 = vperm.xlu2 %4584, %v6310_v24  }
 0x5b2   :  { %4586 = vset.pattern.permute.xlu1 %v5032_v14  ;;  %v2565_v7 = vpop.permute.xlu1 %2564 }
 0x5b3   :  { %2927 = vperm.xlu1 %4586, %v6401_v47  }
 0x5b4   :  { %2745 = vperm.xlu2 %4584, %v6401_v47  }
 0x5ba   :  { %v2577_v55 = vpop.permute.xlu1 %2576 }
 0x5bb   :  { %2923 = vperm.xlu1 %4586, %v6294_v3  }
 0x5bc   :  { %2741 = vperm.xlu2 %4584, %v6294_v3   ;;  %v2573_v3 = vpop.permute.xlu0 %2572 }
 0x5be   :  { %v6656_v23 = vpop.permute.xlu2 %2674 }
 0x5c0   :  { %v6673_v14 = vpop.f32.mrf.mxu2 }
 0x5c2   :  { %v2585_v27 = vpop.permute.xlu1 %2584 }
 0x5c7   :  { %v6660_v46 = vpop.permute.xlu2 %2947 }
 0x5ca   :  { %v6669_v30 = vpop.f32.mrf.mxu3 }
 0x5cc   :  { %v2722_v10 = vpop.f32.mrf.mxu2 }
 0x5d0   :  { %v6664_v38 = vpop.permute.xlu2 %2904 }
 0x5d5   :  { %v6654_v24 = vpop.permute.xlu1 %2912 }
 0x5d9   :  { %v6671_v49 = vpop.permute.xlu2 %2761 }
 0x5dd   :  { %v6658_v31 = vpop.permute.xlu1 %2908 }
 0x5e1   :  { %v6677_v62 = vpop.f32.mrf.mxu3 }
 0x5e2   :  { %v6679_v32 = vpop.permute.xlu2 %2939 }
 0x5e6   :  { %v6662_v58 = vpop.permute.xlu1 %2765 }
 0x5e9   :  { %v2632_v2 = vpop.f32.mrf.mxu1 }
 0x5ea   :  { %v2633_v1 = vadd.f32 %v2632_v2, %v2565_v7 }
 0x5ef   :  { %v6667_v26 = vpop.permute.xlu1 %2666 }
 0x5f1   :  { %v2635_v9 = vpop.f32.mrf.mxu1 }
 0x5f2   :  { %v2636_v45 = vadd.f32 %v2635_v9, %v2569_v54 }
 0x5f4   :  { %v2827_v12 = vadd.f32 %v2636_v45, %v2633_v1 }
 0x5f8   :  { %v6675_v36 = vpop.permute.xlu1 %2900 }
 0x5f9   :  { %v2638_v0 = vpop.f32.mrf.mxu1 }
 0x5fa   :  { %v2639_v16 = vadd.f32 %v2638_v0, %v2573_v3 }
 0x5fc   :  { %v2828_v6 = vadd.f32 %v2827_v12, %v2639_v16 }
 0x601   :  { %v2641_v34 = vpop.f32.mrf.mxu1  ;;  %v6694_v13 = vpop.permute.xlu1 %2757 }
 0x602   :  { %v2642_v37 = vadd.f32 %v2641_v34, %v2577_v55  ;;  %v6700_v55 = vpop.permute.xlu0 %2943 }
 0x604   :  { %v2829_v56 = vadd.f32 %v2828_v6, %v2642_v37 }
 0x609   :  { %v2644_v47 = vpop.f32.mrf.mxu1 }
 0x60a   :  { %v2645_v51 = vadd.f32 %v2644_v47, %v2581_v57  ;;  %v6702_v57 = vpop.f32.mrf.mxu3  ;;  %v2725_v47 = vpop.f32.mrf.mxu2 }
 0x60c   :  { %v2830_v44 = vadd.f32 %v2829_v56, %v2645_v51  ;;  %v2679_v56 = vpop.permute.xlu0 %2678 }
 0x611   :  { %v2647_v5 = vpop.f32.mrf.mxu1 }
 0x612   :  { %v2648_v52 = vadd.f32 %v2647_v5, %v2585_v27  ;;  %v6706_v27 = vpop.permute.xlu2 %2896 }
 0x614   :  { %v2831_v11 = vadd.f32 %v2830_v44, %v2648_v52 }
 0x619   :  { %v2650_v15 = vpop.f32.mrf.mxu1 }
 0x61a   :  { %v2651_v25 = vadd.f32 %v2650_v15, %v2589_v19  ;;  %v2659_v44 = vpop.permute.xlu2 %2658 }
 0x61c   :  { %v2832_v22 = vsel %vm7698_vm4, %v2651_v25, 0.0 }
 0x61d   :  { %v2833_v33 = vadd.f32 %v2832_v22, %v2831_v11 }
 0x61f   :  { %v2834_v39 = vrot.slane %v2833_v33, 4 }
 0x621   :  { %v2835_v42 = vadd.f32 %v2834_v39, %v2833_v33 }
 0x623   :  { %v2836_v60 = vrot.slane %v2835_v42, 2 }
 0x625   :  { %v2837_v18 = vadd.f32 %v2836_v60, %v2835_v42  ;;  %v2671_v60 = vpop.permute.xlu0 %2670 }
 0x627   :  { %v2838_v63 = vrot.slane %v2837_v18, 1 }
 0x629   :  { %v2839_v50 = vadd.f32 %v2838_v63, %v2837_v18 }
 0x62b   :  { %v2840_v17 = vmul.f32 %v2839_v50, %v7667_v41  ;;  %v2932_v50 = vpop.permute.xlu2 %2931 }
 0x62d   :  { %v6682_v40 = vsub.f32 %v2633_v1, %v2840_v17  ;;  %v6684_v61 = vsub.f32 %v2636_v45, %v2840_v17  ;;  %v6686_v53 = vsub.f32 %v2639_v16, %v2840_v17  ;;  %v6688_v59 = vsub.f32 %v2642_v37, %v2840_v17 }
 0x62e   :  { %v6696_v7 = vsub.f32 %v2645_v51, %v2840_v17  ;;  %v6704_v9 = vsub.f32 %v2651_v25, %v2840_v17  ;;  %v6708_v19 = vsub.f32 %v2648_v52, %v2840_v17  ;;  %v6719_v51 = vpop.permute.xlu1 %2935  ;;  %v6721_v52 = vpop.f32.mrf.mxu3 }
 0x62f   :  { %v2848_v28 = vmul.f32 %v6682_v40, %v6682_v40  ;;  %v2849_v29 = vmul.f32 %v6684_v61, %v6684_v61  ;;  %v2850_v54 = vmul.f32 %v6686_v53, %v6686_v53  ;;  %v2851_v0 = vmul.f32 %v6688_v59, %v6688_v59  ;;  %v2728_v25 = vpop.f32.mrf.mxu2 }
 0x630   :  { %v2852_v3 = vmul.f32 %v6696_v7, %v6696_v7  ;;  %v2854_v1 = vmul.f32 %v6704_v9, %v6704_v9  ;;  %v2853_v16 = vmul.f32 %v6708_v19, %v6708_v19 }
 0x631   :  { %v2855_v2 = vadd.f32 %v2849_v29, %v2848_v28 }
 0x632   :  { %v2860_v37 = vsel %vm7699_vm6, %v2854_v1, 0.0 }
 0x633   :  { %v2856_v34 = vadd.f32 %v2855_v2, %v2850_v54  ;;  %v2663_v2 = vpop.permute.xlu0 %2662 }
 0x635   :  { %v2857_v45 = vadd.f32 %v2856_v34, %v2851_v0  ;;  %v2750_v34 = vpop.permute.xlu2 %2749 }
 0x636   :  { %v2893_v42 = vpop.permute.xlu1 %2892  ;;  %v2818_v18 = vpop.f32.mrf.mxu3 }
 0x637   :  { %v2858_v5 = vadd.f32 %v2857_v45, %v2852_v3  ;;  %v2731_v17 = vpop.f32.mrf.mxu2 }
 0x639   :  { %v2859_v12 = vadd.f32 %v2858_v5, %v2853_v16  ;;  %v2729_v5 = vadd.f32 %v2728_v25, %v6667_v26  ;;  %v2732_v26 = vadd.f32 %v2731_v17, %v2671_v60 }
 0x63b   :  { %v2861_v6 = vadd.f32 %v2860_v37, %v2859_v12  ;;  %v2723_v12 = vadd.f32 %v2722_v10, %v2659_v44  ;;  %v2754_v37 = vpop.permute.xlu0 %2753  ;;  %v2819_v10 = vadd.f32 %v2818_v18, %v6694_v13 }
 0x63d   :  { %v2862_v15 = vrot.slane %v2861_v6, 4  ;;  %v2746_v48 = vpop.permute.xlu2 %2745 }
 0x63e   :  { %v2655_v54 = vpop.permute.xlu1 %2654  ;;  %v2821_v0 = vpop.f32.mrf.mxu3 }
 0x63f   :  { %v2863_v11 = vadd.f32 %v2862_v15, %v2861_v6  ;;  %v2734_v45 = vpop.f32.mrf.mxu2 }
 0x640   :  { %v2735_v15 = vadd.f32 %v2734_v45, %v6656_v23  ;;  %v2822_v23 = vadd.f32 %v2821_v0, %v6671_v49 }
 0x641   :  { %v2864_v22 = vrot.slane %v2863_v11, 2 }
 0x642   :  { %v2962_v35 = vadd.f32 1.0, %v2735_v15 }
 0x643   :  { %v2865_v33 = vadd.f32 %v2864_v22, %v2863_v11  ;;  %v2720_v22 = vadd.f32 %v6673_v14, %v2655_v54  ;;  %v2813_v54 = vadd.f32 %v6702_v57, %v2750_v34  ;;  %v2889_v13 = vpop.permute.xlu0 %2888 }
 0x645   :  { %v2866_v39 = vrot.slane %v2865_v33, 1  ;;  %v2957_v14 = vadd.f32 1.0, %v2720_v22 }
 0x646   :  { %v2928_v6 = vpop.permute.xlu1 %2927 }
 0x647   :  { %v2867_v63 = vadd.f32 %v2866_v39, %v2865_v33  ;;  %v2824_v39 = vpop.f32.mrf.mxu3  ;;  %v2737_v4 = vpop.f32.mrf.mxu2 }
 0x648   :  { %v2825_v44 = vadd.f32 %v2824_v39, %v6662_v58  ;;  %v2961_v58 = vadd.f32 1.0, %v2732_v26 }
 0x649   :  { %v2868_v28 = vmul.f32 %v2867_v63, %v7667_v41  ;;  %v2726_v63 = vadd.f32 %v2725_v47, %v2663_v2  ;;  %v2958_v41 = vadd.f32 1.0, %v2723_v12  ;;  %v2738_v2 = vadd.f32 %v2737_v4, %v2679_v56  ;;  %v2742_v12 = vpop.permute.xlu2 %2741 }
 0x64b   :  { %v2869_v29 = vadd.f32 1e-05, %v2868_v28  ;;  %v2960_v28 = vadd.f32 1.0, %v2729_v5  ;;  %v2959_v47 = vadd.f32 1.0, %v2726_v63  ;;  %v2963_v0 = vadd.f32 1.0, %v2738_v2 }
 0x64d   :  { %4768 = vrsqrt.f32 %v2869_v29  ;;  %vm2876_vm5 = vweird.f32 %v2869_v29 }
 0x653   :  { %v4769_v3 = vpop.eup %4768 }
 0x654   :  { %v2871_v1 = vmul.f32 %v4769_v3, %v2869_v29  ;;  %vm2877_vm9 = vweird.f32 %v4769_v3 }
 0x655   :  { %vm2878_vm14 = vmor %vm2876_vm5, %vm2877_vm9 }
 0x656   :  { %v2872_v16 = vmul.f32 %v4769_v3, %v2871_v1 }
 0x658   :  { %v2873_v11 = vmul.f32 0.5, %v2872_v16 }
 0x65a   :  { %v2874_v33 = vsub.f32 1.5, %v2873_v11 }
 0x65c   :  { %v2875_v1 = vmul.f32 %v4769_v3, %v2874_v33 }
 0x65e   :  { %v2879_v25 = vsel %vm2878_vm14, %v4769_v3, %v2875_v1 }
 0x65f   :  { %v2886_v45 = vmul.f32 %v2879_v25, %v6704_v9  ;;  %v2882_v16 = vmul.f32 %v2879_v25, %v6686_v53  ;;  %v2883_v29 = vmul.f32 %v2879_v25, %v6688_v59  ;;  %v2881_v60 = vmul.f32 %v2879_v25, %v6684_v61  ;;  %v2924_v53 = vpop.permute.xlu1 %2923 }
 0x660   :  { %v2885_v18 = vmul.f32 %v2879_v25, %v6708_v19  ;;  %v2884_v49 = vmul.f32 %v2879_v25, %v6696_v7  ;;  %v2880_v17 = vmul.f32 %v2879_v25, %v6682_v40 }
 0x661   :  { %v2921_v57 = vmul.f32 %v6654_v24, %v2886_v45  ;;  %v2917_v4 = vmul.f32 %v6706_v27, %v2882_v16  ;;  %v2918_v9 = vmul.f32 %v6675_v36, %v2883_v29  ;;  %v2916_v56 = vmul.f32 %v2893_v42, %v2881_v60 }
 0x662   :  { %v2920_v59 = vmul.f32 %v6658_v31, %v2885_v18  ;;  %v2919_v61 = vmul.f32 %v6664_v38, %v2884_v49  ;;  %v2915_v34 = vmul.f32 %v2889_v13, %v2880_v17  ;;  %v2816_v36 = vadd.f32 %v6721_v52, %v2754_v37 }
 0x663   :  { %v2952_v19 = vadd.f32 %v2932_v50, %v2917_v4  ;;  %v2953_v7 = vadd.f32 %v6719_v51, %v2918_v9  ;;  %v2956_v3 = vadd.f32 %v6660_v46, %v2921_v57  ;;  %v2951_v40 = vadd.f32 %v2928_v6, %v2916_v56 }
 0x664   :  { %v2955_v24 = vadd.f32 %v6700_v55, %v2920_v59  ;;  %v2954_v27 = vadd.f32 %v6679_v32, %v2919_v61  ;;  %v2950_v42 = vadd.f32 %v2924_v53, %v2915_v34  ;;  %v2810_v50 = vadd.f32 %v6677_v62, %v2746_v48 }
 0x665   :  { %v2967_v5 = vmul.f32 %v2960_v28, %v2953_v7  ;;  %v2966_v31 = vmul.f32 %v2959_v47, %v2952_v19  ;;  %v2970_v15 = vmul.f32 %v2963_v0, %v2956_v3  ;;  %v2965_v38 = vmul.f32 %v2958_v41, %v2951_v40 }
 0x666   :  { %v2969_v11 = vmul.f32 %v2962_v35, %v2955_v24  ;;  %v2968_v22 = vmul.f32 %v2961_v58, %v2954_v27  ;;  %v2964_v51 = vmul.f32 %v2957_v14, %v2950_v42  ;;  %v2807_v52 = vadd.f32 %v6669_v30, %v2742_v12 }
 0x667   :  { %v6749_v33 = vadd.f32 %v2966_v31, %v2813_v54  ;;  %v6751_v46 = vadd.f32 %v2970_v15, %v2825_v44  ;;  %v6753_v55 = vadd.f32 %v2967_v5, %v2816_v36  ;;  %v6760_v6 = vadd.f32 %v2965_v38, %v2810_v50 }
 0x668   :  { %v6755_v32 = vadd.f32 %v2969_v11, %v2822_v23  ;;  %v6758_v37 = vadd.f32 %v2968_v22, %v2819_v10  ;;  %v6766_v39 = vadd.f32 %v2964_v51, %v2807_v52 }
 0x669   :  { %v4356_v35 = vmul.f32 -1.442695, %v6749_v33  ;;  %v4360_v62 = vmul.f32 -1.442695, %v6751_v46  ;;  %v4357_v63 = vmul.f32 -1.442695, %v6753_v55 }
 0x66a   :  { %v4359_v48 = vmul.f32 -1.442695, %v6755_v32  ;;  %v4358_v41 = vmul.f32 -1.442695, %v6758_v37  ;;  %v4355_v30 = vmul.f32 -1.442695, %v6760_v6 }
 0x66b   :  { %4770 = vpow2.f32 %v4356_v35  ;;  %v4354_v28 = vmul.f32 -1.442695, %v6766_v39 }
 0x66c   :  { %4772 = vpow2.f32 %v4359_v48 }
 0x66d   :  { %4774 = vpow2.f32 %v4358_v41  ;;  %v6937_v41 = vld [vmem:[#allocation7 + $0x18] sm:$0xff] }
 0x66e   :  { %4776 = vpow2.f32 %v4360_v62 }
 0x66f   :  { %4778 = vpow2.f32 %v4357_v63 }
 0x670   :  { %4780 = vpow2.f32 %v4355_v30 }
 0x671   :  { %v4771_v1 = vpop.eup %4770  ;;  %4782 = vpow2.f32 %v4354_v28 }
 0x672   :  { %v4773_v26 = vpop.eup %4772  ;;  %v6771_v10 = vadd.f32 1.0, %v4771_v1 }
 0x673   :  { %v4775_v23 = vpop.eup %4774  ;;  %v3004_v44 = vadd.f32 1.0, %v4773_v26 }
 0x674   :  { %v4777_v14 = vpop.eup %4776  ;;  %v6773_v25 = vadd.f32 1.0, %v4775_v23  ;;  %4784 = vrcp.f32 %v6771_v10  ;;  %v3045_v9 = vand.u32 2147483647, %v6771_v10  ;;  %vm3041_vm8 = vweird.f32 %v6771_v10  ;;  %v2291_v23 = vld [vmem:[#allocation5 + $0x2c8] sm:$0xff] }
 0x675   :  { %v4779_v54 = vpop.eup %4778  ;;  %4786 = vrcp.f32 %v3004_v44  ;;  %v6776_v47 = vadd.f32 1.0, %v4777_v14  ;;  %v3092_v13 = vand.u32 2147483648, %v3004_v44  ;;  %v3090_v58 = vand.u32 2147483647, %v3004_v44 }
 0x676   :  { %v4781_v2 = vpop.eup %4780  ;;  %4788 = vrcp.f32 %v6773_v25  ;;  %v6779_v45 = vadd.f32 1.0, %v4779_v54  ;;  %vm3086_vm1 = vweird.f32 %v3004_v44  ;;  %vm3071_vm2 = vweird.f32 %v6773_v25 }
 0x677   :  { %4790 = vrcp.f32 %v6776_v47  ;;  %v4783_v16 = vpop.eup %4782  ;;  %v6783_v29 = vadd.f32 1.0, %v4781_v2  ;;  %v3107_v60 = vand.u32 2147483648, %v6776_v47  ;;  %v3105_v49 = vand.u32 2147483647, %v6776_v47 }
 0x678   :  { %4792 = vrcp.f32 %v6779_v45  ;;  %v6790_v57 = vadd.f32 1.0, %v4783_v16  ;;  %vm3101_vm7 = vweird.f32 %v6776_v47  ;;  %v3093_v0 = vor.u32 1.1754944e-38, %v3092_v13 }
 0x679   :  { %4794 = vrcp.f32 %v6783_v29  ;;  %v3108_v61 = vor.u32 1.1754944e-38, %v3107_v60  ;;  %vm6804_vm13 = vcmp.eq.f32.partialorder %v3105_v49, 8.507059e+37  ;;  %vm6808_vm3 = vcmp.eq.f32.partialorder %v3090_v58, 8.507059e+37 }
 0x67a   :  { %v6786_v18 = vpop.eup %4784  ;;  %v3075_v36 = vand.u32 2147483647, %v6773_v25  ;;  %v3077_v42 = vand.u32 2147483648, %v6773_v25  ;;  %4796 = vrcp.f32 %v6790_v57  ;;  %vm3056_vm12 = vweird.f32 %v6779_v45 }
 0x67b   :  { %v4787_v17 = vpop.eup %4786  ;;  %v3037_v4 = vmul.f32 %v6786_v18, %v6771_v10  ;;  %v3060_v48 = vand.u32 2147483647, %v6779_v45  ;;  %v3062_v30 = vand.u32 2147483648, %v6779_v45  ;;  %v3047_v13 = vand.u32 2147483648, %v6771_v10 }
 0x67c   :  { %v6795_v56 = vpop.eup %4788  ;;  %v3082_v53 = vmul.f32 %v4787_v17, %v3004_v44  ;;  %vm3087_vm11 = vweird.f32 %v4787_v17  ;;  %vm6845_vm9 = vcmp.eq.f32.partialorder %v3075_v36, 8.507059e+37  ;;  %v3078_v54 = vor.u32 1.1754944e-38, %v3077_v42  ;;  %v2292_v44 = vld [vmem:[#allocation5 + $0x2d0] sm:$0x3] }
 0x67d   :  { %v4791_v59 = vpop.eup %4790  ;;  %v3067_v34 = vmul.f32 %v6795_v56, %v6773_v25  ;;  %v3038_v19 = vsub.f32 1.0, %v3037_v4  ;;  %vm3072_vm15 = vweird.f32 %v6795_v56  ;;  %vm6828_vm4 = vmor %vm3086_vm1, %vm3087_vm11  ;;  %vm3042_vm1 = vweird.f32 %v6786_v18 }
 0x67e   :  { %v6801_v7 = vpop.eup %4792  ;;  %v3097_v3 = vmul.f32 %v4791_v59, %v6776_v47  ;;  %v3083_v24 = vsub.f32 1.0, %v3082_v53  ;;  %vm3102_vm10 = vweird.f32 %v4791_v59  ;;  %vm6841_vm6 = vmor %vm3071_vm2, %vm3072_vm15  ;;  %vm6872_vm2 = vcmp.eq.f32.partialorder %v3060_v48, 8.507059e+37  ;;  %v2286_v48 = vld [vmem:[#allocation5 + $0x2a0] sm:$0xff] }
 0x67f   :  { %v3068_v5 = vsub.f32 1.0, %v3067_v34  ;;  %v3052_v12 = vmul.f32 %v6801_v7, %v6779_v45  ;;  %v6819_v31 = vpop.eup %4794  ;;  %v3039_v22 = vmul.f32 %v6786_v18, %v3038_v19  ;;  %vm3057_vm5 = vweird.f32 %v6801_v7  ;;  %vm3103_vm14 = vmor %vm3101_vm7, %vm3102_vm10 }
 0x680   :  { %v3098_v15 = vsub.f32 1.0, %v3097_v3  ;;  %v3084_v38 = vmul.f32 %v4787_v17, %v3083_v24  ;;  %v3022_v51 = vmul.f32 %v6819_v31, %v6783_v29  ;;  %v6850_v14 = vpop.eup %4796  ;;  %vm6868_vm7 = vmor %vm3056_vm12, %vm3057_vm5  ;;  %v3032_v34 = vand.u32 2147483648, %v6783_v29 }
 0x681   :  { %v3069_v11 = vmul.f32 %v6795_v56, %v3068_v5  ;;  %v3053_v50 = vsub.f32 1.0, %v3052_v12  ;;  %v3040_v25 = vadd.f32 %v6786_v18, %v3039_v22  ;;  %v3007_v19 = vmul.f32 %v6850_v14, %v6790_v57 }
 0x682   :  { %v3099_v52 = vmul.f32 %v4791_v59, %v3098_v15  ;;  %v3085_v35 = vadd.f32 %v4787_v17, %v3084_v38  ;;  %v3023_v28 = vsub.f32 1.0, %v3022_v51  ;;  %vm7716_vm12 = vcmask 1041408   ;;  %v6916_v15 = vld [vmem:[#allocation7] sm:$0xff]  ;;  %v6928_v51 = vld [vmem:[#allocation7 + $0x10] sm:$0xff] }
 0x683   :  { %v3070_v62 = vadd.f32 %v6795_v56, %v3069_v11  ;;  %v3054_v63 = vmul.f32 %v6801_v7, %v3053_v50  ;;  %v3048_v3 = vor.u32 1.1754944e-38, %v3047_v13  ;;  %v3030_v40 = vand.u32 2147483647, %v6783_v29 }
 0x684   :  { %v3100_v1 = vadd.f32 %v4791_v59, %v3099_v52  ;;  %v3089_v26 = vsel %vm6828_vm4, %v4787_v17, %v3085_v35  ;;  %v3024_v49 = vmul.f32 %v6819_v31, %v3023_v28  ;;  %vm3046_vm11 = vcmp.eq.f32.partialorder %v3045_v9, 8.507059e+37 }
 0x685   :  { %v3055_v2 = vadd.f32 %v6801_v7, %v3054_v63  ;;  %v3074_v60 = vsel %vm6841_vm6, %v6795_v56, %v3070_v62  ;;  %v3094_v58 = vsel %vm6808_vm3, %v3093_v0, %v3089_v26  ;;  %v3063_v56 = vor.u32 1.1754944e-38, %v3062_v30  ;;  %v6941_v62 = vld [vmem:[#allocation7 + $0x20] sm:$0xff]  ;;  %v6944_v63 = vld [vmem:[#allocation7 + $0x30] sm:$0x3] }
 0x686   :  { %v3104_v16 = vsel %vm3103_vm14, %v4791_v59, %v3100_v1  ;;  %v3025_v45 = vadd.f32 %v6819_v31, %v3024_v49  ;;  %vm3027_vm3 = vweird.f32 %v6819_v31  ;;  %v3079_v0 = vsel %vm6845_vm9, %v3078_v54, %v3074_v60  ;;  %v2289_v1 = vld [vmem:[#allocation5 + $0x2b8] sm:$0xff]  ;;  %v2290_v26 = vld [vmem:[#allocation5 + $0x2c0] sm:$0xff]  ;;  %vm7725_vm14 = vmmov %vm7716_vm12 }
 0x687   :  { %v3109_v47 = vsel %vm6804_vm13, %v3108_v61, %v3104_v16  ;;  %v3059_v59 = vsel %vm6868_vm7, %v6801_v7, %v3055_v2  ;;  %vm6882_vm13 = vmor %vm3041_vm8, %vm3042_vm1  ;;  %v3116_v7 = vmul.f32 %v3094_v58, %v6755_v32  ;;  %vm3026_vm8 = vweird.f32 %v6783_v29 }
 0x688   :  { %v3117_v53 = vmul.f32 %v3109_v47, %v6751_v46  ;;  %v3044_v46 = vsel %vm6882_vm13, %v6786_v18, %v3040_v25  ;;  %v3064_v24 = vsel %vm6872_vm2, %v3063_v56, %v3059_v59  ;;  %vm6904_vm15 = vmor %vm3026_vm8, %vm3027_vm3  ;;  %v3008_v27 = vsub.f32 1.0, %v3007_v19 }
 0x689   :  { %v3115_v36 = vmul.f32 %v3079_v0, %v6758_v37  ;;  %v3049_v32 = vsel %vm3046_vm11, %v3048_v3, %v3044_v46  ;;  %v3029_v42 = vsel %vm6904_vm15, %v6819_v31, %v3025_v45  ;;  %v3017_v29 = vand.u32 2147483648, %v6790_v57  ;;  %v6920_v31 = vld [vmem:[#allocation7 + $0x8] sm:$0xff]  ;;  %vm7727_vm1 = vmmov %vm7716_vm12 }
 0x68a   :  { %4361 = vmatpush.msk.msrb.mxu0 %vm7716_vm12, %v3117_v53  ;;  %v5034_v5 = vmov 26   ;;  %v3033_v12 = vor.u32 1.1754944e-38, %v3032_v34  ;;  %v3009_v10 = vmul.f32 %v6850_v14, %v3008_v27  ;;  %vm3012_vm10 = vweird.f32 %v6850_v14  ;;  %v7723_v27 = vld [vmem:[#allocation16_spill] sm:$0xff] }
 0x68b   :  { %4587 = vset.pattern.permute.xlu0 %v5034_v5  ;;  %v3015_v9 = vand.u32 2147483647, %v6790_v57  ;;  %4588 = vset.pattern.permute.xlu1 %v5034_v5  ;;  %v3114_v37 = vmul.f32 %v3064_v24, %v6753_v55  ;;  %vm3031_vm4 = vcmp.eq.f32.partialorder %v3030_v40, 8.507059e+37  ;;  %vm3011_vm6 = vweird.f32 %v6790_v57  ;;  %v7722_v40 = vld [vmem:[#allocation15_spill] sm:$0xff] }
 0x68c   :  { %3180 = vmatpush.msrb.mxu0 %v3116_v7  ;;  %3119 = vperm.xlu0 %4587, %v6916_v15   ;;  %v3034_v38 = vsel %vm3031_vm4, %v3033_v12, %v3029_v42  ;;  %v3010_v11 = vadd.f32 %v6850_v14, %v3009_v10  ;;  %v3113_v50 = vmul.f32 %v3049_v32, %v6749_v33  ;;  %vm3013_vm9 = vmor %vm3011_vm6, %vm3012_vm10  ;;  %v3018_v22 = vor.u32 1.1754944e-38, %v3017_v29  ;;  %v6934_v33 = vld [vmem:[#allocation7 + $0x28] sm:$0xff] }
 0x68d   :  { %3123 = vperm.xlu1 %4588, %v6920_v31   ;;  %4589 = vset.pattern.permute.xlu2 %v5034_v5  ;;  %vm3016_vm5 = vcmp.eq.f32.partialorder %v3015_v9, 8.507059e+37  ;;  %v3112_v52 = vmul.f32 %v3034_v38, %v6760_v6  ;;  %v2287_v6 = vld [vmem:[#allocation5 + $0x2a8] sm:$0xff]  ;;  %v5035_v30 = vmov 28   ;;  %v5036_v28 = vmov 27  }
 0x68e   :  { %3181 = vmatpush.msrb.mxu0 %v3115_v36  ;;  %3127 = vperm.xlu2 %4589, %v6928_v51   ;;  %v3014_v55 = vsel %vm3013_vm9, %v6850_v14, %v3010_v11  ;;  %v7724_v29 = vld [vmem:[#allocation17_spill] sm:$0xff]  ;;  %vm7728_vm3 = vcmask 80896  }
 0x68f   :  { %v3019_v35 = vsel %vm3016_vm5, %v3018_v22, %v3014_v55  ;;  %v7726_v55 = vld [vmem:[#allocation14_spill] sm:$0xff]  ;;  %vm7733_vm5 = vmmov %vm7728_vm3 }
 0x690   :  { %3182 = vmatpush.msrb.mxu0 %v3114_v37  ;;  %v3111_v57 = vmul.f32 %v3019_v35, %v6766_v39  ;;  %v2288_v39 = vld [vmem:[#allocation5 + $0x2b0] sm:$0xff] }
 0x692   :  { %3183 = vmatpush.msrb.mxu0 %v3113_v50 }
 0x694   :  { %3184 = vmatpush.msrb.mxu0 %v3112_v52  ;;  %3139 = vperm.xlu0 %4587, %v6934_v33  }
 0x695   :  { %3131 = vperm.xlu1 %4588, %v6937_v41  }
 0x696   :  { %3185 = vmatpush.msrb.mxu0 %v3111_v57  ;;  %3135 = vperm.xlu2 %4589, %v6941_v62  }
 0x697   :  { %4362 = vmatmul.msk.f32.vlgmr.msrb.gmra.mxu0 %vm1155_vm0, %v2286_v48 }
 0x69c   :  { %4591 = vset.pattern.permute.xlu0 %v5036_v28 }
 0x69d   :  { %3143 = vperm.xlu1 %4588, %v6944_v63   ;;  %3324 = vperm.xlu0 %4591, %v6934_v33  }
 0x69e   :  { %4590 = vset.pattern.permute.xlu2 %v5036_v28 }
 0x69f   :  { %4363 = vmatmul.msk.f32.gmra.mxu0 %vm1155_vm0, %v2287_v6  ;;  %3328 = vperm.xlu2 %4590, %v6944_v63  }
 0x6a5   :  { %4592 = vset.pattern.permute.xlu1 %v5035_v30  ;;  %4593 = vset.pattern.permute.xlu0 %v5035_v30 }
 0x6a6   :  { %3363 = vperm.xlu1 %4592, %v6944_v63   ;;  %3355 = vperm.xlu0 %4593, %v6941_v62  }
 0x6a7   :  { %4364 = vmatmul.msk.f32.gmra.mxu0 %vm1155_vm0, %v2288_v39  ;;  %3320 = vperm.xlu2 %4590, %v6941_v62  }
 0x6ae   :  { %3359 = vperm.xlu1 %4592, %v6934_v33   ;;  %4596 = vset.pattern.permute.xlu0 %v5036_v28 }
 0x6af   :  { %4365 = vmatmul.msk.f32.gmra.mxu0 %vm1155_vm0, %v2289_v1  ;;  %3316 = vperm.xlu2 %4590, %v6937_v41  }
 0x6b0   :  { %3304 = vperm.xlu0 %4596, %v6916_v15  }
 0x6b6   :  { %4594 = vset.pattern.permute.xlu1 %v5036_v28 }
 0x6b7   :  { %4366 = vmatmul.msk.f32.gmra.mxu0 %vm1155_vm0, %v2290_v26  ;;  %3312 = vperm.xlu1 %4594, %v6928_v51  }
 0x6b8   :  { %4595 = vset.pattern.permute.xlu2 %v5035_v30 }
 0x6b9   :  { %3351 = vperm.xlu2 %4595, %v6937_v41  }
 0x6bf   :  { %4367 = vmatmul.msk.f32.gmra.mxu0 %vm1155_vm0, %v2291_v23  ;;  %3308 = vperm.xlu1 %4594, %v6920_v31  }
 0x6c1   :  { %3347 = vperm.xlu2 %4595, %v6928_v51  }
 0x6c7   :  { %4368 = vmatmul.msk.f32.gmra.mxu0 %vm1155_vm0, %v2292_v44  ;;  %4597 = vset.pattern.permute.xlu1 %v5035_v30 }
 0x6c8   :  { %3343 = vperm.xlu1 %4597, %v6920_v31  }
 0x6c9   :  { %3339 = vperm.xlu2 %4595, %v6916_v15  }
 0x6e8   :  { %v3128_v60 = vpop.permute.xlu2 %3127 }
 0x6f0   :  { %v3136_v56 = vpop.permute.xlu2 %3135 }
 0x6f9   :  { %v3329_v28 = vpop.permute.xlu2 %3328 }
 0x6fe   :  { %v3120_v49 = vpop.permute.xlu0 %3119 }
 0x6ff   :  { %v3124_v16 = vpop.permute.xlu1 %3123 }
 0x706   :  { %v3140_v45 = vpop.permute.xlu0 %3139 }
 0x707   :  { %v3132_v58 = vpop.permute.xlu1 %3131 }
 0x714   :  { %v3187_v14 = vpop.f32.mrf.mxu0 }
 0x715   :  { %v3188_v17 = vadd.f32 %v3187_v14, %v3120_v49 }
 0x717   :  { %v6971_v0 = vadd.f32 %v3188_v17, %v6344_v21  ;;  %v3144_v21 = vpop.permute.xlu1 %3143 }
 0x719   :  { %7720 = vst [vmem:[#allocation19_spill] sm:$0xff] %v6971_v0 }
 0x71c   :  { %v3190_v54 = vpop.f32.mrf.mxu0 }
 0x71d   :  { %v3191_v47 = vadd.f32 %v3190_v54, %v3124_v16 }
 0x71f   :  { %v6968_v53 = vadd.f32 %v3191_v47, %v6341_v8  ;;  %v3364_v17 = vpop.permute.xlu1 %3363 }
 0x721   :  { %7719 = vst [vmem:[#allocation18_spill] sm:$0xff] %v6968_v53  ;;  %v3243_v19 = vadd.f32 %v6968_v53, %v6971_v0 }
 0x724   :  { %v3193_v2 = vpop.f32.mrf.mxu0 }
 0x725   :  { %v3194_v4 = vadd.f32 %v3193_v2, %v3128_v60 }
 0x727   :  { %v6974_v46 = vadd.f32 %v3194_v4, %v6347_v43 }
 0x729   :  { %7721 = vst [vmem:[#allocation20_spill] sm:$0xff] %v6974_v46  ;;  %v3244_v8 = vadd.f32 %v3243_v19, %v6974_v46  ;;  %v3360_v19 = vpop.permute.xlu1 %3359 }
 0x72c   :  { %v3196_v25 = vpop.f32.mrf.mxu0 }
 0x72d   :  { %v3197_v59 = vadd.f32 %v3196_v25, %v3132_v58 }
 0x72f   :  { %v6979_v7 = vadd.f32 %v3197_v59, %v6352_v20 }
 0x731   :  { %v3245_v18 = vadd.f32 %v3244_v8, %v6979_v7 }
 0x734   :  { %v3199_v13 = vpop.f32.mrf.mxu0 }
 0x735   :  { %v3200_v34 = vadd.f32 %v3199_v13, %v3136_v56  ;;  %v3321_v56 = vpop.permute.xlu2 %3320 }
 0x737   :  { %v6983_v24 = vadd.f32 %v3200_v34, %v7722_v40 }
 0x739   :  { %v3246_v42 = vadd.f32 %v3245_v18, %v6983_v24 }
 0x73c   :  { %v3202_v61 = vpop.f32.mrf.mxu0 }
 0x73d   :  { %v3203_v3 = vadd.f32 %v3202_v61, %v3140_v45  ;;  %v3317_v8 = vpop.permute.xlu2 %3316 }
 0x73f   :  { %v6987_v36 = vadd.f32 %v3203_v3, %v7723_v27  ;;  %v3325_v27 = vpop.permute.xlu0 %3324 }
 0x741   :  { %v3247_v20 = vadd.f32 %v3246_v42, %v6987_v36 }
 0x744   :  { %v3205_v43 = vpop.f32.mrf.mxu0 }
 0x745   :  { %v3206_v32 = vadd.f32 %v3205_v43, %v3144_v21  ;;  %v3313_v43 = vpop.permute.xlu1 %3312 }
 0x747   :  { %v6991_v5 = vadd.f32 %v3206_v32, %v7724_v29  ;;  %v3352_v32 = vpop.permute.xlu2 %3351 }
 0x749   :  { %v3248_v12 = vsel %vm7725_vm14, %v6991_v5, 0.0 }
 0x74a   :  { %v3249_v10 = vadd.f32 %v3248_v12, %v3247_v20  ;;  %v3356_v20 = vpop.permute.xlu0 %3355 }
 0x74c   :  { %v3250_v9 = vrot.slane %v3249_v10, 4 }
 0x74e   :  { %v3251_v37 = vadd.f32 %v3250_v9, %v3249_v10  ;;  %v3309_v9 = vpop.permute.xlu1 %3308 }
 0x750   :  { %v3252_v38 = vrot.slane %v3251_v37, 2 }
 0x752   :  { %v3253_v11 = vadd.f32 %v3252_v38, %v3251_v37  ;;  %v3348_v37 = vpop.permute.xlu2 %3347 }
 0x754   :  { %v3254_v50 = vrot.slane %v3253_v11, 1 }
 0x756   :  { %v3255_v22 = vadd.f32 %v3254_v50, %v3253_v11 }
 0x758   :  { %v3256_v52 = vmul.f32 %v3255_v22, %v7726_v55 }
 0x75a   :  { %v3257_v35 = vsub.f32 %v6971_v0, %v3256_v52  ;;  %v3258_v57 = vsub.f32 %v6968_v53, %v3256_v52  ;;  %v3259_v48 = vsub.f32 %v6974_v46, %v3256_v52  ;;  %v3260_v6 = vsub.f32 %v6979_v7, %v3256_v52 }
 0x75b   :  { %v3261_v1 = vsub.f32 %v6983_v24, %v3256_v52  ;;  %v3263_v44 = vsub.f32 %v6991_v5, %v3256_v52  ;;  %v3262_v14 = vsub.f32 %v6987_v36, %v3256_v52 }
 0x75c   :  { %v3264_v39 = vmul.f32 %v3257_v35, %v3257_v35  ;;  %v3265_v30 = vmul.f32 %v3258_v57, %v3258_v57  ;;  %v3266_v26 = vmul.f32 %v3259_v48, %v3259_v48  ;;  %v3267_v54 = vmul.f32 %v3260_v6, %v3260_v6 }
 0x75d   :  { %v3268_v25 = vmul.f32 %v3261_v1, %v3261_v1  ;;  %v3270_v60 = vmul.f32 %v3263_v44, %v3263_v44  ;;  %v3269_v13 = vmul.f32 %v3262_v14, %v3262_v14 }
 0x75e   :  { %v3271_v23 = vadd.f32 %v3265_v30, %v3264_v39 }
 0x75f   :  { %v3276_v58 = vsel %vm7727_vm1, %v3270_v60, 0.0 }
 0x760   :  { %v3272_v2 = vadd.f32 %v3271_v23, %v3266_v26  ;;  %v3305_v26 = vpop.permute.xlu0 %3304 }
 0x762   :  { %v3273_v16 = vadd.f32 %v3272_v2, %v3267_v54 }
 0x764   :  { %v3274_v49 = vadd.f32 %v3273_v16, %v3268_v25 }
 0x766   :  { %v3275_v47 = vadd.f32 %v3274_v49, %v3269_v13 }
 0x768   :  { %v3277_v4 = vadd.f32 %v3276_v58, %v3275_v47 }
 0x76a   :  { %v3278_v59 = vrot.slane %v3277_v4, 4 }
 0x76c   :  { %v3279_v61 = vadd.f32 %v3278_v59, %v3277_v4  ;;  %v3344_v4 = vpop.permute.xlu1 %3343 }
 0x76e   :  { %v3280_v45 = vrot.slane %v3279_v61, 2 }
 0x770   :  { %v3281_v34 = vadd.f32 %v3280_v45, %v3279_v61 }
 0x772   :  { %v3282_v3 = vrot.slane %v3281_v34, 1 }
 0x774   :  { %v3283_v40 = vadd.f32 %v3282_v3, %v3281_v34  ;;  %v5037_v3 = vmov 29  }
 0x775   :  { %4598 = vset.pattern.permute.xlu1 %v5037_v3  ;;  %4599 = vset.pattern.permute.xlu2 %v5037_v3 }
 0x776   :  { %v3284_v18 = vmul.f32 %v3283_v40, %v7726_v55  ;;  %3514 = vperm.xlu1 %4598, %v6916_v15   ;;  %3518 = vperm.xlu2 %4599, %v6920_v31  }
 0x777   :  { %4600 = vset.pattern.permute.xlu0 %v5037_v3 }
 0x778   :  { %v3285_v21 = vadd.f32 1e-05, %v3284_v18  ;;  %3522 = vperm.xlu0 %4600, %v6928_v51  }
 0x77a   :  { %4798 = vrsqrt.f32 %v3285_v21  ;;  %vm3292_vm2 = vweird.f32 %v3285_v21 }
 0x77e   :  { %3526 = vperm.xlu1 %4598, %v6937_v41   ;;  %3530 = vperm.xlu2 %4599, %v6941_v62  }
 0x780   :  { %v4799_v42 = vpop.eup %4798 }
 0x781   :  { %v3287_v29 = vmul.f32 %v4799_v42, %v3285_v21  ;;  %vm3293_vm7 = vweird.f32 %v4799_v42 }
 0x782   :  { %vm3294_vm13 = vmor %vm3292_vm2, %vm3293_vm7 }
 0x783   :  { %v3288_v12 = vmul.f32 %v4799_v42, %v3287_v29  ;;  %vm7736_vm7 = vmmov %vm7728_vm3 }
 0x785   :  { %v3289_v10 = vmul.f32 0.5, %v3288_v12 }
 0x786   :  { %3534 = vperm.xlu1 %4598, %v6934_v33   ;;  %3538 = vperm.xlu2 %4599, %v6944_v63  }
 0x787   :  { %v3290_v38 = vsub.f32 1.5, %v3289_v10 }
 0x789   :  { %v3291_v11 = vmul.f32 %v4799_v42, %v3290_v38 }
 0x78b   :  { %v3295_v50 = vsel %vm3294_vm13, %v4799_v42, %v3291_v11 }
 0x78c   :  { %v3302_v22 = vmul.f32 %v3295_v50, %v3263_v44  ;;  %v3300_v52 = vmul.f32 %v3295_v50, %v3261_v1  ;;  %v3299_v39 = vmul.f32 %v3295_v50, %v3260_v6  ;;  %v3301_v30 = vmul.f32 %v3295_v50, %v3262_v14  ;;  %v3340_v1 = vpop.permute.xlu2 %3339 }
 0x78d   :  { %v3298_v23 = vmul.f32 %v3295_v50, %v3259_v48  ;;  %v3297_v54 = vmul.f32 %v3295_v50, %v3258_v57  ;;  %v3296_v2 = vmul.f32 %v3295_v50, %v3257_v35 }
 0x78e   :  { %v3337_v25 = vmul.f32 %v3329_v28, %v3302_v22  ;;  %v3335_v16 = vmul.f32 %v3321_v56, %v3300_v52  ;;  %v3334_v60 = vmul.f32 %v3317_v8, %v3299_v39  ;;  %v3336_v13 = vmul.f32 %v3325_v27, %v3301_v30 }
 0x78f   :  { %v3333_v49 = vmul.f32 %v3313_v43, %v3298_v23  ;;  %v3332_v47 = vmul.f32 %v3309_v9, %v3297_v54  ;;  %v3331_v58 = vmul.f32 %v3305_v26, %v3296_v2  ;;  %v3222_v9 = vld [vmem:[#allocation5 + $0x310] sm:$0xff] }
 0x790   :  { %v7006_v59 = vadd.f32 %v3364_v17, %v3337_v25  ;;  %v7008_v61 = vadd.f32 %v3352_v32, %v3334_v60  ;;  %v7010_v44 = vadd.f32 %v3360_v19, %v3336_v13  ;;  %v7012_v6 = vadd.f32 %v3356_v20, %v3335_v16  ;;  %4385 = vmatmul.msk.f32.vlgmr.msra.gmra.mxu2 %vm7728_vm3, %v3222_v9 }
 0x791   :  { %v7014_v48 = vadd.f32 %v3348_v37, %v3333_v49  ;;  %v7016_v35 = vadd.f32 %v3340_v1, %v3331_v58  ;;  %v7021_v56 = vadd.f32 %v3344_v4, %v3332_v47 }
 0x792   :  { %v4375_v57 = vmul.f32 -1.442695, %v7006_v59  ;;  %v4372_v28 = vmul.f32 -1.442695, %v7008_v61  ;;  %v4374_v14 = vmul.f32 -1.442695, %v7010_v44 }
 0x793   :  { %v4371_v17 = vmul.f32 -1.442695, %v7014_v48  ;;  %v4373_v45 = vmul.f32 -1.442695, %v7012_v6  ;;  %v4369_v34 = vmul.f32 -1.442695, %v7016_v35 }
 0x794   :  { %4800 = vpow2.f32 %v4375_v57  ;;  %v4370_v19 = vmul.f32 -1.442695, %v7021_v56 }
 0x795   :  { %4802 = vpow2.f32 %v4372_v28 }
 0x796   :  { %4804 = vpow2.f32 %v4374_v14 }
 0x797   :  { %4806 = vpow2.f32 %v4371_v17 }
 0x798   :  { %4808 = vpow2.f32 %v4373_v45 }
 0x799   :  { %4810 = vpow2.f32 %v4369_v34  ;;  %v3229_v34 = vld [vmem:[#allocation5 + $0x348] sm:$0xff] }
 0x79a   :  { %v4801_v8 = vpop.eup %4800  ;;  %4812 = vpow2.f32 %v4370_v19  ;;  %v3223_v19 = vld [vmem:[#allocation5 + $0x318] sm:$0xff]  ;;  %4393 = vmatmul.msk.f32.vlgmr.msra.gmra.mxu3 %vm7733_vm5, %v3229_v34 }
 0x79b   :  { %v4803_v40 = vpop.eup %4802  ;;  %v7029_v18 = vadd.f32 1.0, %v4801_v8  ;;  %4386 = vmatmul.msk.f32.gmra.mxu2 %vm7736_vm7, %v3223_v19 }
 0x79c   :  { %v4805_v21 = vpop.eup %4804  ;;  %v7032_v27 = vadd.f32 1.0, %v4803_v40 }
 0x79d   :  { %v4807_v43 = vpop.eup %4806  ;;  %4814 = vrcp.f32 %v7029_v18  ;;  %v7036_v29 = vadd.f32 1.0, %v4805_v21  ;;  %v3500_v37 = vand.u32 2147483647, %v7029_v18  ;;  %v3502_v38 = vand.u32 2147483648, %v7029_v18 }
 0x79e   :  { %v4809_v32 = vpop.eup %4808  ;;  %4816 = vrcp.f32 %v7032_v27  ;;  %v7038_v20 = vadd.f32 1.0, %v4807_v43  ;;  %v3457_v50 = vand.u32 2147483648, %v7032_v27  ;;  %vm3496_vm12 = vweird.f32 %v7029_v18 }
 0x79f   :  { %v4811_v42 = vpop.eup %4810  ;;  %v7040_v10 = vadd.f32 1.0, %v4809_v32  ;;  %4818 = vrcp.f32 %v7036_v29  ;;  %vm3451_vm8 = vweird.f32 %v7032_v27  ;;  %v3455_v23 = vand.u32 2147483647, %v7032_v27 }
 0x7a0   :  { %v4813_v12 = vpop.eup %4812  ;;  %v7045_v11 = vadd.f32 1.0, %v4811_v42  ;;  %4820 = vrcp.f32 %v7038_v20  ;;  %v3442_v52 = vand.u32 2147483648, %v7038_v20  ;;  %vm7063_vm11 = vcmp.eq.f32.partialorder %v3500_v37, 8.507059e+37 }
 0x7a1   :  { %4822 = vrcp.f32 %v7040_v10  ;;  %v7055_v39 = vadd.f32 1.0, %v4813_v12  ;;  %v3472_v54 = vand.u32 2147483648, %v7040_v10  ;;  %v3503_v25 = vor.u32 1.1754944e-38, %v3502_v38 }
 0x7a2   :  { %4824 = vrcp.f32 %v7045_v11  ;;  %v7070_v13 = vor.u32 1.1754944e-38, %v3457_v50  ;;  %v3470_v49 = vand.u32 2147483647, %v7040_v10  ;;  %v3440_v4 = vand.u32 2147483647, %v7038_v20 }
 0x7a3   :  { %v4815_v22 = vpop.eup %4814  ;;  %4826 = vrcp.f32 %v7055_v39  ;;  %v7077_v1 = vor.u32 1.1754944e-38, %v3442_v52  ;;  %vm7082_vm4 = vcmp.eq.f32.partialorder %v3455_v23, 8.507059e+37  ;;  %vm3466_vm6 = vweird.f32 %v7040_v10 }
 0x7a4   :  { %v7057_v30 = vpop.eup %4816  ;;  %v3492_v26 = vmul.f32 %v4815_v22, %v7029_v18  ;;  %vm3497_vm15 = vweird.f32 %v4815_v22  ;;  %v7087_v17 = vor.u32 1.1754944e-38, %v3472_v54  ;;  %vm3436_vm9 = vweird.f32 %v7038_v20 }
 0x7a5   :  { %v3447_v16 = vmul.f32 %v7057_v30, %v7032_v27  ;;  %v7074_v47 = vpop.eup %4818  ;;  %vm3452_vm10 = vweird.f32 %v7057_v30  ;;  %v3425_v21 = vand.u32 2147483647, %v7055_v39  ;;  %v3427_v43 = vand.u32 2147483648, %v7055_v39  ;;  %vm3498_vm2 = vmor %vm3496_vm12, %vm3497_vm15 }
 0x7a6   :  { %v3493_v60 = vsub.f32 1.0, %v3492_v26  ;;  %v7079_v57 = vpop.eup %4820  ;;  %v3477_v45 = vmul.f32 %v7074_v47, %v7036_v29  ;;  %vm7103_vm14 = vcmp.eq.f32.partialorder %v3470_v49, 8.507059e+37  ;;  %vm3481_vm1 = vweird.f32 %v7036_v29  ;;  %vm7130_vm3 = vmor %vm3451_vm8, %vm3452_vm10 }
 0x7a7   :  { %v3448_v58 = vsub.f32 1.0, %v3447_v16  ;;  %v7091_v3 = vpop.eup %4822  ;;  %v3432_v40 = vmul.f32 %v7079_v57, %v7038_v20  ;;  %vm3421_vm13 = vweird.f32 %v7055_v39  ;;  %v3485_v52 = vand.u32 2147483647, %v7036_v29 }
 0x7a8   :  { %v3494_v28 = vmul.f32 %v4815_v22, %v3493_v60  ;;  %v3462_v42 = vmul.f32 %v7091_v3, %v7040_v10  ;;  %v3478_v9 = vsub.f32 1.0, %v3477_v45  ;;  %v7110_v37 = vpop.eup %4824  ;;  %v3487_v26 = vand.u32 2147483648, %v7036_v29 }
 0x7a9   :  { %v3449_v8 = vmul.f32 %v7057_v30, %v3448_v58  ;;  %v3433_v50 = vsub.f32 1.0, %v3432_v40  ;;  %v7119_v23 = vpop.eup %4826  ;;  %v3402_v49 = vmul.f32 %v7110_v37, %v7045_v11  ;;  %vm7135_vm12 = vcmp.eq.f32.partialorder %v3440_v4, 8.507059e+37  ;;  %v3230_v40 = vld [vmem:[#allocation5 + $0x350] sm:$0xff]  ;;  %v3225_v58 = vld [vmem:[#allocation5 + $0x328] sm:$0xff] }
 0x7aa   :  { %v3495_v32 = vadd.f32 %v4815_v22, %v3494_v28  ;;  %v3463_v16 = vsub.f32 1.0, %v3462_v42  ;;  %v3479_v60 = vmul.f32 %v7074_v47, %v3478_v9  ;;  %v3417_v45 = vmul.f32 %v7119_v23, %v7055_v39 }
 0x7ab   :  { %v3450_v38 = vadd.f32 %v7057_v30, %v3449_v8  ;;  %v3434_v28 = vmul.f32 %v7079_v57, %v3433_v50  ;;  %vm3482_vm15 = vweird.f32 %v7074_v47  ;;  %vm3467_vm8 = vweird.f32 %v7091_v3 }
 0x7ac   :  { %v3499_v54 = vsel %vm3498_vm2, %v4815_v22, %v3495_v32  ;;  %v3418_v34 = vsub.f32 1.0, %v3417_v45  ;;  %v3480_v19 = vadd.f32 %v7074_v47, %v3479_v60  ;;  %vm7741_vm10 = vcmask 1041408   ;;  %vm3483_vm5 = vmor %vm3481_vm1, %vm3482_vm15  ;;  %v3224_v32 = vld [vmem:[#allocation5 + $0x320] sm:$0xff]  ;;  %v3215_v22 = vld [vmem:[#allocation5 + $0x2d8] sm:$0xff] }
 0x7ad   :  { %v3504_v18 = vsel %vm7063_vm11, %v3503_v25, %v3499_v54  ;;  %v3454_v27 = vsel %vm7130_vm3, %v7057_v30, %v3450_v38  ;;  %v3464_v25 = vmul.f32 %v7091_v3, %v3463_v16  ;;  %v3435_v4 = vadd.f32 %v7079_v57, %v3434_v28  ;;  %vm3468_vm2 = vmor %vm3466_vm6, %vm3467_vm8  ;;  %v3226_v45 = vld [vmem:[#allocation5 + $0x330] sm:$0xff] }
 0x7ae   :  { %v3512_v2 = vmul.f32 %v3504_v18, %v7006_v59  ;;  %vm3437_vm11 = vweird.f32 %v7079_v57  ;;  %vm3486_vm7 = vcmp.eq.f32.partialorder %v3485_v52, 8.507059e+37  ;;  %v3488_v59 = vor.u32 1.1754944e-38, %v3487_v26  ;;  %v3231_v18 = vld [vmem:[#allocation5 + $0x358] sm:$0xff] }
 0x7af   :  { %v3465_v8 = vadd.f32 %v7091_v3, %v3464_v25  ;;  %v3403_v30 = vsub.f32 1.0, %v3402_v49  ;;  %v3459_v42 = vsel %vm7082_vm4, %v7070_v13, %v3454_v27  ;;  %v3419_v9 = vmul.f32 %v7119_v23, %v3418_v34  ;;  %vm7168_vm1 = vmor %vm3436_vm9, %vm3437_vm11  ;;  %v3227_v27 = vld [vmem:[#allocation5 + $0x338] sm:$0xff]  ;;  %v3217_v25 = vld [vmem:[#allocation5 + $0x2e8] sm:$0xff] }
 0x7b0   :  { %4376 = vmatpush.msk.msra.mxu1 %vm7741_vm10, %v3512_v2  ;;  %vm3422_vm3 = vweird.f32 %v7119_v23  ;;  %v3484_v38 = vsel %vm3483_vm5, %v7074_v47, %v3480_v19  ;;  %vm7742_vm10 = vcmask 80896   ;;  %vm3407_vm4 = vweird.f32 %v7110_v37  ;;  %v3233_v2 = vld [vmem:[#allocation5 + $0x368] sm:$0xff]  ;;  %v3235_v34 = vld [vmem:[#allocation5 + $0x378] sm:$0x3] }
 0x7b1   :  { %4394 = vmatmul.msk.f32.gmra.mxu3 %vm7742_vm10, %v3230_v40  ;;  %v3469_v13 = vsel %vm3468_vm2, %v7091_v3, %v3465_v8  ;;  %v3489_v10 = vsel %vm3486_vm7, %v3488_v59, %v3484_v38  ;;  %v3404_v14 = vmul.f32 %v7110_v37, %v3403_v30  ;;  %vm7745_vm6 = vmmov %vm7742_vm10  ;;  %v3439_v47 = vsel %vm7168_vm1, %v7079_v57, %v3435_v4  ;;  %v3234_v4 = vld [vmem:[#allocation5 + $0x370] sm:$0xff]  ;;  %v3219_v19 = vld [vmem:[#allocation5 + $0x2f8] sm:$0xff] }
 0x7b2   :  { %4387 = vmatmul.msk.f32.gmra.mxu2 %vm7745_vm6, %v3224_v32  ;;  %v3474_v20 = vsel %vm7103_vm14, %v7087_v17, %v3469_v13  ;;  %v3420_v50 = vadd.f32 %v7119_v23, %v3419_v9  ;;  %v3511_v52 = vmul.f32 %v3489_v10, %v7010_v44  ;;  %vm7186_vm9 = vmor %vm3421_vm13, %vm3422_vm3  ;;  %vm3406_vm15 = vweird.f32 %v7045_v11  ;;  %v3220_v8 = vld [vmem:[#allocation5 + $0x300] sm:$0xff]  ;;  %v3221_v59 = vld [vmem:[#allocation5 + $0x308] sm:$0x3] }
 0x7b3   :  { %v3405_v26 = vadd.f32 %v7110_v37, %v3404_v14  ;;  %v3410_v57 = vand.u32 2147483647, %v7045_v11  ;;  %v3412_v54 = vand.u32 2147483648, %v7045_v11  ;;  %v3510_v17 = vmul.f32 %v3474_v20, %v7012_v6  ;;  %vm7205_vm14 = vmor %vm3406_vm15, %vm3407_vm4 }
 0x7b4   :  { %v3424_v44 = vsel %vm7186_vm9, %v7119_v23, %v3420_v50  ;;  %3575 = vmatpush.msra.mxu1 %v3511_v52  ;;  %v3444_v12 = vsel %vm7135_vm12, %v7077_v1, %v3439_v47  ;;  %v3428_v16 = vor.u32 1.1754944e-38, %v3427_v43  ;;  %v5038_v11 = vmov 32   ;;  %vm7750_vm8 = vmmov %vm7745_vm6 }
 0x7b5   :  { %4601 = vset.pattern.permute.xlu1 %v5038_v11  ;;  %v5039_v6 = vmov 30   ;;  %v3509_v23 = vmul.f32 %v3459_v42, %v7008_v61  ;;  %vm3426_vm13 = vcmp.eq.f32.partialorder %v3425_v21, 8.507059e+37  ;;  %v3409_v1 = vsel %vm7205_vm14, %v7110_v37, %v3405_v26  ;;  %vm7751_vm11 = vmmov %vm7745_vm6 }
 0x7b6   :  { %4602 = vset.pattern.permute.xlu2 %v5039_v6  ;;  %3576 = vmatpush.msra.mxu1 %v3510_v17  ;;  %v3429_v43 = vsel %vm3426_vm13, %v3428_v16, %v3424_v44  ;;  %v3413_v49 = vor.u32 1.1754944e-38, %v3412_v54  ;;  %v3508_v28 = vmul.f32 %v3444_v12, %v7014_v48  ;;  %vm3411_vm12 = vcmp.eq.f32.partialorder %v3410_v57, 8.507059e+37  ;;  %v3232_v48 = vld [vmem:[#allocation5 + $0x360] sm:$0xff]  ;;  %vm7752_vm5 = vmmov %vm7745_vm6 }
 0x7b7   :  { %3862 = vperm.xlu1 %4601, %v6944_v63   ;;  %3624 = vperm.xlu2 %4602, %v6934_v33   ;;  %v5040_v39 = vmov 33   ;;  %v3507_v21 = vmul.f32 %v3429_v43, %v7021_v56  ;;  %vm7753_vm7 = vmmov %vm7752_vm5  ;;  %v5041_v56 = vmov 31   ;;  %vm7759_vm6 = vcmask 1041408  }
 0x7b8   :  { %3577 = vmatpush.msra.mxu1 %v3509_v23  ;;  %v3414_v61 = vsel %vm3411_vm12, %v3413_v49, %v3409_v1  ;;  %4606 = vset.pattern.permute.xlu0 %v5040_v39  ;;  %vm7754_vm2 = vmmov %vm7752_vm5 }
 0x7b9   :  { %4395 = vmatmul.msk.f32.gmra.mxu3 %vm7750_vm8, %v3231_v18  ;;  %3893 = vperm.xlu0 %4606, %v6934_v33   ;;  %v3506_v37 = vmul.f32 %v3414_v61, %v7016_v35  ;;  %v3216_v35 = vld [vmem:[#allocation5 + $0x2e0] sm:$0xff]  ;;  %vm7755_vm3 = vmmov %vm7754_vm2 }
 0x7ba   :  { %4388 = vmatmul.msk.f32.gmra.mxu2 %vm7751_vm11, %v3225_v58  ;;  %3578 = vmatpush.msra.mxu1 %v3508_v28  ;;  %vm7756_vm10 = vmmov %vm7754_vm2 }
 0x7bb   :  { %vm7757_vm1 = vmmov %vm7754_vm2 }
 0x7bc   :  { %3579 = vmatpush.msra.mxu1 %v3507_v21  ;;  %vm7758_vm4 = vmmov %vm7757_vm1 }
 0x7bd   :  { %vm7760_vm9 = vmmov %vm7759_vm6 }
 0x7be   :  { %3580 = vmatpush.msra.mxu1 %v3506_v37 }
 0x7bf   :  { %3858 = vperm.xlu1 %4601, %v6934_v33   ;;  %4377 = vmatmul.msk.f32.vlgmr.msra.gmra.mxu1 %vm1155_vm0, %v3215_v22 }
 0x7c0   :  { %4603 = vset.pattern.permute.xlu2 %v5040_v39 }
 0x7c1   :  { %3897 = vperm.xlu2 %4603, %v6944_v63   ;;  %4396 = vmatmul.msk.f32.gmra.mxu3 %vm7752_vm5, %v3232_v48 }
 0x7c2   :  { %4389 = vmatmul.msk.f32.gmra.mxu2 %vm7753_vm7, %v3226_v45  ;;  %4607 = vset.pattern.permute.xlu0 %v5039_v6 }
 0x7c3   :  { %3628 = vperm.xlu0 %4607, %v6944_v63  }
 0x7c7   :  { %4604 = vset.pattern.permute.xlu1 %v5041_v56  ;;  %4378 = vmatmul.msk.f32.gmra.mxu1 %vm1155_vm0, %v3216_v35 }
 0x7c8   :  { %3715 = vperm.xlu1 %4604, %v6944_v63   ;;  %v3218_v63 = vld [vmem:[#allocation5 + $0x2f0] sm:$0xff] }
 0x7c9   :  { %4605 = vset.pattern.permute.xlu2 %v5038_v11  ;;  %4397 = vmatmul.msk.f32.gmra.mxu3 %vm7754_vm2, %v3233_v2 }
 0x7ca   :  { %3854 = vperm.xlu2 %4605, %v6941_v62   ;;  %4390 = vmatmul.msk.f32.gmra.mxu2 %vm7755_vm3, %v3227_v27 }
 0x7cb   :  { %3620 = vperm.xlu0 %4607, %v6941_v62  }
 0x7cf   :  { %4379 = vmatmul.msk.f32.gmra.mxu1 %vm1155_vm0, %v3217_v25 }
 0x7d0   :  { %4608 = vset.pattern.permute.xlu1 %v5039_v6 }
 0x7d1   :  { %3616 = vperm.xlu1 %4608, %v6937_v41   ;;  %4398 = vmatmul.msk.f32.gmra.mxu3 %vm7756_vm10, %v3234_v4 }
 0x7d2   :  { %4609 = vset.pattern.permute.xlu2 %v5041_v56 }
 0x7d3   :  { %3711 = vperm.xlu2 %4609, %v6934_v33   ;;  %3612 = vperm.xlu0 %4607, %v6928_v51   ;;  %v3228_v33 = vld [vmem:[#allocation5 + $0x340] sm:$0x3] }
 0x7d4   :  { %4391 = vmatmul.msk.f32.gmra.mxu2 %vm7758_vm4, %v3228_v33 }
 0x7d7   :  { %4380 = vmatmul.msk.f32.gmra.mxu1 %vm1155_vm0, %v3218_v63 }
 0x7d9   :  { %4610 = vset.pattern.permute.xlu1 %v5038_v11  ;;  %4399 = vmatmul.msk.f32.gmra.mxu3 %vm7757_vm1, %v3235_v34 }
 0x7da   :  { %3850 = vperm.xlu1 %4610, %v6937_v41  }
 0x7db   :  { %4611 = vset.pattern.permute.xlu2 %v5040_v39  ;;  %4616 = vset.pattern.permute.xlu0 %v5041_v56 }
 0x7dc   :  { %3889 = vperm.xlu2 %4611, %v6941_v62   ;;  %3703 = vperm.xlu0 %4616, %v6937_v41  }
 0x7df   :  { %4381 = vmatmul.msk.f32.gmra.mxu1 %vm1155_vm0, %v3219_v19 }
 0x7e2   :  { %4612 = vset.pattern.permute.xlu1 %v5041_v56 }
 0x7e3   :  { %3707 = vperm.xlu1 %4612, %v6941_v62   ;;  %v3519_v62 = vpop.permute.xlu2 %3518 }
 0x7e4   :  { %4613 = vset.pattern.permute.xlu2 %v5038_v11  ;;  %4621 = vset.pattern.permute.xlu0 %v5038_v11 }
 0x7e5   :  { %3846 = vperm.xlu2 %4613, %v6928_v51   ;;  %3838 = vperm.xlu0 %4621, %v6916_v15  }
 0x7e7   :  { %4382 = vmatmul.msk.f32.gmra.mxu1 %vm1155_vm0, %v3220_v8 }
 0x7eb   :  { %4614 = vset.pattern.permute.xlu1 %v5040_v39  ;;  %v3531_v32 = vpop.permute.xlu2 %3530 }
 0x7ec   :  { %3885 = vperm.xlu1 %4614, %v6937_v41   ;;  %v3515_v41 = vpop.permute.xlu1 %3514 }
 0x7ed   :  { %4615 = vset.pattern.permute.xlu2 %v5039_v6 }
 0x7ee   :  { %3608 = vperm.xlu2 %4615, %v6920_v31  }
 0x7ef   :  { %4383 = vmatmul.msk.f32.gmra.mxu1 %vm1155_vm0, %v3221_v59 }
 0x7f3   :  { %v3539_v38 = vpop.permute.xlu2 %3538 }
 0x7f4   :  { %4617 = vset.pattern.permute.xlu1 %v5038_v11  ;;  %v3527_v40 = vpop.permute.xlu1 %3526 }
 0x7f5   :  { %3842 = vperm.xlu1 %4617, %v6920_v31  }
 0x7f6   :  { %4618 = vset.pattern.permute.xlu2 %v5040_v39 }
 0x7f7   :  { %3881 = vperm.xlu2 %4618, %v6928_v51  }
 0x7fc   :  { %v3535_v9 = vpop.permute.xlu1 %3534 }
 0x7fd   :  { %4619 = vset.pattern.permute.xlu1 %v5039_v6 }
 0x7fe   :  { %3604 = vperm.xlu1 %4619, %v6916_v15  }
 0x7ff   :  { %4620 = vset.pattern.permute.xlu2 %v5041_v56 }
 0x800   :  { %3699 = vperm.xlu2 %4620, %v6928_v51  }
 0x806   :  { %4622 = vset.pattern.permute.xlu1 %v5040_v39 }
 0x807   :  { %3877 = vperm.xlu1 %4622, %v6920_v31  }
 0x808   :  { %3695 = vperm.xlu2 %4620, %v6920_v31  }
 0x80f   :  { %3873 = vperm.xlu1 %4622, %v6916_v15  }
 0x810   :  { %3691 = vperm.xlu2 %4620, %v6916_v15   ;;  %v3523_v15 = vpop.permute.xlu0 %3522 }
 0x811   :  { %v7281_v13 = vpop.permute.xlu2 %3624 }
 0x813   :  { %v7298_v39 = vpop.f32.mrf.mxu2 }
 0x81b   :  { %v7285_v47 = vpop.permute.xlu2 %3897 }
 0x81d   :  { %v7294_v58 = vpop.f32.mrf.mxu3 }
 0x81e   :  { %v3672_v27 = vpop.f32.mrf.mxu2 }
 0x824   :  { %v7289_v17 = vpop.permute.xlu2 %3854 }
 0x829   :  { %v7279_v51 = vpop.permute.xlu1 %3862 }
 0x82d   :  { %v7296_v28 = vpop.permute.xlu2 %3711 }
 0x831   :  { %v7283_v14 = vpop.permute.xlu1 %3858 }
 0x834   :  { %v7302_v35 = vpop.f32.mrf.mxu3 }
 0x836   :  { %v7304_v56 = vpop.permute.xlu2 %3889 }
 0x83a   :  { %v7287_v57 = vpop.permute.xlu1 %3715 }
 0x83c   :  { %v3582_v30 = vpop.f32.mrf.mxu1 }
 0x83d   :  { %v3583_v50 = vadd.f32 %v3582_v30, %v3515_v41 }
 0x843   :  { %v7292_v49 = vpop.permute.xlu1 %3616 }
 0x844   :  { %v3585_v42 = vpop.f32.mrf.mxu1 }
 0x845   :  { %v3586_v20 = vadd.f32 %v3585_v42, %v3519_v62 }
 0x847   :  { %v3777_v26 = vadd.f32 %v3586_v20, %v3583_v50 }
 0x84c   :  { %v3588_v29 = vpop.f32.mrf.mxu1  ;;  %v7300_v48 = vpop.permute.xlu1 %3850 }
 0x84d   :  { %v3589_v52 = vadd.f32 %v3588_v29, %v3523_v15 }
 0x84f   :  { %v3778_v44 = vadd.f32 %v3777_v26, %v3589_v52 }
 0x854   :  { %v3591_v10 = vpop.f32.mrf.mxu1 }
 0x855   :  { %v3592_v54 = vadd.f32 %v3591_v10, %v3527_v40  ;;  %v7319_v59 = vpop.permute.xlu1 %3707  ;;  %v7325_v40 = vpop.permute.xlu0 %3893 }
 0x857   :  { %v3779_v16 = vadd.f32 %v3778_v44, %v3592_v54 }
 0x85c   :  { %v3594_v31 = vpop.f32.mrf.mxu1 }
 0x85d   :  { %v3595_v12 = vadd.f32 %v3594_v31, %v3531_v32  ;;  %v7327_v32 = vpop.f32.mrf.mxu3  ;;  %v3675_v31 = vpop.f32.mrf.mxu2 }
 0x85f   :  { %v3780_v11 = vadd.f32 %v3779_v16, %v3595_v12  ;;  %v3629_v16 = vpop.permute.xlu0 %3628 }
 0x864   :  { %v3597_v3 = vpop.f32.mrf.mxu1 }
 0x865   :  { %v3598_v60 = vadd.f32 %v3597_v3, %v3535_v9  ;;  %v7331_v9 = vpop.permute.xlu2 %3846 }
 0x867   :  { %v3781_v1 = vadd.f32 %v3780_v11, %v3598_v60 }
 0x86c   :  { %v3600_v6 = vpop.f32.mrf.mxu1 }
 0x86d   :  { %v3601_v23 = vadd.f32 %v3600_v6, %v3539_v38  ;;  %v3609_v11 = vpop.permute.xlu2 %3608 }
 0x86f   :  { %v3782_v43 = vsel %vm7759_vm6, %v3601_v23, 0.0 }
 0x870   :  { %v3783_v18 = vadd.f32 %v3782_v43, %v3781_v1 }
 0x872   :  { %v3784_v61 = vrot.slane %v3783_v18, 4 }
 0x874   :  { %v3785_v21 = vadd.f32 %v3784_v61, %v3783_v18 }
 0x876   :  { %v3786_v37 = vrot.slane %v3785_v21, 2 }
 0x878   :  { %v3787_v22 = vadd.f32 %v3786_v37, %v3785_v21  ;;  %v3621_v37 = vpop.permute.xlu0 %3620 }
 0x87a   :  { %v3788_v45 = vrot.slane %v3787_v22, 1 }
 0x87c   :  { %v3789_v2 = vadd.f32 %v3788_v45, %v3787_v22 }
 0x87e   :  { %v3790_v25 = vmul.f32 %v3789_v2, %v7726_v55  ;;  %v3882_v2 = vpop.permute.xlu2 %3881 }
 0x880   :  { %v7307_v4 = vsub.f32 %v3583_v50, %v3790_v25  ;;  %v7309_v63 = vsub.f32 %v3586_v20, %v3790_v25  ;;  %v7311_v34 = vsub.f32 %v3589_v52, %v3790_v25  ;;  %v7313_v19 = vsub.f32 %v3592_v54, %v3790_v25 }
 0x881   :  { %v7321_v41 = vsub.f32 %v3595_v12, %v3790_v25  ;;  %v7329_v42 = vsub.f32 %v3601_v23, %v3790_v25  ;;  %v7333_v38 = vsub.f32 %v3598_v60, %v3790_v25  ;;  %v7344_v12 = vpop.permute.xlu1 %3885  ;;  %v7346_v60 = vpop.f32.mrf.mxu3 }
 0x882   :  { %v3798_v33 = vmul.f32 %v7307_v4, %v7307_v4  ;;  %v3799_v8 = vmul.f32 %v7309_v63, %v7309_v63  ;;  %v3800_v62 = vmul.f32 %v7311_v34, %v7311_v34  ;;  %v3801_v29 = vmul.f32 %v7313_v19, %v7313_v19  ;;  %v3678_v23 = vpop.f32.mrf.mxu2 }
 0x883   :  { %v3802_v15 = vmul.f32 %v7321_v41, %v7321_v41  ;;  %v3804_v50 = vmul.f32 %v7329_v42, %v7329_v42  ;;  %v3803_v52 = vmul.f32 %v7333_v38, %v7333_v38 }
 0x884   :  { %v3805_v30 = vadd.f32 %v3799_v8, %v3798_v33 }
 0x885   :  { %v3810_v54 = vsel %vm7760_vm9, %v3804_v50, 0.0 }
 0x886   :  { %v3806_v10 = vadd.f32 %v3805_v30, %v3800_v62  ;;  %v3613_v30 = vpop.permute.xlu0 %3612 }
 0x888   :  { %v3807_v20 = vadd.f32 %v3806_v10, %v3801_v29  ;;  %v3700_v10 = vpop.permute.xlu2 %3699 }
 0x889   :  { %v3843_v21 = vpop.permute.xlu1 %3842  ;;  %v3768_v22 = vpop.f32.mrf.mxu3 }
 0x88a   :  { %v3808_v3 = vadd.f32 %v3807_v20, %v3802_v15  ;;  %v3681_v25 = vpop.f32.mrf.mxu2 }
 0x88c   :  { %v3809_v26 = vadd.f32 %v3808_v3, %v3803_v52  ;;  %v3679_v3 = vadd.f32 %v3678_v23, %v7292_v49  ;;  %v3682_v49 = vadd.f32 %v3681_v25, %v3621_v37 }
 0x88e   :  { %v3811_v44 = vadd.f32 %v3810_v54, %v3809_v26  ;;  %v3673_v26 = vadd.f32 %v3672_v27, %v3609_v11  ;;  %v3704_v54 = vpop.permute.xlu0 %3703  ;;  %v3769_v27 = vadd.f32 %v3768_v22, %v7319_v59 }
 0x890   :  { %v3812_v6 = vrot.slane %v3811_v44, 4  ;;  %v3696_v0 = vpop.permute.xlu2 %3695 }
 0x891   :  { %v3605_v62 = vpop.permute.xlu1 %3604  ;;  %v3771_v29 = vpop.f32.mrf.mxu3 }
 0x892   :  { %v3813_v1 = vadd.f32 %v3812_v6, %v3811_v44  ;;  %v3684_v20 = vpop.f32.mrf.mxu2 }
 0x893   :  { %v3685_v6 = vadd.f32 %v3684_v20, %v7281_v13  ;;  %v3772_v13 = vadd.f32 %v3771_v29, %v7296_v28 }
 0x894   :  { %v3814_v43 = vrot.slane %v3813_v1, 2 }
 0x895   :  { %v3912_v46 = vadd.f32 1.0, %v3685_v6 }
 0x896   :  { %v3815_v18 = vadd.f32 %v3814_v43, %v3813_v1  ;;  %v3839_v59 = vpop.permute.xlu0 %3838 }
 0x898   :  { %v3816_v61 = vrot.slane %v3815_v18, 1 }
 0x899   :  { %v3878_v44 = vpop.permute.xlu1 %3877 }
 0x89a   :  { %v3817_v45 = vadd.f32 %v3816_v61, %v3815_v18  ;;  %v3774_v18 = vpop.f32.mrf.mxu3  ;;  %v3676_v61 = vadd.f32 %v3675_v31, %v3613_v30  ;;  %v3687_v53 = vpop.f32.mrf.mxu2 }
 0x89b   :  { %v3775_v11 = vadd.f32 %v3774_v18, %v7287_v57  ;;  %v3688_v30 = vadd.f32 %v3687_v53, %v3629_v16  ;;  %v3911_v57 = vadd.f32 1.0, %v3682_v49  ;;  %v5042_v49 = vmov 34  }
 0x89c   :  { %v3818_v33 = vmul.f32 %v3817_v45, %v7726_v55  ;;  %v3670_v55 = vadd.f32 %v7298_v39, %v3605_v62  ;;  %v3910_v45 = vadd.f32 1.0, %v3679_v3  ;;  %v3763_v62 = vadd.f32 %v7327_v32, %v3700_v10  ;;  %4624 = vset.pattern.permute.xlu1 %v5042_v49  ;;  %4623 = vset.pattern.permute.xlu0 %v5042_v49 }
 0x89d   :  { %v3909_v31 = vadd.f32 1.0, %v3676_v61  ;;  %v3913_v29 = vadd.f32 1.0, %v3688_v30  ;;  %4625 = vset.pattern.permute.xlu2 %v5042_v49 }
 0x89e   :  { %v3819_v8 = vadd.f32 1e-05, %v3818_v33  ;;  %v3908_v33 = vadd.f32 1.0, %v3673_v26  ;;  %v3907_v39 = vadd.f32 1.0, %v3670_v55  ;;  %v3692_v26 = vpop.permute.xlu2 %3691 }
 0x8a0   :  { %4828 = vrsqrt.f32 %v3819_v8  ;;  %vm3826_vm14 = vweird.f32 %v3819_v8 }
 0x8a6   :  { %v4829_v15 = vpop.eup %4828 }
 0x8a7   :  { %v3821_v50 = vmul.f32 %v4829_v15, %v3819_v8  ;;  %vm3827_vm15 = vweird.f32 %v4829_v15 }
 0x8a8   :  { %vm3828_vm13 = vmor %vm3826_vm14, %vm3827_vm15 }
 0x8a9   :  { %v3822_v52 = vmul.f32 %v4829_v15, %v3821_v50 }
 0x8ab   :  { %v3823_v1 = vmul.f32 0.5, %v3822_v52 }
 0x8ad   :  { %v3824_v43 = vsub.f32 1.5, %v3823_v1 }
 0x8af   :  { %v3825_v50 = vmul.f32 %v4829_v15, %v3824_v43 }
 0x8b1   :  { %v3829_v23 = vsel %vm3828_vm13, %v4829_v15, %v3825_v50 }
 0x8b2   :  { %v3836_v20 = vmul.f32 %v3829_v23, %v7329_v42  ;;  %v3832_v52 = vmul.f32 %v3829_v23, %v7311_v34  ;;  %v3833_v8 = vmul.f32 %v3829_v23, %v7313_v19  ;;  %v3831_v37 = vmul.f32 %v3829_v23, %v7309_v63  ;;  %v3874_v34 = vpop.permute.xlu1 %3873 }
 0x8b3   :  { %v3835_v22 = vmul.f32 %v3829_v23, %v7333_v38  ;;  %v3834_v28 = vmul.f32 %v3829_v23, %v7321_v41  ;;  %v3830_v25 = vmul.f32 %v3829_v23, %v7307_v4 }
 0x8b4   :  { %v3871_v32 = vmul.f32 %v7279_v51, %v3836_v20  ;;  %v3867_v53 = vmul.f32 %v7331_v9, %v3832_v52  ;;  %v3868_v42 = vmul.f32 %v7300_v48, %v3833_v8  ;;  %v3866_v16 = vmul.f32 %v3843_v21, %v3831_v37  ;;  %v4885_v20 = vld [vmem:[#allocation7 + $0x20] sm:$0xff] }
 0x8b5   :  { %v3870_v19 = vmul.f32 %v7283_v14, %v3835_v22  ;;  %v3869_v63 = vmul.f32 %v7289_v17, %v3834_v28  ;;  %v3865_v10 = vmul.f32 %v3839_v59, %v3830_v25  ;;  %v3766_v48 = vadd.f32 %v7346_v60, %v3704_v54  ;;  %4085 = vperm.xlu2 %4625, %v4885_v20  }
 0x8b6   :  { %v3902_v38 = vadd.f32 %v3882_v2, %v3867_v53  ;;  %v3903_v41 = vadd.f32 %v7344_v12, %v3868_v42  ;;  %v3906_v15 = vadd.f32 %v7285_v47, %v3871_v32  ;;  %v3901_v4 = vadd.f32 %v3878_v44, %v3866_v16  ;;  %v4886_v16 = vld [vmem:[#allocation7 + $0x18] sm:$0xff] }
 0x8b7   :  { %v3905_v51 = vadd.f32 %v7325_v40, %v3870_v19  ;;  %v3904_v9 = vadd.f32 %v7304_v56, %v3869_v63  ;;  %v3900_v21 = vadd.f32 %v3874_v34, %v3865_v10  ;;  %v3760_v2 = vadd.f32 %v7302_v35, %v3696_v0  ;;  %v4887_v34 = vld [vmem:[#allocation7 + $0x8] sm:$0xff] }
 0x8b8   :  { %v3917_v3 = vmul.f32 %v3910_v45, %v3903_v41  ;;  %v3916_v14 = vmul.f32 %v3909_v31, %v3902_v38  ;;  %v3920_v6 = vmul.f32 %v3913_v29, %v3906_v15  ;;  %v3915_v17 = vmul.f32 %v3908_v33, %v3901_v4  ;;  %v4888_v15 = vld [vmem:[#allocation7 + $0x10] sm:$0xff] }
 0x8b9   :  { %v3919_v1 = vmul.f32 %v3912_v46, %v3905_v51  ;;  %v3918_v55 = vmul.f32 %v3911_v57, %v3904_v9  ;;  %v3914_v12 = vmul.f32 %v3907_v39, %v3900_v21  ;;  %v3757_v60 = vadd.f32 %v7294_v58, %v3692_v26  ;;  %v4884_v39 = vld [vmem:[#allocation7 + $0x30] sm:$0x3] }
 0x8ba   :  { %v7374_v43 = vadd.f32 %v3916_v14, %v3763_v62  ;;  %v7376_v47 = vadd.f32 %v3920_v6, %v3775_v11  ;;  %v7378_v40 = vadd.f32 %v3917_v3, %v3766_v48  ;;  %v7385_v44 = vadd.f32 %v3915_v17, %v3760_v2  ;;  %v4883_v11 = vld [vmem:[#allocation7 + $0x28] sm:$0xff]  ;;  %4093 = vperm.xlu0 %4623, %v4884_v39  }
 0x8bb   :  { %v7380_v56 = vadd.f32 %v3919_v1, %v3772_v13  ;;  %v7383_v54 = vadd.f32 %v3918_v55, %v3769_v27  ;;  %v7391_v61 = vadd.f32 %v3914_v12, %v3757_v60  ;;  %4089 = vperm.xlu1 %4624, %v4883_v11  }
 0x8bc   :  { %v4402_v46 = vmul.f32 -1.442695, %v7374_v43  ;;  %v4406_v18 = vmul.f32 -1.442695, %v7376_v47  ;;  %v4403_v45 = vmul.f32 -1.442695, %v7378_v40 }
 0x8bd   :  { %v4405_v0 = vmul.f32 -1.442695, %v7380_v56  ;;  %v4404_v35 = vmul.f32 -1.442695, %v7383_v54  ;;  %v4401_v58 = vmul.f32 -1.442695, %v7385_v44  ;;  %4077 = vperm.xlu2 %4625, %v4888_v15  }
 0x8be   :  { %4830 = vpow2.f32 %v4402_v46  ;;  %v4400_v33 = vmul.f32 -1.442695, %v7391_v61 }
 0x8bf   :  { %4832 = vpow2.f32 %v4405_v0 }
 0x8c0   :  { %4834 = vpow2.f32 %v4404_v35 }
 0x8c1   :  { %4836 = vpow2.f32 %v4406_v18 }
 0x8c2   :  { %4838 = vpow2.f32 %v4403_v45  ;;  %4073 = vperm.xlu0 %4623, %v4887_v34  }
 0x8c3   :  { %4840 = vpow2.f32 %v4401_v58  ;;  %4081 = vperm.xlu1 %4624, %v4886_v16  }
 0x8c4   :  { %v4831_v50 = vpop.eup %4830  ;;  %4842 = vpow2.f32 %v4400_v33 }
 0x8c5   :  { %v4833_v27 = vpop.eup %4832  ;;  %v7396_v13 = vadd.f32 1.0, %v4831_v50 }
 0x8c6   :  { %v4835_v23 = vpop.eup %4834  ;;  %v7398_v62 = vadd.f32 1.0, %v4833_v27  ;;  %v4889_v27 = vld [vmem:[#allocation7] sm:$0xff] }
 0x8c7   :  { %v4837_v31 = vpop.eup %4836  ;;  %v7400_v30 = vadd.f32 1.0, %v4835_v23  ;;  %4844 = vrcp.f32 %v7396_v13  ;;  %v3995_v10 = vand.u32 2147483647, %v7396_v13  ;;  %vm3991_vm3 = vweird.f32 %v7396_v13 }
 0x8c8   :  { %v4839_v52 = vpop.eup %4838  ;;  %4846 = vrcp.f32 %v7398_v62  ;;  %v7404_v8 = vadd.f32 1.0, %v4837_v31  ;;  %v4042_v25 = vand.u32 2147483648, %v7398_v62  ;;  %v4040_v42 = vand.u32 2147483647, %v7398_v62 }
 0x8c9   :  { %v4841_v37 = vpop.eup %4840  ;;  %4848 = vrcp.f32 %v7400_v30  ;;  %v7407_v59 = vadd.f32 1.0, %v4839_v52  ;;  %vm4036_vm8 = vweird.f32 %v7398_v62  ;;  %vm4021_vm11 = vweird.f32 %v7400_v30 }
 0x8ca   :  { %4850 = vrcp.f32 %v7404_v8  ;;  %v4843_v22 = vpop.eup %4842  ;;  %v7411_v28 = vadd.f32 1.0, %v4841_v37  ;;  %v4057_v57 = vand.u32 2147483648, %v7404_v8  ;;  %v4055_v53 = vand.u32 2147483647, %v7404_v8 }
 0x8cb   :  { %4852 = vrcp.f32 %v7407_v59  ;;  %v7422_v63 = vadd.f32 1.0, %v4843_v22  ;;  %vm4051_vm12 = vweird.f32 %v7404_v8  ;;  %v4043_v9 = vor.u32 1.1754944e-38, %v4042_v25  ;;  %4069 = vperm.xlu1 %4624, %v4889_v27  }
 0x8cc   :  { %4854 = vrcp.f32 %v7411_v28  ;;  %v4058_v51 = vor.u32 1.1754944e-38, %v4057_v57  ;;  %vm7439_vm5 = vcmp.eq.f32.partialorder %v4055_v53, 8.507059e+37  ;;  %vm7443_vm7 = vcmp.eq.f32.partialorder %v4040_v42, 8.507059e+37 }
 0x8cd   :  { %v7415_v32 = vpop.eup %4844  ;;  %v4025_v1 = vand.u32 2147483647, %v7400_v30  ;;  %v4027_v2 = vand.u32 2147483648, %v7400_v30  ;;  %4856 = vrcp.f32 %v7422_v63  ;;  %vm4006_vm2 = vweird.f32 %v7407_v59 }
 0x8ce   :  { %v7420_v19 = vpop.eup %4846  ;;  %v3987_v29 = vmul.f32 %v7415_v32, %v7396_v13  ;;  %v4010_v49 = vand.u32 2147483647, %v7407_v59  ;;  %v4012_v31 = vand.u32 2147483648, %v7407_v59  ;;  %v3997_v34 = vand.u32 2147483648, %v7396_v13 }
 0x8cf   :  { %v7427_v38 = vpop.eup %4848  ;;  %v4032_v41 = vmul.f32 %v7420_v19, %v7398_v62  ;;  %vm4037_vm10 = vweird.f32 %v7420_v19  ;;  %vm7485_vm15 = vcmp.eq.f32.partialorder %v4025_v1, 8.507059e+37  ;;  %v4028_v25 = vor.u32 1.1754944e-38, %v4027_v2 }
 0x8d0   :  { %v4851_v4 = vpop.eup %4850  ;;  %v4017_v48 = vmul.f32 %v7427_v38, %v7400_v30  ;;  %v3988_v21 = vsub.f32 1.0, %v3987_v29  ;;  %vm4022_vm1 = vweird.f32 %v7427_v38  ;;  %vm7467_vm6 = vmor %vm4036_vm8, %vm4037_vm10  ;;  %vm3992_vm8 = vweird.f32 %v7415_v32 }
 0x8d1   :  { %v7436_v3 = vpop.eup %4852  ;;  %v4047_v26 = vmul.f32 %v4851_v4, %v7404_v8  ;;  %v4033_v6 = vsub.f32 1.0, %v4032_v41  ;;  %vm4052_vm4 = vweird.f32 %v4851_v4  ;;  %vm7481_vm9 = vmor %vm4021_vm11, %vm4022_vm1  ;;  %vm7511_vm11 = vcmp.eq.f32.partialorder %v4010_v49, 8.507059e+37 }
 0x8d2   :  { %v4018_v55 = vsub.f32 1.0, %v4017_v48  ;;  %v4002_v12 = vmul.f32 %v7436_v3, %v7407_v59  ;;  %v7454_v60 = vpop.eup %4854  ;;  %v3989_v45 = vmul.f32 %v7415_v32, %v3988_v21  ;;  %vm4007_vm14 = vweird.f32 %v7436_v3  ;;  %vm4053_vm13 = vmor %vm4051_vm12, %vm4052_vm4 }
 0x8d3   :  { %v4048_v46 = vsub.f32 1.0, %v4047_v26  ;;  %v4034_v0 = vmul.f32 %v7420_v19, %v4033_v6  ;;  %v3972_v58 = vmul.f32 %v7454_v60, %v7411_v28  ;;  %v4857_v57 = vpop.eup %4856  ;;  %vm7507_vm12 = vmor %vm4006_vm2, %vm4007_vm14  ;;  %v3982_v21 = vand.u32 2147483648, %v7411_v28 }
 0x8d4   :  { %v4019_v35 = vmul.f32 %v7427_v38, %v4018_v55  ;;  %v4003_v18 = vsub.f32 1.0, %v4002_v12  ;;  %v3990_v30 = vadd.f32 %v7415_v32, %v3989_v45  ;;  %vm7777_vm2 = vcmask 1041408  }
 0x8d5   :  { %v4049_v33 = vmul.f32 %v4851_v4, %v4048_v46  ;;  %v4035_v50 = vadd.f32 %v7420_v19, %v4034_v0  ;;  %v3973_v20 = vsub.f32 1.0, %v3972_v58  ;;  %v3998_v14 = vor.u32 1.1754944e-38, %v3997_v34 }
 0x8d6   :  { %v4020_v39 = vadd.f32 %v7427_v38, %v4019_v35  ;;  %v4004_v23 = vmul.f32 %v7436_v3, %v4003_v18  ;;  %v3980_v6 = vand.u32 2147483647, %v7411_v28  ;;  %vm3996_vm10 = vcmp.eq.f32.partialorder %v3995_v10, 8.507059e+37 }
 0x8d7   :  { %v4050_v52 = vadd.f32 %v4851_v4, %v4049_v33  ;;  %v4039_v37 = vsel %vm7467_vm6, %v7420_v19, %v4035_v50  ;;  %v3974_v19 = vmul.f32 %v7454_v60, %v3973_v20  ;;  %v3983_v12 = vor.u32 1.1754944e-38, %v3982_v21  ;;  %v3237_v33 = vld [vmem:[#allocation5 + $0x388] sm:$0xff]  ;;  %v3240_v50 = vld [vmem:[#allocation5 + $0x3a0] sm:$0xff] }
 0x8d8   :  { %v4005_v53 = vadd.f32 %v7436_v3, %v4004_v23  ;;  %v4024_v16 = vsel %vm7481_vm9, %v7427_v38, %v4020_v39  ;;  %v4044_v29 = vsel %vm7443_vm7, %v4043_v9, %v4039_v37  ;;  %v4013_v38 = vor.u32 1.1754944e-38, %v4012_v31 }
 0x8d9   :  { %v4054_v42 = vsel %vm4053_vm13, %v4851_v4, %v4050_v52  ;;  %v3975_v59 = vadd.f32 %v7454_v60, %v3974_v19  ;;  %vm3977_vm7 = vweird.f32 %v7454_v60  ;;  %v4029_v48 = vsel %vm7485_vm15, %v4028_v25, %v4024_v16  ;;  %v4890_v52 = vld [vmem:[#allocation7] sm:$0x3]  ;;  %vm7778_vm13 = vmmov %vm7777_vm2 }
 0x8da   :  { %v4059_v8 = vsel %vm7439_vm5, %v4058_v51, %v4054_v42  ;;  %v4009_v51 = vsel %vm7507_vm12, %v7436_v3, %v4005_v53  ;;  %vm7521_vm5 = vmor %vm3991_vm3, %vm3992_vm8  ;;  %v3957_v3 = vmul.f32 %v4857_v57, %v7422_v63  ;;  %v4066_v26 = vmul.f32 %v4044_v29, %v7380_v56 }
 0x8db   :  { %v4067_v4 = vmul.f32 %v4059_v8, %v7376_v47  ;;  %v3994_v47 = vsel %vm7521_vm5, %v7415_v32, %v3990_v30  ;;  %vm3976_vm3 = vweird.f32 %v7411_v28  ;;  %v4014_v17 = vsel %vm7511_vm11, %v4013_v38, %v4009_v51 }
 0x8dc   :  { %vm3978_vm1 = vmor %vm3976_vm3, %vm3977_vm7  ;;  %v3958_v32 = vsub.f32 1.0, %v3957_v3  ;;  %v4065_v1 = vmul.f32 %v4029_v48, %v7383_v54  ;;  %v3999_v2 = vsel %vm3996_vm10, %v3998_v14, %v3994_v47  ;;  %v3967_v56 = vand.u32 2147483648, %v7422_v63  ;;  %v4165_v3 = vld [vmem:[#allocation5 + $0x3b8] sm:$0x3] }
 0x8dd   :  { %4407 = vmatpush.msk.msra.mxu0 %vm7777_vm2, %v4067_v4  ;;  %v3979_v55 = vsel %vm3978_vm1, %v7454_v60, %v3975_v59  ;;  %vm3962_vm4 = vweird.f32 %v4857_v57  ;;  %v3965_v28 = vand.u32 2147483647, %v7422_v63  ;;  %v4064_v0 = vmul.f32 %v4014_v17, %v7378_v40  ;;  %v3236_v40 = vld [vmem:[#allocation5 + $0x380] sm:$0xff] }
 0x8de   :  { %v3959_v46 = vmul.f32 %v4857_v57, %v3958_v32  ;;  %vm3981_vm6 = vcmp.eq.f32.partialorder %v3980_v6, 8.507059e+37  ;;  %vm3961_vm9 = vweird.f32 %v7422_v63  ;;  %v4063_v54 = vmul.f32 %v3999_v2, %v7374_v43  ;;  %v3238_v63 = vld [vmem:[#allocation5 + $0x390] sm:$0xff]  ;;  %v3239_v43 = vld [vmem:[#allocation5 + $0x398] sm:$0xff] }
 0x8df   :  { %4130 = vmatpush.msra.mxu0 %v4066_v26  ;;  %v3984_v13 = vsel %vm3981_vm6, %v3983_v12, %v3979_v55  ;;  %vm3963_vm15 = vmor %vm3961_vm9, %vm3962_vm4  ;;  %v3968_v60 = vor.u32 1.1754944e-38, %v3967_v56  ;;  %vm3966_vm14 = vcmp.eq.f32.partialorder %v3965_v28, 8.507059e+37  ;;  %v5043_v31 = vmov 35   ;;  %v7779_v59 = vld [vmem:[#allocation20_spill] sm:$0xff]  ;;  %v7783_v26 = vld [vmem:[#allocation13_spill] sm:$0xff] }
 0x8e0   :  { %v3960_v10 = vadd.f32 %v4857_v57, %v3959_v46  ;;  %v4062_v18 = vmul.f32 %v3984_v13, %v7385_v44  ;;  %v3241_v44 = vld [vmem:[#allocation5 + $0x3a8] sm:$0xff]  ;;  %4626 = vset.pattern.permute.xlu2 %v5043_v31  ;;  %4627 = vset.pattern.permute.xlu0 %v5043_v31  ;;  %v4891_v55 = vld [vmem:[#allocation2] sm:$0x3] }
 0x8e1   :  { %4131 = vmatpush.msra.mxu0 %v4065_v1  ;;  %4167 = vperm.xlu2 %4626, %v4890_v52  }
 0x8e2   :  { %v3964_v35 = vsel %vm3963_vm15, %v4857_v57, %v3960_v10 }
 0x8e3   :  { %4132 = vmatpush.msra.mxu0 %v4064_v0  ;;  %v3969_v45 = vsel %vm3966_vm14, %v3968_v60, %v3964_v35 }
 0x8e4   :  { %v4061_v58 = vmul.f32 %v3969_v45, %v7391_v61  ;;  %v3242_v61 = vld [vmem:[#allocation5 + $0x3b0] sm:$0x3] }
 0x8e5   :  { %4133 = vmatpush.msra.mxu0 %v4063_v54 }
 0x8e7   :  { %4134 = vmatpush.msra.mxu0 %v4062_v18 }
 0x8e9   :  { %4135 = vmatpush.msra.mxu0 %v4061_v58 }
 0x8ea   :  { %4408 = vmatmul.msk.f32.vlgmr.msra.gmra.mxu0 %vm1155_vm0, %v3236_v40 }
 0x8f2   :  { %4409 = vmatmul.msk.f32.gmra.mxu0 %vm1155_vm0, %v3237_v33 }
 0x8fa   :  { %4410 = vmatmul.msk.f32.gmra.mxu0 %vm1155_vm0, %v3238_v63 }
 0x902   :  { %4411 = vmatmul.msk.f32.gmra.mxu0 %vm1155_vm0, %v3239_v43 }
 0x90a   :  { %4412 = vmatmul.msk.f32.gmra.mxu0 %vm1155_vm0, %v3240_v50 }
 0x90f   :  { %v4086_v62 = vpop.permute.xlu2 %4085 }
 0x912   :  { %4413 = vmatmul.msk.f32.gmra.mxu0 %vm1155_vm0, %v3241_v44 }
 0x917   :  { %v4078_v34 = vpop.permute.xlu2 %4077 }
 0x91a   :  { %4414 = vmatmul.msk.f32.gmra.mxu0 %vm1155_vm0, %v3242_v61 }
 0x92c   :  { %v4094_v22 = vpop.permute.xlu0 %4093 }
 0x92d   :  { %v4090_v20 = vpop.permute.xlu1 %4089 }
 0x934   :  { %v4074_v29 = vpop.permute.xlu0 %4073 }
 0x935   :  { %v4082_v57 = vpop.permute.xlu1 %4081 }
 0x93b   :  { %v4168_v17 = vpop.permute.xlu2 %4167 }
 0x93d   :  { %v4070_v38 = vpop.permute.xlu1 %4069 }
 0x967   :  { %v4137_v49 = vpop.f32.mrf.mxu0 }
 0x968   :  { %v4138_v9 = vadd.f32 %v4137_v49, %v4070_v38 }
 0x96f   :  { %v4140_v27 = vpop.f32.mrf.mxu0 }
 0x970   :  { %v4141_v4 = vadd.f32 %v4140_v27, %v4074_v29 }
 0x977   :  { %v4143_v11 = vpop.f32.mrf.mxu0 }
 0x978   :  { %v4144_v41 = vadd.f32 %v4143_v11, %v4078_v34 }
 0x97a   :  { %v4160_v48 = vadd.f32 %v4144_v41, %v7779_v59 }
 0x97f   :  { %v4146_v39 = vpop.f32.mrf.mxu0 }
 0x980   :  { %v4147_v19 = vadd.f32 %v4146_v39, %v4082_v57 }
 0x982   :  { %v4161_v51 = vadd.f32 %v4147_v19, %v6979_v7  ;;  %v4199_v7 = vmul.f32 %v7783_v26, %v7783_v26 }
 0x984   :  { %v4200_v6 = vperm.slane %v4199_v7, 0 }
 0x986   :  { %v4201_v56 = vmul.f32 %v4891_v55, %v4200_v6 }
 0x987   :  { %v4149_v23 = vpop.f32.mrf.mxu0 }
 0x988   :  { %v4150_v42 = vadd.f32 %v4149_v23, %v4086_v62 }
 0x98a   :  { %v4162_v15 = vadd.f32 %v4150_v42, %v6983_v24  ;;  %v7782_v24 = vld [vmem:[#allocation12_spill] sm:$0xff] }
 0x98b   :  { %4858 = vrcp.f32 %v7782_v24 }
 0x98f   :  { %v4152_v37 = vpop.f32.mrf.mxu0 }
 0x990   :  { %v4153_v53 = vadd.f32 %v4152_v37, %v4090_v20 }
 0x991   :  { %v4859_v14 = vpop.eup %4858 }
 0x992   :  { %v4163_v8 = vadd.f32 %v4153_v53, %v6987_v36  ;;  %v7781_v36 = vld [vmem:[#allocation19_spill] sm:$0xff]  ;;  %v4197_v32 = vperm.slane %v4859_v14, 0 }
 0x993   :  { %v4158_v21 = vadd.f32 %v4138_v9, %v7781_v36 }
 0x997   :  { %v4155_v25 = vpop.f32.mrf.mxu0 }
 0x998   :  { %v4156_v30 = vadd.f32 %v4155_v25, %v4094_v22 }
 0x99a   :  { %v4164_v16 = vadd.f32 %v4156_v30, %v6991_v5  ;;  %v7780_v5 = vld [vmem:[#allocation18_spill] sm:$0xff] }
 0x99b   :  { %v4159_v47 = vadd.f32 %v4141_v4, %v7780_v5 }
 0x99c   :  { %4415 = vmatpush.msk.msrb.mxu1 %vm7778_vm13, %v4164_v16 }
 0x99e   :  { %4186 = vmatpush.msrb.mxu1 %v4163_v8 }
 0x9a0   :  { %4187 = vmatpush.msrb.mxu1 %v4162_v15 }
 0x9a2   :  { %4188 = vmatpush.msrb.mxu1 %v4161_v51 }
 0x9a4   :  { %4189 = vmatpush.msrb.mxu1 %v4160_v48 }
 0x9a6   :  { %4190 = vmatpush.msrb.mxu1 %v4159_v47 }
 0x9a8   :  { %4191 = vmatpush.msrb.mxu1 %v4158_v21 }
 0x9a9   :  { %4416 = vmatmul.msk.f32.vlgmr.msrb.gmra.mxu1 %vm1155_vm0, %v4165_v3 }
 0xa26   :  { %v4193_v1 = vpop.f32.mrf.mxu1 }
 0xa27   :  { %v4194_v2 = vadd.f32 %v4193_v1, %v4168_v17 }
 0xa29   :  { %v4198_v12 = vmul.f32 %v4197_v32, %v4194_v2 }
 0xa2b   :  { %v4202_v46 = vsub.f32 %v4198_v12, %v4201_v56 }
 0xa2d   :  { %4203 = vst [vmem:[#allocation8] sm:$0x3] %v4202_v46 }
 0xa2e   :  { %4214 = dma.vmem_to_hbm [thread:$0]  %s4210_s2, 32, %s4212_s30, [#allocation4]  }
 0xa2f   :  { %4992 = dma.done.wait [#allocation4], 32  }
 0xa30   :  { %4993 = vsyncadd [#allocation4], 4294967264 }
 0xa31   :  { %4219 = vsyncpa [#allocation3], 1 }
 0xa32   :  { %4220 = vsyncpa [#allocation6], 1 }
 0xa33   :  { %4221 = vsyncpa [#allocation4], 1 }

</bundles_post_ra>
